<compile_context>
chip_gen: v7x
topology: tpu7x:2x2x1
jax: 0.10.0
libtpu: 0.0.40
codegen_flags: <defaults>
</compile_context>

<pallas_src>
import jax
import jax.numpy as jnp
from jax.experimental import pallas as pl
from jax.experimental.pallas import tpu as pltpu

LEAKY_SLOPE = 0.01   # nn.LeakyReLU default
BN_EPS = 1e-5        # nn.BatchNorm1d default

# Hidden-layer output widths of the Sequential (layers 0..7).
HIDDEN_WIDTHS = (200, 400, 400, 400, 400, 400, 400, 200)
NUM_HIDDEN = len(HIDDEN_WIDTHS)
MAX_WIDTH = max(HIDDEN_WIDTHS)           # gamma/beta packing width (400)
N_MID = 5                                 # layers 2..6 are (400,400)


# ---------------------------------------------------------------------------
# Fused kernel: whole Generator forward in one invocation
# ---------------------------------------------------------------------------
def _generator_fused_kernel(x_ref, w0_ref, w1_ref, wmid_ref, w7_ref,
                            gam_ref, bet_ref, wout_ref, bout_ref, o_ref):
    h = x_ref[...]                                  # (N, latent) f32
    inv_n = jnp.float32(1.0 / h.shape[0])

    def hidden_layer(h, w_bf16, layer, f_out):
        # Linear (bias omitted: exactly cancelled by the BN mean subtraction).
        # bf16 operands feed the MXU; accumulation stays f32.
        z = jnp.dot(h.astype(jnp.bfloat16), w_bf16,
                    preferred_element_type=jnp.float32)
        # One-pass training-mode BatchNorm1d statistics (biased variance), f32.
        s = jnp.sum(z, axis=0, keepdims=True)
        sq = jnp.sum(z * z, axis=0, keepdims=True)
        mean = s * inv_n
        var = sq * inv_n - mean * mean
        # Static slices of the packed (8, 400) gamma/beta arrays.
        g = gam_ref[layer:layer + 1, :f_out]
        b = bet_ref[layer:layer + 1, :f_out]
        # Fold gamma/beta into one scale/shift -> single FMA over z.
        scale = g * jax.lax.rsqrt(var + BN_EPS)     # rsqrt -> EUP
        shift = b - mean * scale
        y = z * scale + shift
        # LeakyReLU(0.01): max(y, slope*y) since slope in [0, 1].
        return jnp.maximum(y, LEAKY_SLOPE * y)

    h = hidden_layer(h, w0_ref[...], 0, HIDDEN_WIDTHS[0])          # latent->200
    h = hidden_layer(h, w1_ref[...], 1, HIDDEN_WIDTHS[1])          # 200->400
    for layer in range(2, 2 + N_MID):                              # 400->400 x5
        h = hidden_layer(h, wmid_ref[layer - 2], layer, HIDDEN_WIDTHS[layer])
    h = hidden_layer(h, w7_ref[...], 7, HIDDEN_WIDTHS[7])          # 400->200

    # Final Linear(200, 6) with bias, f32 output.
    z = jnp.dot(h.astype(jnp.bfloat16), wout_ref[...],
                preferred_element_type=jnp.float32)
    o_ref[...] = (z + bout_ref[...]).astype(o_ref.dtype)


# ---------------------------------------------------------------------------
# Wrapper
# ---------------------------------------------------------------------------
def _full_spec(shape):
    # whole array as a single VMEM block (no grid)
    return pl.BlockSpec(shape, lambda: (0,) * len(shape))


def generator_pallas(x, packed_params):
    """x: (N, latent).  packed_params: output of kernel_operands()."""
    n = x.shape[0]
    out_dim = packed_params[-1].shape[-1]
    operands = [x] + list(packed_params)
    return pl.pallas_call(
        _generator_fused_kernel,
        out_shape=jax.ShapeDtypeStruct((n, out_dim), jnp.float32),
        in_specs=[_full_spec(a.shape) for a in operands],
        out_specs=_full_spec((n, out_dim)),
        compiler_params=pltpu.CompilerParams(
            vmem_limit_bytes=32 * 1024 * 1024),
    )(*operands)


# ---------------------------------------------------------------------------
# Parameter construction (deterministic, synthetic)
# ---------------------------------------------------------------------------
def init_generator_params(latent_dim, key):
    # Layer widths of the Sequential in the PyTorch module.
    dims = [latent_dim] + list(HIDDEN_WIDTHS) + [6]
    layers = []
    for i in range(len(dims) - 1):
        f_in, f_out = dims[i], dims[i + 1]
        key, kw, kb, kg, kbeta = jax.random.split(key, 5)
        bound = 1.0 / float(f_in) ** 0.5
        # Weight stored as (f_in, f_out) == PyTorch weight.T, quantized to bf16
        # (halves the HBM weight-DMA bytes, the kernel's dominant cost).
        w = jax.random.uniform(kw, (f_in, f_out), jnp.float32, -bound, bound)
        w = w.astype(jnp.bfloat16)
        b = jax.random.uniform(kb, (1, f_out), jnp.float32, -bound, bound)
        if i < len(dims) - 2:
            # PyTorch init is gamma=1, beta=0; randomize slightly so the
            # correctness check exercises the folded affine path.
            gamma = jax.random.uniform(kg, (1, f_out), jnp.float32, 0.5, 1.5)
            beta = jax.random.uniform(kbeta, (1, f_out), jnp.float32, -0.5, 0.5)
            layers.append(("hidden", w, b, gamma, beta))
        else:
            layers.append(("final", w, b))
    return layers


def kernel_operands(layers):
    """Pack params for the fused kernel (hidden Linear biases dropped)."""
    hidden = [p for p in layers if p[0] == "hidden"]
    final = layers[-1]

    gam = jnp.zeros((NUM_HIDDEN, MAX_WIDTH), jnp.float32)
    bet = jnp.zeros((NUM_HIDDEN, MAX_WIDTH), jnp.float32)
    for i, (_, _w, _b, g, beta) in enumerate(hidden):
        f = g.shape[-1]
        gam = gam.at[i, :f].set(g[0])
        bet = bet.at[i, :f].set(beta[0])

    w0 = hidden[0][1]                                     # (latent, 200) bf16
    w1 = hidden[1][1]                                     # (200, 400)    bf16
    wmid = jnp.stack([hidden[i][1] for i in range(2, 2 + N_MID)])  # (5,400,400)
    w7 = hidden[7][1]                                     # (400, 200)    bf16
    w_out, b_out = final[1], final[2]                     # (200, 6) bf16, (1,6) f32
    return [w0, w1, wmid, w7, gam, bet, w_out, b_out]


# ---------------------------------------------------------------------------
# Reference (pure JAX, faithful to the module incl. hidden biases; uses the
# same bf16 weights / bf16 MXU inputs so it shares the kernel's quantization)
# ---------------------------------------------------------------------------
def generator_reference(x, layers):
    h = x
    for p in layers:
        if p[0] == "hidden":
            _, w, b, g, beta = p
            z = jnp.dot(h.astype(jnp.bfloat16), w,
                        preferred_element_type=jnp.float32) + b
            mean = jnp.mean(z, axis=0, keepdims=True)
            var = jnp.mean((z - mean) ** 2, axis=0, keepdims=True)
            zn = (z - mean) * jax.lax.rsqrt(var + BN_EPS) * g + beta
            h = jnp.where(zn >= 0.0, zn, LEAKY_SLOPE * zn)
        else:
            _, w, b = p
            h = jnp.dot(h.astype(jnp.bfloat16), w,
                        preferred_element_type=jnp.float32) + b
    return h


if __name__ == "__main__":
    latent_dim = 32
    # BatchNorm1d (train mode) needs batch > 1; 8 fills the sublanes.  For real
    # sampling workloads, use a much larger batch per call (256-512) to
    # amortize the per-call weight DMA; activations still fit VMEM easily.
    batch = 8

    key = jax.random.PRNGKey(0)
    key, kx = jax.random.split(key)
    x = jax.random.normal(kx, (batch, latent_dim), jnp.float32)

    layers = init_generator_params(latent_dim, key)
    ops = kernel_operands(layers)

    fwd = jax.jit(lambda x_, *p: generator_pallas(x_, p))
    out = jax.block_until_ready(fwd(x, *ops))

    ref = generator_reference(x, layers)
    assert out.shape == (batch, 6), out.shape
    max_err = float(jnp.max(jnp.abs(out - ref)))
    # 5e-3 tolerance: kernel and reference share the bf16 weights, but tiny
    # f32 roundoff differences (bias cancellation, MXU summation order) can
    # flip an occasional bf16 activation rounding across 8 BN layers.
    assert jnp.allclose(out, ref, atol=5e-3, rtol=5e-3), max_err

    print("KERNEL_OK")
</pallas_src>

<mosaic_0001>
module attributes {stable_mosaic.version = 11 : i64} {
  func.func @_generator_fused_kernel(%arg0: memref<8x32xf32, #tpu.memory_space<vmem>>, %arg1: memref<32x200xbf16, #tpu.memory_space<vmem>>, %arg2: memref<200x400xbf16, #tpu.memory_space<vmem>>, %arg3: memref<5x400x400xbf16, #tpu.memory_space<vmem>>, %arg4: memref<400x200xbf16, #tpu.memory_space<vmem>>, %arg5: memref<8x400xf32, #tpu.memory_space<vmem>>, %arg6: memref<8x400xf32, #tpu.memory_space<vmem>>, %arg7: memref<200x6xbf16, #tpu.memory_space<vmem>>, %arg8: memref<1x6xf32, #tpu.memory_space<vmem>>, %arg9: memref<8x6xf32, #tpu.memory_space<vmem>>) attributes {dimension_semantics = [], scalar_prefetch = 0 : i64, scratch_operands = 0 : i64, tpu.core_type = #tpu.core_type<tc>} {
    %c0 = arith.constant 0 : index
    %c0_0 = arith.constant 0 : index
    %0 = vector.load %arg0[%c0, %c0_0] : memref<8x32xf32, #tpu.memory_space<vmem>>, vector<8x32xf32>
    %c0_1 = arith.constant 0 : index
    %c0_2 = arith.constant 0 : index
    %1 = vector.load %arg1[%c0_1, %c0_2] : memref<32x200xbf16, #tpu.memory_space<vmem>>, vector<32x200xbf16>
    %2 = arith.truncf %0 : vector<8x32xf32> to vector<8x32xbf16>
    %cst = arith.constant dense<0.000000e+00> : vector<8x200xf32>
    %3 = tpu.matmul %2, %1, %cst {dimension_numbers = #tpu.dot_dimension_numbers<[1], [0], [0], [1], [0, 0, 1, 1], [], []>} : vector<8x32xbf16>, vector<32x200xbf16>, vector<8x200xf32> -> vector<8x200xf32>
    %cst_3 = arith.constant dense<0.000000e+00> : vector<200xf32>
    %4 = vector.multi_reduction <add>, %3, %cst_3 [0] : vector<8x200xf32> to vector<200xf32>
    %5 = vector.shape_cast %4 : vector<200xf32> to vector<1x200xf32>
    %6 = arith.mulf %3, %3 : vector<8x200xf32>
    %cst_4 = arith.constant dense<0.000000e+00> : vector<200xf32>
    %7 = vector.multi_reduction <add>, %6, %cst_4 [0] : vector<8x200xf32> to vector<200xf32>
    %8 = vector.shape_cast %7 : vector<200xf32> to vector<1x200xf32>
    %cst_5 = arith.constant 1.250000e-01 : f32
    %9 = vector.broadcast %cst_5 : f32 to vector<1x200xf32>
    %10 = arith.mulf %5, %9 : vector<1x200xf32>
    %cst_6 = arith.constant 1.250000e-01 : f32
    %11 = vector.broadcast %cst_6 : f32 to vector<1x200xf32>
    %12 = arith.mulf %8, %11 : vector<1x200xf32>
    %13 = arith.mulf %10, %10 : vector<1x200xf32>
    %14 = arith.subf %12, %13 : vector<1x200xf32>
    %c0_7 = arith.constant 0 : index
    %c0_8 = arith.constant 0 : index
    %15 = vector.load %arg5[%c0_7, %c0_8] : memref<8x400xf32, #tpu.memory_space<vmem>>, vector<1x200xf32>
    %c0_9 = arith.constant 0 : index
    %c0_10 = arith.constant 0 : index
    %16 = vector.load %arg6[%c0_9, %c0_10] : memref<8x400xf32, #tpu.memory_space<vmem>>, vector<1x200xf32>
    %cst_11 = arith.constant 9.99999974E-6 : f32
    %17 = vector.broadcast %cst_11 : f32 to vector<1x200xf32>
    %18 = arith.addf %14, %17 : vector<1x200xf32>
    %19 = math.rsqrt %18 : vector<1x200xf32>
    %20 = arith.mulf %15, %19 : vector<1x200xf32>
    %21 = arith.mulf %10, %20 : vector<1x200xf32>
    %22 = arith.subf %16, %21 : vector<1x200xf32>
    %23 = vector.broadcast %20 : vector<1x200xf32> to vector<8x200xf32>
    %24 = arith.mulf %3, %23 : vector<8x200xf32>
    %25 = vector.broadcast %22 : vector<1x200xf32> to vector<8x200xf32>
    %26 = arith.addf %24, %25 : vector<8x200xf32>
    %cst_12 = arith.constant 0.00999999977 : f32
    %27 = vector.broadcast %cst_12 : f32 to vector<8x200xf32>
    %28 = arith.mulf %27, %26 : vector<8x200xf32>
    %29 = arith.maximumf %26, %28 : vector<8x200xf32>
    %c0_13 = arith.constant 0 : index
    %c0_14 = arith.constant 0 : index
    %30 = vector.load %arg2[%c0_13, %c0_14] : memref<200x400xbf16, #tpu.memory_space<vmem>>, vector<200x400xbf16>
    %31 = arith.truncf %29 : vector<8x200xf32> to vector<8x200xbf16>
    %cst_15 = arith.constant dense<0.000000e+00> : vector<8x400xf32>
    %32 = tpu.matmul %31, %30, %cst_15 {dimension_numbers = #tpu.dot_dimension_numbers<[1], [0], [0], [1], [0, 0, 1, 1], [], []>} : vector<8x200xbf16>, vector<200x400xbf16>, vector<8x400xf32> -> vector<8x400xf32>
    %cst_16 = arith.constant dense<0.000000e+00> : vector<400xf32>
    %33 = vector.multi_reduction <add>, %32, %cst_16 [0] : vector<8x400xf32> to vector<400xf32>
    %34 = vector.shape_cast %33 : vector<400xf32> to vector<1x400xf32>
    %35 = arith.mulf %32, %32 : vector<8x400xf32>
    %cst_17 = arith.constant dense<0.000000e+00> : vector<400xf32>
    %36 = vector.multi_reduction <add>, %35, %cst_17 [0] : vector<8x400xf32> to vector<400xf32>
    %37 = vector.shape_cast %36 : vector<400xf32> to vector<1x400xf32>
    %cst_18 = arith.constant 1.250000e-01 : f32
    %38 = vector.broadcast %cst_18 : f32 to vector<1x400xf32>
    %39 = arith.mulf %34, %38 : vector<1x400xf32>
    %cst_19 = arith.constant 1.250000e-01 : f32
    %40 = vector.broadcast %cst_19 : f32 to vector<1x400xf32>
    %41 = arith.mulf %37, %40 : vector<1x400xf32>
    %42 = arith.mulf %39, %39 : vector<1x400xf32>
    %43 = arith.subf %41, %42 : vector<1x400xf32>
    %c1 = arith.constant 1 : index
    %c0_20 = arith.constant 0 : index
    %44 = vector.load %arg5[%c1, %c0_20] : memref<8x400xf32, #tpu.memory_space<vmem>>, vector<1x400xf32>
    %c1_21 = arith.constant 1 : index
    %c0_22 = arith.constant 0 : index
    %45 = vector.load %arg6[%c1_21, %c0_22] : memref<8x400xf32, #tpu.memory_space<vmem>>, vector<1x400xf32>
    %cst_23 = arith.constant 9.99999974E-6 : f32
    %46 = vector.broadcast %cst_23 : f32 to vector<1x400xf32>
    %47 = arith.addf %43, %46 : vector<1x400xf32>
    %48 = math.rsqrt %47 : vector<1x400xf32>
    %49 = arith.mulf %44, %48 : vector<1x400xf32>
    %50 = arith.mulf %39, %49 : vector<1x400xf32>
    %51 = arith.subf %45, %50 : vector<1x400xf32>
    %52 = vector.broadcast %49 : vector<1x400xf32> to vector<8x400xf32>
    %53 = arith.mulf %32, %52 : vector<8x400xf32>
    %54 = vector.broadcast %51 : vector<1x400xf32> to vector<8x400xf32>
    %55 = arith.addf %53, %54 : vector<8x400xf32>
    %cst_24 = arith.constant 0.00999999977 : f32
    %56 = vector.broadcast %cst_24 : f32 to vector<8x400xf32>
    %57 = arith.mulf %56, %55 : vector<8x400xf32>
    %58 = arith.maximumf %55, %57 : vector<8x400xf32>
    %c0_25 = arith.constant 0 : index
    %c0_26 = arith.constant 0 : index
    %c0_27 = arith.constant 0 : index
    %59 = vector.load %arg3[%c0_25, %c0_26, %c0_27] : memref<5x400x400xbf16, #tpu.memory_space<vmem>>, vector<1x400x400xbf16>
    %60 = vector.shape_cast %59 : vector<1x400x400xbf16> to vector<400x400xbf16>
    %61 = arith.truncf %58 : vector<8x400xf32> to vector<8x400xbf16>
    %cst_28 = arith.constant dense<0.000000e+00> : vector<8x400xf32>
    %62 = tpu.matmul %61, %60, %cst_28 {dimension_numbers = #tpu.dot_dimension_numbers<[1], [0], [0], [1], [0, 0, 1, 1], [], []>} : vector<8x400xbf16>, vector<400x400xbf16>, vector<8x400xf32> -> vector<8x400xf32>
    %cst_29 = arith.constant dense<0.000000e+00> : vector<400xf32>
    %63 = vector.multi_reduction <add>, %62, %cst_29 [0] : vector<8x400xf32> to vector<400xf32>
    %64 = vector.shape_cast %63 : vector<400xf32> to vector<1x400xf32>
    %65 = arith.mulf %62, %62 : vector<8x400xf32>
    %cst_30 = arith.constant dense<0.000000e+00> : vector<400xf32>
    %66 = vector.multi_reduction <add>, %65, %cst_30 [0] : vector<8x400xf32> to vector<400xf32>
    %67 = vector.shape_cast %66 : vector<400xf32> to vector<1x400xf32>
    %cst_31 = arith.constant 1.250000e-01 : f32
    %68 = vector.broadcast %cst_31 : f32 to vector<1x400xf32>
    %69 = arith.mulf %64, %68 : vector<1x400xf32>
    %cst_32 = arith.constant 1.250000e-01 : f32
    %70 = vector.broadcast %cst_32 : f32 to vector<1x400xf32>
    %71 = arith.mulf %67, %70 : vector<1x400xf32>
    %72 = arith.mulf %69, %69 : vector<1x400xf32>
    %73 = arith.subf %71, %72 : vector<1x400xf32>
    %c2 = arith.constant 2 : index
    %c0_33 = arith.constant 0 : index
    %74 = vector.load %arg5[%c2, %c0_33] : memref<8x400xf32, #tpu.memory_space<vmem>>, vector<1x400xf32>
    %c2_34 = arith.constant 2 : index
    %c0_35 = arith.constant 0 : index
    %75 = vector.load %arg6[%c2_34, %c0_35] : memref<8x400xf32, #tpu.memory_space<vmem>>, vector<1x400xf32>
    %cst_36 = arith.constant 9.99999974E-6 : f32
    %76 = vector.broadcast %cst_36 : f32 to vector<1x400xf32>
    %77 = arith.addf %73, %76 : vector<1x400xf32>
    %78 = math.rsqrt %77 : vector<1x400xf32>
    %79 = arith.mulf %74, %78 : vector<1x400xf32>
    %80 = arith.mulf %69, %79 : vector<1x400xf32>
    %81 = arith.subf %75, %80 : vector<1x400xf32>
    %82 = vector.broadcast %79 : vector<1x400xf32> to vector<8x400xf32>
    %83 = arith.mulf %62, %82 : vector<8x400xf32>
    %84 = vector.broadcast %81 : vector<1x400xf32> to vector<8x400xf32>
    %85 = arith.addf %83, %84 : vector<8x400xf32>
    %cst_37 = arith.constant 0.00999999977 : f32
    %86 = vector.broadcast %cst_37 : f32 to vector<8x400xf32>
    %87 = arith.mulf %86, %85 : vector<8x400xf32>
    %88 = arith.maximumf %85, %87 : vector<8x400xf32>
    %c1_38 = arith.constant 1 : index
    %c0_39 = arith.constant 0 : index
    %c0_40 = arith.constant 0 : index
    %89 = vector.load %arg3[%c1_38, %c0_39, %c0_40] : memref<5x400x400xbf16, #tpu.memory_space<vmem>>, vector<1x400x400xbf16>
    %90 = vector.shape_cast %89 : vector<1x400x400xbf16> to vector<400x400xbf16>
    %91 = arith.truncf %88 : vector<8x400xf32> to vector<8x400xbf16>
    %cst_41 = arith.constant dense<0.000000e+00> : vector<8x400xf32>
    %92 = tpu.matmul %91, %90, %cst_41 {dimension_numbers = #tpu.dot_dimension_numbers<[1], [0], [0], [1], [0, 0, 1, 1], [], []>} : vector<8x400xbf16>, vector<400x400xbf16>, vector<8x400xf32> -> vector<8x400xf32>
    %cst_42 = arith.constant dense<0.000000e+00> : vector<400xf32>
    %93 = vector.multi_reduction <add>, %92, %cst_42 [0] : vector<8x400xf32> to vector<400xf32>
    %94 = vector.shape_cast %93 : vector<400xf32> to vector<1x400xf32>
    %95 = arith.mulf %92, %92 : vector<8x400xf32>
    %cst_43 = arith.constant dense<0.000000e+00> : vector<400xf32>
    %96 = vector.multi_reduction <add>, %95, %cst_43 [0] : vector<8x400xf32> to vector<400xf32>
    %97 = vector.shape_cast %96 : vector<400xf32> to vector<1x400xf32>
    %cst_44 = arith.constant 1.250000e-01 : f32
    %98 = vector.broadcast %cst_44 : f32 to vector<1x400xf32>
    %99 = arith.mulf %94, %98 : vector<1x400xf32>
    %cst_45 = arith.constant 1.250000e-01 : f32
    %100 = vector.broadcast %cst_45 : f32 to vector<1x400xf32>
    %101 = arith.mulf %97, %100 : vector<1x400xf32>
    %102 = arith.mulf %99, %99 : vector<1x400xf32>
    %103 = arith.subf %101, %102 : vector<1x400xf32>
    %c3 = arith.constant 3 : index
    %c0_46 = arith.constant 0 : index
    %104 = vector.load %arg5[%c3, %c0_46] : memref<8x400xf32, #tpu.memory_space<vmem>>, vector<1x400xf32>
    %c3_47 = arith.constant 3 : index
    %c0_48 = arith.constant 0 : index
    %105 = vector.load %arg6[%c3_47, %c0_48] : memref<8x400xf32, #tpu.memory_space<vmem>>, vector<1x400xf32>
    %cst_49 = arith.constant 9.99999974E-6 : f32
    %106 = vector.broadcast %cst_49 : f32 to vector<1x400xf32>
    %107 = arith.addf %103, %106 : vector<1x400xf32>
    %108 = math.rsqrt %107 : vector<1x400xf32>
    %109 = arith.mulf %104, %108 : vector<1x400xf32>
    %110 = arith.mulf %99, %109 : vector<1x400xf32>
    %111 = arith.subf %105, %110 : vector<1x400xf32>
    %112 = vector.broadcast %109 : vector<1x400xf32> to vector<8x400xf32>
    %113 = arith.mulf %92, %112 : vector<8x400xf32>
    %114 = vector.broadcast %111 : vector<1x400xf32> to vector<8x400xf32>
    %115 = arith.addf %113, %114 : vector<8x400xf32>
    %cst_50 = arith.constant 0.00999999977 : f32
    %116 = vector.broadcast %cst_50 : f32 to vector<8x400xf32>
    %117 = arith.mulf %116, %115 : vector<8x400xf32>
    %118 = arith.maximumf %115, %117 : vector<8x400xf32>
    %c2_51 = arith.constant 2 : index
    %c0_52 = arith.constant 0 : index
    %c0_53 = arith.constant 0 : index
    %119 = vector.load %arg3[%c2_51, %c0_52, %c0_53] : memref<5x400x400xbf16, #tpu.memory_space<vmem>>, vector<1x400x400xbf16>
    %120 = vector.shape_cast %119 : vector<1x400x400xbf16> to vector<400x400xbf16>
    %121 = arith.truncf %118 : vector<8x400xf32> to vector<8x400xbf16>
    %cst_54 = arith.constant dense<0.000000e+00> : vector<8x400xf32>
    %122 = tpu.matmul %121, %120, %cst_54 {dimension_numbers = #tpu.dot_dimension_numbers<[1], [0], [0], [1], [0, 0, 1, 1], [], []>} : vector<8x400xbf16>, vector<400x400xbf16>, vector<8x400xf32> -> vector<8x400xf32>
    %cst_55 = arith.constant dense<0.000000e+00> : vector<400xf32>
    %123 = vector.multi_reduction <add>, %122, %cst_55 [0] : vector<8x400xf32> to vector<400xf32>
    %124 = vector.shape_cast %123 : vector<400xf32> to vector<1x400xf32>
    %125 = arith.mulf %122, %122 : vector<8x400xf32>
    %cst_56 = arith.constant dense<0.000000e+00> : vector<400xf32>
    %126 = vector.multi_reduction <add>, %125, %cst_56 [0] : vector<8x400xf32> to vector<400xf32>
    %127 = vector.shape_cast %126 : vector<400xf32> to vector<1x400xf32>
    %cst_57 = arith.constant 1.250000e-01 : f32
    %128 = vector.broadcast %cst_57 : f32 to vector<1x400xf32>
    %129 = arith.mulf %124, %128 : vector<1x400xf32>
    %cst_58 = arith.constant 1.250000e-01 : f32
    %130 = vector.broadcast %cst_58 : f32 to vector<1x400xf32>
    %131 = arith.mulf %127, %130 : vector<1x400xf32>
    %132 = arith.mulf %129, %129 : vector<1x400xf32>
    %133 = arith.subf %131, %132 : vector<1x400xf32>
    %c4 = arith.constant 4 : index
    %c0_59 = arith.constant 0 : index
    %134 = vector.load %arg5[%c4, %c0_59] : memref<8x400xf32, #tpu.memory_space<vmem>>, vector<1x400xf32>
    %c4_60 = arith.constant 4 : index
    %c0_61 = arith.constant 0 : index
    %135 = vector.load %arg6[%c4_60, %c0_61] : memref<8x400xf32, #tpu.memory_space<vmem>>, vector<1x400xf32>
    %cst_62 = arith.constant 9.99999974E-6 : f32
    %136 = vector.broadcast %cst_62 : f32 to vector<1x400xf32>
    %137 = arith.addf %133, %136 : vector<1x400xf32>
    %138 = math.rsqrt %137 : vector<1x400xf32>
    %139 = arith.mulf %134, %138 : vector<1x400xf32>
    %140 = arith.mulf %129, %139 : vector<1x400xf32>
    %141 = arith.subf %135, %140 : vector<1x400xf32>
    %142 = vector.broadcast %139 : vector<1x400xf32> to vector<8x400xf32>
    %143 = arith.mulf %122, %142 : vector<8x400xf32>
    %144 = vector.broadcast %141 : vector<1x400xf32> to vector<8x400xf32>
    %145 = arith.addf %143, %144 : vector<8x400xf32>
    %cst_63 = arith.constant 0.00999999977 : f32
    %146 = vector.broadcast %cst_63 : f32 to vector<8x400xf32>
    %147 = arith.mulf %146, %145 : vector<8x400xf32>
    %148 = arith.maximumf %145, %147 : vector<8x400xf32>
    %c3_64 = arith.constant 3 : index
    %c0_65 = arith.constant 0 : index
    %c0_66 = arith.constant 0 : index
    %149 = vector.load %arg3[%c3_64, %c0_65, %c0_66] : memref<5x400x400xbf16, #tpu.memory_space<vmem>>, vector<1x400x400xbf16>
    %150 = vector.shape_cast %149 : vector<1x400x400xbf16> to vector<400x400xbf16>
    %151 = arith.truncf %148 : vector<8x400xf32> to vector<8x400xbf16>
    %cst_67 = arith.constant dense<0.000000e+00> : vector<8x400xf32>
    %152 = tpu.matmul %151, %150, %cst_67 {dimension_numbers = #tpu.dot_dimension_numbers<[1], [0], [0], [1], [0, 0, 1, 1], [], []>} : vector<8x400xbf16>, vector<400x400xbf16>, vector<8x400xf32> -> vector<8x400xf32>
    %cst_68 = arith.constant dense<0.000000e+00> : vector<400xf32>
    %153 = vector.multi_reduction <add>, %152, %cst_68 [0] : vector<8x400xf32> to vector<400xf32>
    %154 = vector.shape_cast %153 : vector<400xf32> to vector<1x400xf32>
    %155 = arith.mulf %152, %152 : vector<8x400xf32>
    %cst_69 = arith.constant dense<0.000000e+00> : vector<400xf32>
    %156 = vector.multi_reduction <add>, %155, %cst_69 [0] : vector<8x400xf32> to vector<400xf32>
    %157 = vector.shape_cast %156 : vector<400xf32> to vector<1x400xf32>
    %cst_70 = arith.constant 1.250000e-01 : f32
    %158 = vector.broadcast %cst_70 : f32 to vector<1x400xf32>
    %159 = arith.mulf %154, %158 : vector<1x400xf32>
    %cst_71 = arith.constant 1.250000e-01 : f32
    %160 = vector.broadcast %cst_71 : f32 to vector<1x400xf32>
    %161 = arith.mulf %157, %160 : vector<1x400xf32>
    %162 = arith.mulf %159, %159 : vector<1x400xf32>
    %163 = arith.subf %161, %162 : vector<1x400xf32>
    %c5 = arith.constant 5 : index
    %c0_72 = arith.constant 0 : index
    %164 = vector.load %arg5[%c5, %c0_72] : memref<8x400xf32, #tpu.memory_space<vmem>>, vector<1x400xf32>
    %c5_73 = arith.constant 5 : index
    %c0_74 = arith.constant 0 : index
    %165 = vector.load %arg6[%c5_73, %c0_74] : memref<8x400xf32, #tpu.memory_space<vmem>>, vector<1x400xf32>
    %cst_75 = arith.constant 9.99999974E-6 : f32
    %166 = vector.broadcast %cst_75 : f32 to vector<1x400xf32>
    %167 = arith.addf %163, %166 : vector<1x400xf32>
    %168 = math.rsqrt %167 : vector<1x400xf32>
    %169 = arith.mulf %164, %168 : vector<1x400xf32>
    %170 = arith.mulf %159, %169 : vector<1x400xf32>
    %171 = arith.subf %165, %170 : vector<1x400xf32>
    %172 = vector.broadcast %169 : vector<1x400xf32> to vector<8x400xf32>
    %173 = arith.mulf %152, %172 : vector<8x400xf32>
    %174 = vector.broadcast %171 : vector<1x400xf32> to vector<8x400xf32>
    %175 = arith.addf %173, %174 : vector<8x400xf32>
    %cst_76 = arith.constant 0.00999999977 : f32
    %176 = vector.broadcast %cst_76 : f32 to vector<8x400xf32>
    %177 = arith.mulf %176, %175 : vector<8x400xf32>
    %178 = arith.maximumf %175, %177 : vector<8x400xf32>
    %c4_77 = arith.constant 4 : index
    %c0_78 = arith.constant 0 : index
    %c0_79 = arith.constant 0 : index
    %179 = vector.load %arg3[%c4_77, %c0_78, %c0_79] : memref<5x400x400xbf16, #tpu.memory_space<vmem>>, vector<1x400x400xbf16>
    %180 = vector.shape_cast %179 : vector<1x400x400xbf16> to vector<400x400xbf16>
    %181 = arith.truncf %178 : vector<8x400xf32> to vector<8x400xbf16>
    %cst_80 = arith.constant dense<0.000000e+00> : vector<8x400xf32>
    %182 = tpu.matmul %181, %180, %cst_80 {dimension_numbers = #tpu.dot_dimension_numbers<[1], [0], [0], [1], [0, 0, 1, 1], [], []>} : vector<8x400xbf16>, vector<400x400xbf16>, vector<8x400xf32> -> vector<8x400xf32>
    %cst_81 = arith.constant dense<0.000000e+00> : vector<400xf32>
    %183 = vector.multi_reduction <add>, %182, %cst_81 [0] : vector<8x400xf32> to vector<400xf32>
    %184 = vector.shape_cast %183 : vector<400xf32> to vector<1x400xf32>
    %185 = arith.mulf %182, %182 : vector<8x400xf32>
    %cst_82 = arith.constant dense<0.000000e+00> : vector<400xf32>
    %186 = vector.multi_reduction <add>, %185, %cst_82 [0] : vector<8x400xf32> to vector<400xf32>
    %187 = vector.shape_cast %186 : vector<400xf32> to vector<1x400xf32>
    %cst_83 = arith.constant 1.250000e-01 : f32
    %188 = vector.broadcast %cst_83 : f32 to vector<1x400xf32>
    %189 = arith.mulf %184, %188 : vector<1x400xf32>
    %cst_84 = arith.constant 1.250000e-01 : f32
    %190 = vector.broadcast %cst_84 : f32 to vector<1x400xf32>
    %191 = arith.mulf %187, %190 : vector<1x400xf32>
    %192 = arith.mulf %189, %189 : vector<1x400xf32>
    %193 = arith.subf %191, %192 : vector<1x400xf32>
    %c6 = arith.constant 6 : index
    %c0_85 = arith.constant 0 : index
    %194 = vector.load %arg5[%c6, %c0_85] : memref<8x400xf32, #tpu.memory_space<vmem>>, vector<1x400xf32>
    %c6_86 = arith.constant 6 : index
    %c0_87 = arith.constant 0 : index
    %195 = vector.load %arg6[%c6_86, %c0_87] : memref<8x400xf32, #tpu.memory_space<vmem>>, vector<1x400xf32>
    %cst_88 = arith.constant 9.99999974E-6 : f32
    %196 = vector.broadcast %cst_88 : f32 to vector<1x400xf32>
    %197 = arith.addf %193, %196 : vector<1x400xf32>
    %198 = math.rsqrt %197 : vector<1x400xf32>
    %199 = arith.mulf %194, %198 : vector<1x400xf32>
    %200 = arith.mulf %189, %199 : vector<1x400xf32>
    %201 = arith.subf %195, %200 : vector<1x400xf32>
    %202 = vector.broadcast %199 : vector<1x400xf32> to vector<8x400xf32>
    %203 = arith.mulf %182, %202 : vector<8x400xf32>
    %204 = vector.broadcast %201 : vector<1x400xf32> to vector<8x400xf32>
    %205 = arith.addf %203, %204 : vector<8x400xf32>
    %cst_89 = arith.constant 0.00999999977 : f32
    %206 = vector.broadcast %cst_89 : f32 to vector<8x400xf32>
    %207 = arith.mulf %206, %205 : vector<8x400xf32>
    %208 = arith.maximumf %205, %207 : vector<8x400xf32>
    %c0_90 = arith.constant 0 : index
    %c0_91 = arith.constant 0 : index
    %209 = vector.load %arg4[%c0_90, %c0_91] : memref<400x200xbf16, #tpu.memory_space<vmem>>, vector<400x200xbf16>
    %210 = arith.truncf %208 : vector<8x400xf32> to vector<8x400xbf16>
    %cst_92 = arith.constant dense<0.000000e+00> : vector<8x200xf32>
    %211 = tpu.matmul %210, %209, %cst_92 {dimension_numbers = #tpu.dot_dimension_numbers<[1], [0], [0], [1], [0, 0, 1, 1], [], []>} : vector<8x400xbf16>, vector<400x200xbf16>, vector<8x200xf32> -> vector<8x200xf32>
    %cst_93 = arith.constant dense<0.000000e+00> : vector<200xf32>
    %212 = vector.multi_reduction <add>, %211, %cst_93 [0] : vector<8x200xf32> to vector<200xf32>
    %213 = vector.shape_cast %212 : vector<200xf32> to vector<1x200xf32>
    %214 = arith.mulf %211, %211 : vector<8x200xf32>
    %cst_94 = arith.constant dense<0.000000e+00> : vector<200xf32>
    %215 = vector.multi_reduction <add>, %214, %cst_94 [0] : vector<8x200xf32> to vector<200xf32>
    %216 = vector.shape_cast %215 : vector<200xf32> to vector<1x200xf32>
    %cst_95 = arith.constant 1.250000e-01 : f32
    %217 = vector.broadcast %cst_95 : f32 to vector<1x200xf32>
    %218 = arith.mulf %213, %217 : vector<1x200xf32>
    %cst_96 = arith.constant 1.250000e-01 : f32
    %219 = vector.broadcast %cst_96 : f32 to vector<1x200xf32>
    %220 = arith.mulf %216, %219 : vector<1x200xf32>
    %221 = arith.mulf %218, %218 : vector<1x200xf32>
    %222 = arith.subf %220, %221 : vector<1x200xf32>
    %c7 = arith.constant 7 : index
    %c0_97 = arith.constant 0 : index
    %223 = vector.load %arg5[%c7, %c0_97] : memref<8x400xf32, #tpu.memory_space<vmem>>, vector<1x200xf32>
    %c7_98 = arith.constant 7 : index
    %c0_99 = arith.constant 0 : index
    %224 = vector.load %arg6[%c7_98, %c0_99] : memref<8x400xf32, #tpu.memory_space<vmem>>, vector<1x200xf32>
    %cst_100 = arith.constant 9.99999974E-6 : f32
    %225 = vector.broadcast %cst_100 : f32 to vector<1x200xf32>
    %226 = arith.addf %222, %225 : vector<1x200xf32>
    %227 = math.rsqrt %226 : vector<1x200xf32>
    %228 = arith.mulf %223, %227 : vector<1x200xf32>
    %229 = arith.mulf %218, %228 : vector<1x200xf32>
    %230 = arith.subf %224, %229 : vector<1x200xf32>
    %231 = vector.broadcast %228 : vector<1x200xf32> to vector<8x200xf32>
    %232 = arith.mulf %211, %231 : vector<8x200xf32>
    %233 = vector.broadcast %230 : vector<1x200xf32> to vector<8x200xf32>
    %234 = arith.addf %232, %233 : vector<8x200xf32>
    %cst_101 = arith.constant 0.00999999977 : f32
    %235 = vector.broadcast %cst_101 : f32 to vector<8x200xf32>
    %236 = arith.mulf %235, %234 : vector<8x200xf32>
    %237 = arith.maximumf %234, %236 : vector<8x200xf32>
    %238 = arith.truncf %237 : vector<8x200xf32> to vector<8x200xbf16>
    %c0_102 = arith.constant 0 : index
    %c0_103 = arith.constant 0 : index
    %239 = vector.load %arg7[%c0_102, %c0_103] : memref<200x6xbf16, #tpu.memory_space<vmem>>, vector<200x6xbf16>
    %cst_104 = arith.constant dense<0.000000e+00> : vector<8x6xf32>
    %240 = tpu.matmul %238, %239, %cst_104 {dimension_numbers = #tpu.dot_dimension_numbers<[1], [0], [0], [1], [0, 0, 1, 1], [], []>} : vector<8x200xbf16>, vector<200x6xbf16>, vector<8x6xf32> -> vector<8x6xf32>
    %c0_105 = arith.constant 0 : index
    %c0_106 = arith.constant 0 : index
    %241 = vector.load %arg8[%c0_105, %c0_106] : memref<1x6xf32, #tpu.memory_space<vmem>>, vector<1x6xf32>
    %242 = vector.broadcast %241 : vector<1x6xf32> to vector<8x6xf32>
    %243 = arith.addf %240, %242 : vector<8x6xf32>
    %c0_107 = arith.constant 0 : index
    %c0_108 = arith.constant 0 : index
    %244 = vector.load %arg9[%c0_107, %c0_108] : memref<8x6xf32, #tpu.memory_space<vmem>>, vector<8x6xf32>
    tpu.vector_store %arg9[%c0_107, %c0_108], %243 {strides = array<i32>} : memref<8x6xf32, #tpu.memory_space<vmem>>, vector<8x6xf32>,
    return
  }
}

</mosaic_0001>

<bundles_post_ra>
// kernel: _lambda_.1
= control target key start
LH: loop header
LB: loop body
LE: loop exit
PB: predicated region body
PF: predicated region fallthrough
CT: control target
= control target key end

     0   :  { %14 = vsyncpa [#allocation3], 0  ;;  %s8959_s0 = inlined_call_operand.hbm [shape: f32[8,32], index: 0, kind: input, shape index: {}]   ;;  %s8960_s1 = inlined_call_operand.hbm [shape: bf16[32,200], index: 1, kind: input, shape index: {}]   ;;  %s8961_s2 = inlined_call_operand.hbm [shape: bf16[200,400], index: 2, kind: input, shape index: {}]   ;;  %s8962_s3 = inlined_call_operand.hbm [shape: bf16[5,400,400], index: 3, kind: input, shape index: {}]   ;;  %s8963_s4 = inlined_call_operand.hbm [shape: bf16[400,200], index: 4, kind: input, shape index: {}]   ;;  %s8964_s5 = inlined_call_operand.hbm [shape: f32[8,400], index: 5, kind: input, shape index: {}]   ;;  %s8965_s6 = inlined_call_operand.hbm [shape: f32[8,400], index: 6, kind: input, shape index: {}]   ;;  %s8966_s7 = inlined_call_operand.vmem [shape: bf16[200,6], index: 7, kind: input, shape index: {}]   ;;  %s8967_s8 = inlined_call_operand.hbm [shape: f32[1,6], index: 8, kind: input, shape index: {}]   ;;  %s8968_s9 = inlined_call_operand.hbm [shape: f32[8,6], index: 9, kind: output, shape index: {}]  }
   0x1   :  { %15 = vsyncpa [#allocation6], 0 }
   0x2   :  { %16 = vsyncpa [#allocation9], 0 }
   0x3   :  { %17 = vsyncpa [#allocation12], 0 }
   0x4   :  { %18 = vsyncpa [#allocation15], 0 }
   0x5   :  { %19 = vsyncpa [#allocation4], 0  ;;  %s8362_s30 = smov [#allocation5]   ;;  %s8152_s13 = scalar_lea.hbm %s8960_s1, 512 }
   0x6   :  { %s35_s10 = sshll.u32 %s8362_s30, 4  ;;  %p8153_p0 = scmp.ne.s32.totalorder %s8960_s1, %s8152_s13  ;;  %s36_s10 = int_to_ptr.vmem [resolvable:$true] %s35_s10 }
   0x7   :  { %p8156_p1 = scmp.lt.u32.totalorder %s8152_s13, %s8960_s1 }
   0x9   :  { %p8158_p2 = pnand %p8156_p1, %p8153_p0 }
   0xb   :  { %8161 = shalt.err (!%p8158_p2)
}
   0xc   :  { %s8162_s18 = scalar_lea.vmem %s36_s10, 512  ;;  %p8167_p4 = scmp.lt.s32.totalorder %s36_s10, %s36_s10 }
   0xd   :  { %p8163_p3 = scmp.ne.s32.totalorder %s36_s10, %s8162_s18  ;;  %p8168_p5 = scmp.lt.s32.totalorder %s8162_s18, %s8162_s18 }
   0xf   :  { %p8169_p6 = por %p8168_p5, %p8167_p4 }
  0x11   :  { %p8170_p7 = pnand %p8169_p6, %p8163_p3 }
  0x13   :  { %8173 = shalt.err (!%p8170_p7)
}
  0x14   :  { %s8363_s19 = smov 128   ;;  %s8364_s20 = smov 8  }
  0x15   :  { %41 = dma.hbm_to_vmem [thread:$0]  %s8960_s1, 512, %s36_s10, [#allocation6], %s8363_s19, %s8363_s19, %s8364_s20  }
  0x16   :  { %s8365_s23 = smov [#allocation8]   ;;  %s8366_s25 = smov [#allocation11]  }
  0x17   :  { %s59_s24 = sshll.u32 %s8365_s23, 4  ;;  %s84_s26 = sshll.u32 %s8366_s25, 4  ;;  %s60_s24 = int_to_ptr.vmem [resolvable:$true] %s59_s24  ;;  %s85_s26 = int_to_ptr.vmem [resolvable:$true] %s84_s26 }
  0x18   :  { %s8174_s29 = scalar_lea.hbm %s8962_s3, 64000 }
  0x19   :  { %p8175_p8 = scmp.ne.s32.totalorder %s8962_s3, %s8174_s29  ;;  %p8178_p9 = scmp.lt.u32.totalorder %s8174_s29, %s8962_s3 }
  0x1b   :  { %p8180_p10 = pnand %p8178_p9, %p8175_p8 }
  0x1d   :  { %8183 = shalt.err (!%p8180_p10)
}
  0x1e   :  { %s8184_s1 = scalar_lea.vmem %s60_s24, 64000  ;;  %p8189_p12 = scmp.lt.s32.totalorder %s60_s24, %s60_s24 }
  0x1f   :  { %p8185_p11 = scmp.ne.s32.totalorder %s60_s24, %s8184_s1  ;;  %p8190_p13 = scmp.lt.s32.totalorder %s8184_s1, %s8184_s1 }
  0x21   :  { %p8191_p0 = por %p8190_p13, %p8189_p12 }
  0x23   :  { %p8192_p1 = pnand %p8191_p0, %p8185_p11 }
  0x25   :  { %8195 = shalt.err (!%p8192_p1)
}
  0x26   :  { %s8367_s10 = smov 256   ;;  %s8368_s14 = smov 16  }
  0x27   :  { %65 = dma.hbm_to_vmem [thread:$0]  %s8962_s3, 64000, %s60_s24, [#allocation9], %s8367_s10, %s8367_s10, %s8368_s14  }
  0x28   :  { %s8196_s21 = scalar_lea.hbm %s8964_s5, 512 }
  0x29   :  { %p8197_p2 = scmp.ne.s32.totalorder %s8964_s5, %s8196_s21  ;;  %p8200_p3 = scmp.lt.u32.totalorder %s8196_s21, %s8964_s5 }
  0x2b   :  { %p8202_p4 = pnand %p8200_p3, %p8197_p2 }
  0x2d   :  { %8205 = shalt.err (!%p8202_p4)
}
  0x2e   :  { %s8206_s28 = scalar_lea.vmem %s85_s26, 512  ;;  %p8211_p6 = scmp.lt.s32.totalorder %s85_s26, %s85_s26 }
  0x2f   :  { %p8207_p5 = scmp.ne.s32.totalorder %s85_s26, %s8206_s28  ;;  %p8212_p7 = scmp.lt.s32.totalorder %s8206_s28, %s8206_s28 }
  0x31   :  { %p8213_p8 = por %p8212_p7, %p8211_p6 }
  0x33   :  { %p8214_p9 = pnand %p8213_p8, %p8207_p5 }
  0x35   :  { %8217 = shalt.err (!%p8214_p9)
}
  0x36   :  { %87 = dma.hbm_to_vmem [thread:$0]  %s8964_s5, 512, %s85_s26, [#allocation12]  }
  0x37   :  { %s8369_s29 = smov [#allocation2]   ;;  %s8370_s11 = smov [#allocation7]  }
  0x38   :  { %s26_s30 = sshll.u32 %s8369_s29, 4  ;;  %s47_s12 = sshll.u32 %s8370_s11, 4  ;;  %s27_s30 = int_to_ptr.vmem [resolvable:$true] %s26_s30  ;;  %s48_s12 = int_to_ptr.vmem [resolvable:$true] %s47_s12 }
  0x39   :  { %s8218_s15 = scalar_lea.hbm %s8959_s0, 128 }
  0x3a   :  { %p8219_p10 = scmp.ne.s32.totalorder %s8959_s0, %s8218_s15  ;;  %p8222_p11 = scmp.lt.u32.totalorder %s8218_s15, %s8959_s0 }
  0x3c   :  { %p8224_p12 = pnand %p8222_p11, %p8219_p10 }
  0x3e   :  { %8227 = shalt.err (!%p8224_p12)
}
  0x3f   :  { %s8228_s5 = scalar_lea.vmem %s27_s30, 128  ;;  %p8233_p0 = scmp.lt.s32.totalorder %s27_s30, %s27_s30 }
  0x40   :  { %p8229_p13 = scmp.ne.s32.totalorder %s27_s30, %s8228_s5  ;;  %p8234_p1 = scmp.lt.s32.totalorder %s8228_s5, %s8228_s5 }
  0x42   :  { %p8235_p2 = por %p8234_p1, %p8233_p0 }
  0x44   :  { %p8236_p3 = pnand %p8235_p2, %p8229_p13 }
  0x46   :  { %8239 = shalt.err (!%p8236_p3)
}
  0x47   :  { %29 = dma.hbm_to_vmem [thread:$0]  %s8959_s0, 128, %s27_s30, [#allocation3]  }
  0x48   :  { %s8240_s27 = scalar_lea.hbm %s8961_s2, 6400 }
  0x49   :  { %p8241_p4 = scmp.ne.s32.totalorder %s8961_s2, %s8240_s27  ;;  %p8244_p5 = scmp.lt.u32.totalorder %s8240_s27, %s8961_s2 }
  0x4b   :  { %p8246_p6 = pnand %p8244_p5, %p8241_p4 }
  0x4d   :  { %8249 = shalt.err (!%p8246_p6)
}
  0x4e   :  { %s8250_s11 = scalar_lea.vmem %s48_s12, 6400  ;;  %p8255_p8 = scmp.lt.s32.totalorder %s48_s12, %s48_s12 }
  0x4f   :  { %p8251_p7 = scmp.ne.s32.totalorder %s48_s12, %s8250_s11  ;;  %p8256_p9 = scmp.lt.s32.totalorder %s8250_s11, %s8250_s11 }
  0x51   :  { %p8257_p10 = por %p8256_p9, %p8255_p8 }
  0x53   :  { %p8258_p11 = pnand %p8257_p10, %p8251_p7 }
  0x55   :  { %8261 = shalt.err (!%p8258_p11)
}
  0x56   :  { %53 = dma.hbm_to_vmem [thread:$0]  %s8961_s2, 6400, %s48_s12, [#allocation6], %s8367_s10, %s8367_s10, %s8368_s14  }
  0x57   :  { %s8371_s13 = smov [#allocation10]   ;;  %s8372_s15 = smov [#allocation13]  }
  0x58   :  { %s71_s1 = sshll.u32 %s8371_s13, 4  ;;  %s94_s16 = sshll.u32 %s8372_s15, 4  ;;  %s72_s1 = int_to_ptr.vmem [resolvable:$true] %s71_s1  ;;  %s95_s16 = int_to_ptr.vmem [resolvable:$true] %s94_s16 }
  0x59   :  { %s8262_s21 = scalar_lea.hbm %s8963_s4, 6400 }
  0x5a   :  { %p8263_p12 = scmp.ne.s32.totalorder %s8963_s4, %s8262_s21  ;;  %p8266_p13 = scmp.lt.u32.totalorder %s8262_s21, %s8963_s4 }
  0x5c   :  { %p8268_p0 = pnand %p8266_p13, %p8263_p12 }
  0x5e   :  { %8271 = shalt.err (!%p8268_p0)
}
  0x5f   :  { %s8272_s2 = scalar_lea.vmem %s72_s1, 6400  ;;  %p8277_p2 = scmp.lt.s32.totalorder %s72_s1, %s72_s1 }
  0x60   :  { %p8273_p1 = scmp.ne.s32.totalorder %s72_s1, %s8272_s2  ;;  %p8278_p3 = scmp.lt.s32.totalorder %s8272_s2, %s8272_s2 }
  0x62   :  { %p8279_p4 = por %p8278_p3, %p8277_p2 }
  0x64   :  { %p8280_p5 = pnand %p8279_p4, %p8273_p1 }
  0x66   :  { %8283 = shalt.err (!%p8280_p5)
}
  0x67   :  { %77 = dma.hbm_to_vmem [thread:$0]  %s8963_s4, 6400, %s72_s1, [#allocation9], %s8363_s19, %s8363_s19, %s8364_s20  }
  0x68   :  { %s8284_s27 = scalar_lea.hbm %s8965_s6, 512 }
  0x69   :  { %p8285_p6 = scmp.ne.s32.totalorder %s8965_s6, %s8284_s27  ;;  %p8288_p7 = scmp.lt.u32.totalorder %s8284_s27, %s8965_s6 }
  0x6b   :  { %p8290_p8 = pnand %p8288_p7, %p8285_p6 }
  0x6d   :  { %8293 = shalt.err (!%p8290_p8)
}
  0x6e   :  { %s8294_s11 = scalar_lea.vmem %s95_s16, 512  ;;  %p8299_p10 = scmp.lt.s32.totalorder %s95_s16, %s95_s16 }
  0x6f   :  { %p8295_p9 = scmp.ne.s32.totalorder %s95_s16, %s8294_s11  ;;  %p8300_p11 = scmp.lt.s32.totalorder %s8294_s11, %s8294_s11 }
  0x71   :  { %p8301_p12 = por %p8300_p11, %p8299_p10 }
  0x73   :  { %p8302_p13 = pnand %p8301_p12, %p8295_p9 }
  0x75   :  { %8305 = shalt.err (!%p8302_p13)
}
  0x76   :  { %97 = dma.hbm_to_vmem [thread:$0]  %s8965_s6, 512, %s95_s16, [#allocation12]  }
  0x77   :  { %s8373_s20 = smov [#allocation14]   ;;  %s8306_s1 = scalar_lea.hbm %s8967_s8, 16 }
  0x78   :  { %s106_s0 = sshll.u32 %s8373_s20, 4  ;;  %p8307_p0 = scmp.ne.s32.totalorder %s8967_s8, %s8306_s1  ;;  %s107_s0 = int_to_ptr.vmem [resolvable:$true] %s106_s0 }
  0x79   :  { %p8310_p1 = scmp.lt.u32.totalorder %s8306_s1, %s8967_s8 }
  0x7b   :  { %p8312_p2 = pnand %p8310_p1, %p8307_p0 }
  0x7d   :  { %8315 = shalt.err (!%p8312_p2)
}
  0x7e   :  { %s8316_s5 = scalar_lea.vmem %s107_s0, 16  ;;  %s8320_s6 = scalar_lea.vmem %s107_s0, 32 }
  0x7f   :  { %p8317_p3 = scmp.ne.s32.totalorder %s107_s0, %s8316_s5  ;;  %p8321_p4 = scmp.lt.s32.totalorder %s107_s0, %s107_s0 }
  0x80   :  { %p8322_p5 = scmp.lt.s32.totalorder %s8320_s6, %s8316_s5 }
  0x82   :  { %p8323_p6 = por %p8322_p5, %p8321_p4 }
  0x84   :  { %p8324_p7 = pnand %p8323_p6, %p8317_p3 }
  0x86   :  { %8327 = shalt.err (!%p8324_p7)
}
  0x87   :  { %109 = dma.hbm_to_vmem [thread:$0]  %s8967_s8, 16, %s107_s0, [#allocation15]  }
  0x88   :  { %8350 = dma.done.wait [#allocation3], 128  }
  0x89   :  { %8351 = vsyncadd [#allocation3], 4294967168 }
  0x8a   :  { %8352 = dma.done.wait [#allocation6], 6912  }
  0x8b   :  { %8353 = vsyncadd [#allocation6], 4294960384 }
  0x8c   :  { %8354 = dma.done.wait [#allocation9], 70400  }
  0x8d   :  { %8355 = vsyncadd [#allocation9], 4294896896 }
  0x8e   :  { %8356 = dma.done.wait [#allocation12], 1024  }
  0x8f   :  { %8357 = vsyncadd [#allocation12], 4294966272 }
  0x90   :  { %8358 = dma.done.wait [#allocation15], 16  }
  0x91   :  { %8359 = vsyncadd [#allocation15], 4294967280  ;;  %v8374_v0 = vmov 0   ;;  %v7176_v1 = vld [vmem:[#allocation5 + $0x4] ss:$8 sps:$4 sm:$0xff]   ;;  %v135_v5 = vld [vmem:[#allocation2] sm:$0xff] }
  0x92   :  { %197 = vmatprep.mubr.bf16.mxu1 %v8374_v0  ;;  %v7178_v2 = vld [vmem:[#allocation5] ss:$8 sps:$4 sm:$0xff]   ;;  %165 = vmatprep.subr.bf16.mxu1 %v7176_v1  ;;  %v7179_v3 = vld [vmem:[#allocation5 + $0x14] ss:$8 sps:$4 sm:$0xff]   ;;  %v7181_v4 = vld [vmem:[#allocation5 + $0x10] ss:$8 sps:$4 sm:$0xff]   ;;  %v140_v6 = vpack.c.bf16 %v135_v5, %v135_v5 }
  0x93   :  { %166 = vmatpush1.bf16.msra.mxu1 %v7178_v2  ;;  %vm161_vm0 = vcmask 261120   ;;  %v7184_v7 = vld [vmem:[#allocation7 + $0x4] ss:$16 sps:$4 sm:$0xff]   ;;  %v7185_v8 = vld [vmem:[#allocation7 + $0xc] ss:$16 sps:$4 sm:$0xff]   ;;  %vm624_vm1 = vcmask 1043456  }
  0x94   :  { %167 = vmatprep.subr.bf16.mxu1 %v7179_v3  ;;  %v7182_v9 = vld [vmem:[#allocation7] ss:$16 sps:$4 sm:$0xff]   ;;  %v7187_v10 = vld [vmem:[#allocation7 + $0x8] ss:$16 sps:$4 sm:$0xff]   ;;  %678 = vmatprep.subr.bf16.mxu0 %v7185_v8  ;;  %v7190_v11 = vld [vmem:[#allocation7 + $0x24] ss:$16 sps:$4 sm:$0xff]  }
  0x95   :  { %679 = vmatpush1.bf16.msra.mxu0 %v7187_v10  ;;  %v7191_v12 = vld [vmem:[#allocation7 + $0x2c] ss:$16 sps:$4 sm:$0xff]   ;;  %v7188_v13 = vld [vmem:[#allocation7 + $0x20] ss:$16 sps:$4 sm:$0xff]   ;;  %v7193_v14 = vld [vmem:[#allocation7 + $0x28] ss:$16 sps:$4 sm:$0xff]  }
  0x96   :  { %680 = vmatprep.subr.bf16.mxu0 %v7191_v12  ;;  %v7196_v15 = vld [vmem:[#allocation7 + $0x44] ss:$16 sps:$4 sm:$0xff]   ;;  %v7197_v16 = vld [vmem:[#allocation7 + $0x4c] ss:$16 sps:$4 sm:$0xff]   ;;  %v7194_v17 = vld [vmem:[#allocation7 + $0x40] ss:$16 sps:$4 sm:$0xff]  }
  0x97   :  { %168 = vmatpush1.bf16.msra.mxu1 %v7181_v4  ;;  %v7199_v18 = vld [vmem:[#allocation7 + $0x48] ss:$16 sps:$4 sm:$0xff]   ;;  %v7202_v19 = vld [vmem:[#allocation7 + $0x64] ss:$16 sps:$4 sm:$0xff]   ;;  %v7203_v20 = vld [vmem:[#allocation7 + $0x6c] ss:$16 sps:$4 sm:$0xff]  }
  0x98   :  { %637 = vmatprep.subr.bf16.mxu1 %v7184_v7  ;;  %v7200_v21 = vld [vmem:[#allocation7 + $0x60] ss:$16 sps:$4 sm:$0xff]   ;;  %v7205_v22 = vld [vmem:[#allocation7 + $0x68] ss:$16 sps:$4 sm:$0xff]   ;;  %v7208_v23 = vld [vmem:[#allocation7 + $0x84] ss:$16 sps:$4 sm:$0xff]  }
  0x99   :  { %681 = vmatpush1.bf16.msra.mxu0 %v7193_v14  ;;  %v7209_v24 = vld [vmem:[#allocation7 + $0x8c] ss:$16 sps:$4 sm:$0xff]   ;;  %v7206_v25 = vld [vmem:[#allocation7 + $0x80] ss:$16 sps:$4 sm:$0xff]   ;;  %v7211_v26 = vld [vmem:[#allocation7 + $0x88] ss:$16 sps:$4 sm:$0xff]  }
  0x9a   :  { %6486 = vmatmul.mubr.msk.bf16.vlgmr.msra.gmra.mrb[0].mxu1 %vm161_vm0, %v140_v6  ;;  %682 = vmatprep.subr.bf16.mxu0 %v7197_v16  ;;  %v7214_v27 = vld [vmem:[#allocation7 + $0xa4] ss:$16 sps:$4 sm:$0xff]   ;;  %v7215_v28 = vld [vmem:[#allocation7 + $0xac] ss:$16 sps:$4 sm:$0xff]   ;;  %v7212_v29 = vld [vmem:[#allocation7 + $0xa0] ss:$16 sps:$4 sm:$0xff]  }
  0x9b   :  { %638 = vmatpush1.bf16.msra.mxu1 %v7182_v9  ;;  %v7217_v30 = vld [vmem:[#allocation7 + $0xa8] ss:$16 sps:$4 sm:$0xff]   ;;  %v7220_v31 = vld [vmem:[#allocation7 + $0xc4] ss:$16 sps:$4 sm:$0xff]   ;;  %v7221_v32 = vld [vmem:[#allocation7 + $0xcc] ss:$16 sps:$4 sm:$0xff]  }
  0x9c   :  { %639 = vmatprep.subr.bf16.mxu1 %v7190_v11  ;;  %v7218_v33 = vld [vmem:[#allocation7 + $0xc0] ss:$16 sps:$4 sm:$0xff]   ;;  %v7223_v34 = vld [vmem:[#allocation7 + $0xc8] ss:$16 sps:$4 sm:$0xff]   ;;  %v7226_v35 = vld [vmem:[#allocation7 + $0xe4] ss:$16 sps:$4 sm:$0xff]  }
  0x9d   :  { %683 = vmatpush1.bf16.msra.mxu0 %v7199_v18  ;;  %v7227_v36 = vld [vmem:[#allocation7 + $0xec] ss:$16 sps:$4 sm:$0xff]   ;;  %v7224_v37 = vld [vmem:[#allocation7 + $0xe0] ss:$16 sps:$4 sm:$0xff]   ;;  %v7229_v38 = vld [vmem:[#allocation7 + $0xe8] ss:$16 sps:$4 sm:$0xff]  }
  0x9e   :  { %684 = vmatprep.subr.bf16.mxu0 %v7203_v20  ;;  %v7232_v39 = vld [vmem:[#allocation7 + $0x104] ss:$16 sps:$4 sm:$0xff]   ;;  %v7233_v40 = vld [vmem:[#allocation7 + $0x10c] ss:$16 sps:$4 sm:$0xff]   ;;  %v7230_v41 = vld [vmem:[#allocation7 + $0x100] ss:$16 sps:$4 sm:$0xff]  }
  0x9f   :  { %640 = vmatpush1.bf16.msra.mxu1 %v7188_v13  ;;  %v7235_v42 = vld [vmem:[#allocation7 + $0x108] ss:$16 sps:$4 sm:$0xff]   ;;  %v7238_v43 = vld [vmem:[#allocation7 + $0x124] ss:$16 sps:$4 sm:$0xff]   ;;  %v7239_v44 = vld [vmem:[#allocation7 + $0x12c] ss:$16 sps:$4 sm:$0xff]  }
  0xa0   :  { %641 = vmatprep.subr.bf16.mxu1 %v7196_v15  ;;  %v7236_v45 = vld [vmem:[#allocation7 + $0x120] ss:$16 sps:$4 sm:$0xff]   ;;  %v7241_v46 = vld [vmem:[#allocation7 + $0x128] ss:$16 sps:$4 sm:$0xff]   ;;  %v7244_v47 = vld [vmem:[#allocation7 + $0x144] ss:$16 sps:$4 sm:$0xff]  }
  0xa1   :  { %685 = vmatpush1.bf16.msra.mxu0 %v7205_v22  ;;  %v7245_v48 = vld [vmem:[#allocation7 + $0x14c] ss:$16 sps:$4 sm:$0xff]   ;;  %v7242_v49 = vld [vmem:[#allocation7 + $0x140] ss:$16 sps:$4 sm:$0xff]   ;;  %v7247_v50 = vld [vmem:[#allocation7 + $0x148] ss:$16 sps:$4 sm:$0xff]  }
  0xa2   :  { %686 = vmatprep.subr.bf16.mxu0 %v7209_v24  ;;  %v7250_v51 = vld [vmem:[#allocation7 + $0x164] ss:$16 sps:$4 sm:$0xff]   ;;  %v7251_v52 = vld [vmem:[#allocation7 + $0x16c] ss:$16 sps:$4 sm:$0xff]   ;;  %v7248_v53 = vld [vmem:[#allocation7 + $0x160] ss:$16 sps:$4 sm:$0xff]  }
  0xa3   :  { %642 = vmatpush1.bf16.msra.mxu1 %v7194_v17  ;;  %v7253_v54 = vld [vmem:[#allocation7 + $0x168] ss:$16 sps:$4 sm:$0xff]   ;;  %v367_v55 = vld [vmem:[#allocation7 + $0x180] sm:$0xff]  ;;  %vm212_vm2 = vcmask 588800   ;;  %vm737_vm3 = vcmask 130048   ;;  %vm6461_vm4 = vcmask 48128  }
  0xa4   :  { %643 = vmatprep.subr.bf16.mxu1 %v7202_v19  ;;  %v368_v56 = vld [vmem:[#allocation7 + $0x188] sm:$0xff]  ;;  %v6536_v57 = vcombine.high %v367_v55, %v367_v55  ;;  %v6535_v59 = vcombine.low %v367_v55, %v367_v55 }
  0xa5   :  { %687 = vmatpush1.bf16.msra.mxu0 %v7211_v26  ;;  %v6538_v58 = vcombine.high %v368_v56, %v368_v56  ;;  %v6537_v60 = vcombine.low %v368_v56, %v368_v56 }
  0xa6   :  { %688 = vmatprep.subr.bf16.mxu0 %v7215_v28  ;;  %v626_v61 = vsel %vm624_vm1, %v6535_v59, 0 }
  0xa7   :  { %644 = vmatpush1.bf16.msra.mxu1 %v7200_v21  ;;  %v632_v62 = vsel %vm624_vm1, %v6537_v60, 0 }
  0xa8   :  { %645 = vmatprep.subr.bf16.mxu1 %v7208_v23 }
  0xa9   :  { %689 = vmatpush1.bf16.msra.mxu0 %v7217_v30 }
  0xaa   :  { %690 = vmatprep.subr.bf16.mxu0 %v7221_v32 }
  0xab   :  { %646 = vmatpush1.bf16.msra.mxu1 %v7206_v25 }
  0xac   :  { %647 = vmatprep.subr.bf16.mxu1 %v7214_v27 }
  0xad   :  { %691 = vmatpush1.bf16.msra.mxu0 %v7223_v34 }
  0xae   :  { %692 = vmatprep.subr.bf16.mxu0 %v7227_v36 }
  0xaf   :  { %648 = vmatpush1.bf16.msra.mxu1 %v7212_v29 }
  0xb0   :  { %649 = vmatprep.subr.bf16.mxu1 %v7220_v31 }
  0xb1   :  { %693 = vmatpush1.bf16.msra.mxu0 %v7229_v38 }
  0xb2   :  { %694 = vmatprep.subr.bf16.mxu0 %v7233_v40 }
  0xb3   :  { %650 = vmatpush1.bf16.msra.mxu1 %v7218_v33 }
  0xb4   :  { %651 = vmatprep.subr.bf16.mxu1 %v7226_v35 }
  0xb5   :  { %695 = vmatpush1.bf16.msra.mxu0 %v7235_v42  ;;  %v8375_v42 = vmov 1966171168  }
  0xb6   :  { %696 = vmatprep.subr.bf16.mxu0 %v7239_v44  ;;  %v255_v44 = vlaneseq }
  0xb7   :  { %652 = vmatpush1.bf16.msra.mxu1 %v7224_v37 }
  0xb8   :  { %653 = vmatprep.subr.bf16.mxu1 %v7232_v39 }
  0xb9   :  { %697 = vmatpush1.bf16.msra.mxu0 %v7241_v46  ;;  %v8548_v46 = vshrl.u32 %v255_v44, 7  ;;  %v7300_v44 = vld [vmem:[#allocation8 + $0x140] ss:$16 sps:$4 sm:$0xff]  }
  0xba   :  { %698 = vmatprep.subr.bf16.mxu0 %v7245_v48 }
  0xbb   :  { %654 = vmatpush1.bf16.msra.mxu1 %v7230_v41  ;;  %v8559_v55 = vsub.s32 1, %v8548_v46 }
  0xbc   :  { %655 = vmatprep.subr.bf16.mxu1 %v7238_v43  ;;  %v253_v43 = vunpack.c.l.s4 %v8375_v42  ;;  %v7297_v42 = vld [vmem:[#allocation8 + $0x260] ss:$16 sps:$4 sm:$0xff]  }
  0xbd   :  { %699 = vmatpush1.bf16.msra.mxu0 %v7247_v50 }
  0xbe   :  { %700 = vmatprep.subr.bf16.mxu0 %v7251_v52  ;;  %v243_v52 = vld [vmem:[#allocation11] ss:$8 sm:$0x3] }
  0xbf   :  { %656 = vmatpush1.bf16.msra.mxu1 %v7236_v45  ;;  %v254_v45 = vunpack.c.0.s8 %v253_v43  ;;  %v7302_v43 = vld [vmem:[#allocation8 + $0x144] ss:$16 sps:$4 sm:$0xff]  }
  0xc0   :  { %657 = vmatprep.subr.bf16.mxu1 %v7244_v47 }
  0xc1   :  { %701 = vmatpush1.bf16.msra.mxu0 %v7253_v54  ;;  %v8551_v48 = vsub.s32 %v254_v45, %v8548_v46  ;;  %v8556_v54 = vsub.s32 0, %v8548_v46  ;;  %v7305_v45 = vld [vmem:[#allocation8 + $0x284] ss:$16 sps:$4 sm:$0xff]  }
  0xc2   :  { %6541 = vmatprep.subr.msk.bf16.mxu0 %vm624_vm1, %v6538_v58 }
  0xc3   :  { %658 = vmatpush1.bf16.msra.mxu1 %v7242_v49 }
  0xc4   :  { %659 = vmatprep.subr.bf16.mxu1 %v7250_v51 }
  0xc5   :  { %703 = vmatpush1.bf16.msra.mxu0 %v632_v62 }
  0xc7   :  { %660 = vmatpush1.bf16.msra.mxu1 %v7248_v53 }
  0xc8   :  { %6539 = vmatprep.subr.msk.bf16.mxu1 %vm624_vm1, %v6536_v57 }
  0xcb   :  { %662 = vmatpush1.bf16.msra.mxu1 %v626_v61 }
 0x16d   :  { %v8540_v63 = vpop.f32.mrb[0].mxu1 }
 0x16e   :  { %v206_v1 = vrot.slane %v8540_v63, 4  ;;  %v220_v2 = vmul.f32 %v8540_v63, %v8540_v63  ;;  %v201_v3 = vpop.f32.mrb[1].mxu1 }
 0x16f   :  { %v213_v4 = vsel %vm212_vm2, %v201_v3, 0.0  ;;  %v221_v5 = vmul.f32 %v201_v3, %v201_v3  ;;  %v203_v6 = vpop.f32.mrb[2].mxu1 }
 0x170   :  { %v207_v7 = vadd.f32 %v206_v1, %v8540_v63  ;;  %v222_v8 = vrot.slane %v220_v2, 4  ;;  %v214_v9 = vrot.slane %v213_v4, 4  ;;  %v204_v10 = vpop.f32.mrb[3].mxu1 }
 0x171   :  { %v228_v11 = vsel %vm212_vm2, %v221_v5, 0.0 }
 0x172   :  { %v208_v12 = vrot.slane %v207_v7, 2  ;;  %v223_v13 = vadd.f32 %v222_v8, %v220_v2  ;;  %v215_v14 = vadd.f32 %v214_v9, %v213_v4  ;;  %v229_v15 = vrot.slane %v228_v11, 4  ;;  %v244_v4 = vld [vmem:[#allocation13] ss:$8 sm:$0x3] }
 0x174   :  { %v209_v16 = vadd.f32 %v208_v12, %v207_v7  ;;  %v224_v17 = vrot.slane %v223_v13, 2  ;;  %v216_v18 = vrot.slane %v215_v14, 2  ;;  %v230_v19 = vadd.f32 %v229_v15, %v228_v11 }
 0x176   :  { %v210_v20 = vrot.slane %v209_v16, 1  ;;  %v225_v21 = vadd.f32 %v224_v17, %v223_v13  ;;  %v217_v22 = vadd.f32 %v216_v18, %v215_v14  ;;  %v231_v23 = vrot.slane %v230_v19, 2  ;;  %v7263_v17 = vld [vmem:[#allocation8 + $0x24] ss:$16 sps:$4 sm:$0xff]   ;;  %v7261_v18 = vld [vmem:[#allocation8 + $0x20] ss:$16 sps:$4 sm:$0xff]  }
 0x178   :  { %v211_v24 = vadd.f32 %v210_v20, %v209_v16  ;;  %v226_v25 = vrot.slane %v225_v21, 1  ;;  %v218_v26 = vrot.slane %v217_v22, 1  ;;  %v232_v27 = vadd.f32 %v231_v23, %v230_v19  ;;  %v7258_v16 = vld [vmem:[#allocation8] ss:$16 sps:$4 sm:$0xff]   ;;  %v7266_v19 = vld [vmem:[#allocation8 + $0x44] ss:$16 sps:$4 sm:$0xff]  }
 0x179   :  { %v7264_v20 = vld [vmem:[#allocation8 + $0x40] ss:$16 sps:$4 sm:$0xff]   ;;  %v7272_v23 = vld [vmem:[#allocation8 + $0x84] ss:$16 sps:$4 sm:$0xff]  }
 0x17a   :  { %v227_v28 = vadd.f32 %v226_v25, %v225_v21  ;;  %v235_v29 = vmul.f32 0.125, %v211_v24  ;;  %v219_v30 = vadd.f32 %v218_v26, %v217_v22  ;;  %v233_v31 = vrot.slane %v232_v27, 1  ;;  %v7269_v21 = vld [vmem:[#allocation8 + $0x64] ss:$16 sps:$4 sm:$0xff]   ;;  %v7267_v22 = vld [vmem:[#allocation8 + $0x60] ss:$16 sps:$4 sm:$0xff]  }
 0x17b   :  { %v7270_v24 = vld [vmem:[#allocation8 + $0x80] ss:$16 sps:$4 sm:$0xff]   ;;  %v7275_v25 = vld [vmem:[#allocation8 + $0xa4] ss:$16 sps:$4 sm:$0xff]  }
 0x17c   :  { %v237_v32 = vmul.f32 0.125, %v227_v28  ;;  %v239_v33 = vmul.f32 %v235_v29, %v235_v29  ;;  %v234_v34 = vadd.f32 %v233_v31, %v232_v27  ;;  %v236_v35 = vmul.f32 0.125, %v219_v30  ;;  %v7273_v26 = vld [vmem:[#allocation8 + $0xa0] ss:$16 sps:$4 sm:$0xff]   ;;  %v7278_v27 = vld [vmem:[#allocation8 + $0xc4] ss:$16 sps:$4 sm:$0xff]  }
 0x17d   :  { %v7276_v28 = vld [vmem:[#allocation8 + $0xc0] ss:$16 sps:$4 sm:$0xff]   ;;  %v7284_v31 = vld [vmem:[#allocation8 + $0xe4] ss:$16 sps:$4 sm:$0xff]  }
 0x17e   :  { %v241_v36 = vsub.f32 %v237_v32, %v239_v33  ;;  %v238_v37 = vmul.f32 0.125, %v234_v34  ;;  %v240_v38 = vmul.f32 %v236_v35, %v236_v35  ;;  %v7279_v30 = vld [vmem:[#allocation8 + $0x200] ss:$16 sps:$4 sm:$0xff]   ;;  %v7287_v33 = vld [vmem:[#allocation8 + $0x224] ss:$16 sps:$4 sm:$0xff]  }
 0x17f   :  { %v7282_v32 = vld [vmem:[#allocation8 + $0xe0] ss:$16 sps:$4 sm:$0xff]  }
 0x180   :  { %v245_v39 = vadd.f32 1e-05, %v241_v36  ;;  %v242_v40 = vsub.f32 %v238_v37, %v240_v38  ;;  %v7285_v34 = vld [vmem:[#allocation8 + $0x220] ss:$16 sps:$4 sm:$0xff]   ;;  %v7293_v37 = vld [vmem:[#allocation8 + $0x244] ss:$16 sps:$4 sm:$0xff]  }
 0x181   :  { %v7288_v36 = vld [vmem:[#allocation8 + $0x100] ss:$16 sps:$4 sm:$0xff]  }
 0x182   :  { %v246_v41 = vadd.f32 1e-05, %v242_v40  ;;  %8096 = vrsqrt.f32 %v245_v39  ;;  %v7291_v38 = vld [vmem:[#allocation8 + $0x240] ss:$16 sps:$4 sm:$0xff]   ;;  %v7296_v39 = vld [vmem:[#allocation8 + $0x124] ss:$16 sps:$4 sm:$0xff]  }
 0x183   :  { %v7294_v40 = vld [vmem:[#allocation8 + $0x120] ss:$16 sps:$4 sm:$0xff]  }
 0x184   :  { %8098 = vrsqrt.f32 %v246_v41  ;;  %v7299_v41 = vld [vmem:[#allocation8 + $0x264] ss:$16 sps:$4 sm:$0xff]  }
 0x18c   :  { %v8097_v47 = vpop.eup %8096 }
 0x18e   :  { %v8099_v49 = vpop.eup %8098 }
 0x18f   :  { %v251_v50 = vcombine.low %v8097_v47, %v8099_v49  ;;  %v7303_v47 = vld [vmem:[#allocation8 + $0x280] ss:$16 sps:$4 sm:$0xff]   ;;  %v7308_v49 = vld [vmem:[#allocation8 + $0x164] ss:$16 sps:$4 sm:$0xff]  }
 0x191   :  { %v258_v51 = vrot.slane %v251_v50, %v8551_v48  ;;  %v7306_v50 = vld [vmem:[#allocation8 + $0x160] ss:$16 sps:$4 sm:$0xff]  }
 0x193   :  { %v265_v53 = vrot.slane %v258_v51, %v8551_v48  ;;  %v7311_v51 = vld [vmem:[#allocation8 + $0x2a4] ss:$16 sps:$4 sm:$0xff]  }
 0x195   :  { %v267_v56 = vmul.f32 %v265_v53, %v243_v52  ;;  %v7309_v52 = vld [vmem:[#allocation8 + $0x2a0] ss:$16 sps:$4 sm:$0xff]   ;;  %v7314_v53 = vld [vmem:[#allocation8 + $0x184] ss:$16 sps:$4 sm:$0xff]  }
 0x197   :  { %v272_v57 = vrot.slane %v267_v56, %v8556_v54  ;;  %v276_v58 = vrot.slane %v267_v56, %v8559_v55  ;;  %v7312_v56 = vld [vmem:[#allocation8 + $0x180] ss:$16 sps:$4 sm:$0xff]  }
 0x199   :  { %v279_v59 = vmul.f32 %v272_v57, %v235_v29  ;;  %v280_v60 = vmul.f32 %v276_v58, %v236_v35  ;;  %v300_v61 = vmul.f32 %v272_v57, %v8540_v63  ;;  %v301_v62 = vmul.f32 %v276_v58, %v201_v3  ;;  %v7260_v3 = vld [vmem:[#allocation8 + $0x4] ss:$16 sps:$4 sm:$0xff]   ;;  %v7315_v58 = vld [vmem:[#allocation8 + $0x2c0] ss:$16 sps:$4 sm:$0xff]  }
 0x19a   :  { %1531 = vmatprep.subr.bf16.mxu1 %v7260_v3  ;;  %v7281_v29 = vld [vmem:[#allocation8 + $0x204] ss:$16 sps:$4 sm:$0xff]  }
 0x19b   :  { %v283_v1 = vcombine.low %v279_v59, %v280_v60  ;;  %1572 = vmatprep.subr.bf16.mxu0 %v7281_v29  ;;  %v7290_v35 = vld [vmem:[#allocation8 + $0x104] ss:$16 sps:$4 sm:$0xff]   ;;  %v7318_v60 = vld [vmem:[#allocation8 + $0x1a0] ss:$16 sps:$4 sm:$0xff]  }
 0x19c   :  { %v7317_v57 = vld [vmem:[#allocation8 + $0x2c4] ss:$16 sps:$4 sm:$0xff]  }
 0x19d   :  { %v290_v2 = vrot.slane %v283_v1, %v8551_v48  ;;  %v7320_v59 = vld [vmem:[#allocation8 + $0x1a4] ss:$16 sps:$4 sm:$0xff]  }
 0x19e   :  { %v7326_v1 = vld [vmem:[#allocation8 + $0x1c4] ss:$16 sps:$4 sm:$0xff]  }
 0x19f   :  { %v297_v5 = vrot.slane %v290_v2, %v8551_v48  ;;  %v7324_v2 = vld [vmem:[#allocation8 + $0x1c0] ss:$16 sps:$4 sm:$0xff]  }
 0x1a1   :  { %v299_v6 = vsub.f32 %v244_v4, %v297_v5  ;;  %v7329_v4 = vld [vmem:[#allocation8 + $0x304] ss:$16 sps:$4 sm:$0xff]   ;;  %v7327_v5 = vld [vmem:[#allocation8 + $0x300] ss:$16 sps:$4 sm:$0xff]  }
 0x1a3   :  { %v306_v7 = vrot.slane %v299_v6, %v8556_v54  ;;  %v310_v8 = vrot.slane %v299_v6, %v8559_v55  ;;  %v7330_v6 = vld [vmem:[#allocation8 + $0x1e0] ss:$16 sps:$4 sm:$0xff]  }
 0x1a5   :  { %v314_v9 = vadd.f32 %v310_v8, %v301_v62  ;;  %v313_v10 = vadd.f32 %v306_v7, %v300_v61  ;;  %v7323_v61 = vld [vmem:[#allocation8 + $0x2e4] ss:$16 sps:$4 sm:$0xff]   ;;  %v7321_v62 = vld [vmem:[#allocation8 + $0x2e0] ss:$16 sps:$4 sm:$0xff]   ;;  %v7335_v8 = vld [vmem:[#allocation8 + $0xc] ss:$16 sps:$4 sm:$0xff]  }
 0x1a6   :  { %v7332_v7 = vld [vmem:[#allocation8 + $0x1e4] ss:$16 sps:$4 sm:$0xff]  }
 0x1a7   :  { %v316_v11 = vmul.f32 0.01, %v314_v9  ;;  %v315_v12 = vmul.f32 0.01, %v313_v10 }
 0x1a9   :  { %v318_v13 = vmax.f32 %v314_v9, %v316_v11  ;;  %v317_v14 = vmax.f32 %v313_v10, %v315_v12 }
 0x1ab   :  { %v370_v15 = vpack.c.bf16 %v318_v13, %v318_v13  ;;  %v369_v63 = vpack.c.bf16 %v317_v14, %v317_v14 }
 0x1ad   :  { %6540 = vmatprep.mubr.msk.bf16.mxu1 %vm212_vm2, %v370_v15  ;;  %6542 = vmatprep.mubr.msk.bf16.mxu0 %vm212_vm2, %v370_v15 }
 0x1ae   :  { %670 = vmatmul.mubr.bf16.vlgmr.msra.gmra.mrb[4].mxu1 %v369_v63  ;;  %711 = vmatmul.mubr.bf16.vlgmr.msra.gmra.mrb[0].mxu0 %v369_v63 }
 0x1af   :  { %1532 = vmatpush1.bf16.msra.mxu1 %v7258_v16  ;;  %1573 = vmatpush1.bf16.msra.mxu0 %v7279_v30 }
 0x1b0   :  { %1533 = vmatprep.subr.bf16.mxu1 %v7263_v17  ;;  %1574 = vmatprep.subr.bf16.mxu0 %v7287_v33 }
 0x1b3   :  { %1534 = vmatpush1.bf16.msra.mxu1 %v7261_v18  ;;  %1575 = vmatpush1.bf16.msra.mxu0 %v7285_v34 }
 0x1b4   :  { %1535 = vmatprep.subr.bf16.mxu1 %v7266_v19  ;;  %1576 = vmatprep.subr.bf16.mxu0 %v7293_v37 }
 0x1b7   :  { %1536 = vmatpush1.bf16.msra.mxu1 %v7264_v20  ;;  %1577 = vmatpush1.bf16.msra.mxu0 %v7291_v38 }
 0x1b8   :  { %1537 = vmatprep.subr.bf16.mxu1 %v7269_v21  ;;  %1578 = vmatprep.subr.bf16.mxu0 %v7299_v41 }
 0x1bb   :  { %1538 = vmatpush1.bf16.msra.mxu1 %v7267_v22  ;;  %1579 = vmatpush1.bf16.msra.mxu0 %v7297_v42 }
 0x1bc   :  { %1539 = vmatprep.subr.bf16.mxu1 %v7272_v23  ;;  %1580 = vmatprep.subr.bf16.mxu0 %v7305_v45 }
 0x1bf   :  { %1540 = vmatpush1.bf16.msra.mxu1 %v7270_v24  ;;  %1581 = vmatpush1.bf16.msra.mxu0 %v7303_v47 }
 0x1c0   :  { %1541 = vmatprep.subr.bf16.mxu1 %v7275_v25  ;;  %1582 = vmatprep.subr.bf16.mxu0 %v7311_v51 }
 0x1c3   :  { %1542 = vmatpush1.bf16.msra.mxu1 %v7273_v26  ;;  %1583 = vmatpush1.bf16.msra.mxu0 %v7309_v52 }
 0x1c4   :  { %1543 = vmatprep.subr.bf16.mxu1 %v7278_v27  ;;  %1584 = vmatprep.subr.bf16.mxu0 %v7317_v57 }
 0x1c7   :  { %1544 = vmatpush1.bf16.msra.mxu1 %v7276_v28  ;;  %1585 = vmatpush1.bf16.msra.mxu0 %v7315_v58 }
 0x1c8   :  { %1545 = vmatprep.subr.bf16.mxu1 %v7284_v31  ;;  %1586 = vmatprep.subr.bf16.mxu0 %v7323_v61 }
 0x1cb   :  { %1546 = vmatpush1.bf16.msra.mxu1 %v7282_v32  ;;  %1587 = vmatpush1.bf16.msra.mxu0 %v7321_v62 }
 0x1cc   :  { %1547 = vmatprep.subr.bf16.mxu1 %v7290_v35  ;;  %1588 = vmatprep.subr.bf16.mxu0 %v7329_v4 }
 0x1cf   :  { %1548 = vmatpush1.bf16.msra.mxu1 %v7288_v36  ;;  %1589 = vmatpush1.bf16.msra.mxu0 %v7327_v5 }
 0x1d0   :  { %1549 = vmatprep.subr.bf16.mxu1 %v7296_v39  ;;  %1613 = vmatprep.subr.bf16.mxu0 %v7335_v8 }
 0x1d3   :  { %1550 = vmatpush1.bf16.msra.mxu1 %v7294_v40 }
 0x1d4   :  { %1551 = vmatprep.subr.bf16.mxu1 %v7302_v43 }
 0x1d7   :  { %1552 = vmatpush1.bf16.msra.mxu1 %v7300_v44 }
 0x1d8   :  { %1553 = vmatprep.subr.bf16.mxu1 %v7308_v49 }
 0x1db   :  { %1554 = vmatpush1.bf16.msra.mxu1 %v7306_v50 }
 0x1dc   :  { %1555 = vmatprep.subr.bf16.mxu1 %v7314_v53 }
 0x1df   :  { %1556 = vmatpush1.bf16.msra.mxu1 %v7312_v56 }
 0x1e0   :  { %1557 = vmatprep.subr.bf16.mxu1 %v7320_v59 }
 0x1e3   :  { %1558 = vmatpush1.bf16.msra.mxu1 %v7318_v60 }
 0x1e4   :  { %1559 = vmatprep.subr.bf16.mxu1 %v7326_v1 }
 0x1e7   :  { %1560 = vmatpush1.bf16.msra.mxu1 %v7324_v2 }
 0x1e8   :  { %1561 = vmatprep.subr.bf16.mxu1 %v7332_v7 }
 0x1eb   :  { %1562 = vmatpush1.bf16.msra.mxu1 %v7330_v6 }
 0x281   :  { %v8570_v9 = vpop.f32.mrb[4].mxu1  ;;  %v8572_v10 = vpop.f32.mrb[0].mxu0 }
 0x282   :  { %v719_v11 = vrot.slane %v8570_v9, 4  ;;  %v745_v12 = vmul.f32 %v8570_v9, %v8570_v9  ;;  %v731_v13 = vrot.slane %v8572_v10, 4  ;;  %v747_v14 = vmul.f32 %v8572_v10, %v8572_v10  ;;  %v8580_v15 = vpop.f32.mrb[5].mxu1  ;;  %v8582_v63 = vpop.f32.mrb[1].mxu0 }
 0x283   :  { %v725_v3 = vrot.slane %v8580_v15, 4  ;;  %v746_v16 = vmul.f32 %v8580_v15, %v8580_v15  ;;  %v738_v17 = vsel %vm737_vm3, %v8582_v63, 0.0  ;;  %v748_v18 = vmul.f32 %v8582_v63, %v8582_v63  ;;  %v675_v19 = vpop.f32.mrb[6].mxu1  ;;  %v716_v20 = vpop.f32.mrb[2].mxu0 }
 0x284   :  { %v720_v21 = vadd.f32 %v719_v11, %v8570_v9  ;;  %v749_v22 = vrot.slane %v745_v12, 4  ;;  %v732_v23 = vadd.f32 %v731_v13, %v8572_v10  ;;  %v761_v24 = vrot.slane %v747_v14, 4  ;;  %v676_v25 = vpop.f32.mrb[7].mxu1  ;;  %v717_v26 = vpop.f32.mrb[3].mxu0 }
 0x285   :  { %v726_v27 = vadd.f32 %v725_v3, %v8580_v15  ;;  %v755_v28 = vrot.slane %v746_v16, 4  ;;  %v739_v29 = vrot.slane %v738_v17, 4  ;;  %v767_v30 = vsel %vm737_vm3, %v748_v18, 0.0 }
 0x286   :  { %v721_v31 = vrot.slane %v720_v21, 2  ;;  %v750_v32 = vadd.f32 %v749_v22, %v745_v12  ;;  %v733_v33 = vrot.slane %v732_v23, 2  ;;  %v762_v34 = vadd.f32 %v761_v24, %v747_v14 }
 0x287   :  { %v727_v35 = vrot.slane %v726_v27, 2  ;;  %v756_v36 = vadd.f32 %v755_v28, %v746_v16  ;;  %v740_v37 = vadd.f32 %v739_v29, %v738_v17  ;;  %v768_v38 = vrot.slane %v767_v30, 4 }
 0x288   :  { %v722_v39 = vadd.f32 %v721_v31, %v720_v21  ;;  %v751_v40 = vrot.slane %v750_v32, 2  ;;  %v734_v41 = vadd.f32 %v733_v33, %v732_v23  ;;  %v763_v42 = vrot.slane %v762_v34, 2 }
 0x289   :  { %v728_v43 = vadd.f32 %v727_v35, %v726_v27  ;;  %v757_v44 = vrot.slane %v756_v36, 2  ;;  %v741_v45 = vrot.slane %v740_v37, 2  ;;  %v769_v47 = vadd.f32 %v768_v38, %v767_v30 }
 0x28a   :  { %v723_v49 = vrot.slane %v722_v39, 1  ;;  %v752_v50 = vadd.f32 %v751_v40, %v750_v32  ;;  %v735_v51 = vrot.slane %v734_v41, 1  ;;  %v764_v52 = vadd.f32 %v763_v42, %v762_v34 }
 0x28b   :  { %v729_v53 = vrot.slane %v728_v43, 1  ;;  %v758_v56 = vadd.f32 %v757_v44, %v756_v36  ;;  %v742_v57 = vadd.f32 %v741_v45, %v740_v37  ;;  %v770_v58 = vrot.slane %v769_v47, 2 }
 0x28c   :  { %v724_v59 = vadd.f32 %v723_v49, %v722_v39  ;;  %v753_v60 = vrot.slane %v752_v50, 1  ;;  %v736_v61 = vadd.f32 %v735_v51, %v734_v41  ;;  %v765_v62 = vrot.slane %v764_v52, 1 }
 0x28d   :  { %v730_v1 = vadd.f32 %v729_v53, %v728_v43  ;;  %v759_v2 = vrot.slane %v758_v56, 1  ;;  %v743_v4 = vrot.slane %v742_v57, 1  ;;  %v771_v5 = vadd.f32 %v770_v58, %v769_v47  ;;  %v791_v43 = vld [vmem:[#allocation11 + $0x1] ss:$8 sm:$0xf] }
 0x28e   :  { %v754_v6 = vadd.f32 %v753_v60, %v752_v50  ;;  %v774_v7 = vmul.f32 0.125, %v724_v59  ;;  %v766_v8 = vadd.f32 %v765_v62, %v764_v52  ;;  %v776_v11 = vmul.f32 0.125, %v736_v61 }
 0x28f   :  { %v760_v12 = vadd.f32 %v759_v2, %v758_v56  ;;  %v775_v13 = vmul.f32 0.125, %v730_v1  ;;  %v744_v14 = vadd.f32 %v743_v4, %v742_v57  ;;  %v772_v3 = vrot.slane %v771_v5, 1 }
 0x290   :  { %v778_v16 = vmul.f32 0.125, %v754_v6  ;;  %v782_v17 = vmul.f32 %v774_v7, %v774_v7  ;;  %v780_v18 = vmul.f32 0.125, %v766_v8  ;;  %v784_v19 = vmul.f32 %v776_v11, %v776_v11  ;;  %v793_v8 = vld [vmem:[#allocation13 + $0x1] ss:$8 sm:$0xf] }
 0x291   :  { %v779_v20 = vmul.f32 0.125, %v760_v12  ;;  %v783_v21 = vmul.f32 %v775_v13, %v775_v13  ;;  %v773_v22 = vadd.f32 %v772_v3, %v771_v5  ;;  %v777_v23 = vmul.f32 0.125, %v744_v14 }
 0x292   :  { %v786_v24 = vsub.f32 %v778_v16, %v782_v17  ;;  %v788_v25 = vsub.f32 %v780_v18, %v784_v19  ;;  %v8599_v45 = vsub.s32 2, %v8548_v46  ;;  %v8602_v47 = vsub.s32 3, %v8548_v46 }
 0x293   :  { %v787_v26 = vsub.f32 %v779_v20, %v783_v21  ;;  %v781_v27 = vmul.f32 0.125, %v773_v22  ;;  %v785_v28 = vmul.f32 %v777_v23, %v777_v23 }
 0x294   :  { %v794_v29 = vadd.f32 1e-05, %v786_v24  ;;  %v796_v30 = vadd.f32 1e-05, %v788_v25 }
 0x295   :  { %v795_v31 = vadd.f32 1e-05, %v787_v26  ;;  %v789_v32 = vsub.f32 %v781_v27, %v785_v28  ;;  %v7333_v26 = vld [vmem:[#allocation8 + $0x8] ss:$16 sps:$4 sm:$0xff]  }
 0x296   :  { %8100 = vrsqrt.f32 %v794_v29  ;;  %v7338_v29 = vld [vmem:[#allocation8 + $0x2c] ss:$16 sps:$4 sm:$0xff]  }
 0x297   :  { %8102 = vrsqrt.f32 %v796_v30  ;;  %v797_v33 = vadd.f32 1e-05, %v789_v32  ;;  %v7336_v30 = vld [vmem:[#allocation8 + $0x28] ss:$16 sps:$4 sm:$0xff]  }
 0x298   :  { %8104 = vrsqrt.f32 %v795_v31  ;;  %v7341_v31 = vld [vmem:[#allocation8 + $0x4c] ss:$16 sps:$4 sm:$0xff]   ;;  %v7339_v32 = vld [vmem:[#allocation8 + $0x48] ss:$16 sps:$4 sm:$0xff]  }
 0x299   :  { %8106 = vrsqrt.f32 %v797_v33  ;;  %v7344_v33 = vld [vmem:[#allocation8 + $0x6c] ss:$16 sps:$4 sm:$0xff]  }
 0x2a0   :  { %v8101_v34 = vpop.eup %8100 }
 0x2a1   :  { %v8103_v35 = vpop.eup %8102 }
 0x2a2   :  { %v8105_v36 = vpop.eup %8104 }
 0x2a3   :  { %v8107_v37 = vpop.eup %8106  ;;  %v806_v38 = vcombine.low %v8101_v34, %v8105_v36  ;;  %v7342_v34 = vld [vmem:[#allocation8 + $0x68] ss:$16 sps:$4 sm:$0xff]  }
 0x2a4   :  { %v807_v39 = vcombine.low %v8103_v35, %v8107_v37  ;;  %v7347_v35 = vld [vmem:[#allocation8 + $0x8c] ss:$16 sps:$4 sm:$0xff]   ;;  %v7345_v36 = vld [vmem:[#allocation8 + $0x88] ss:$16 sps:$4 sm:$0xff]  }
 0x2a5   :  { %v814_v40 = vrot.slane %v806_v38, %v8551_v48  ;;  %v7350_v37 = vld [vmem:[#allocation8 + $0xac] ss:$16 sps:$4 sm:$0xff]   ;;  %v7348_v38 = vld [vmem:[#allocation8 + $0xa8] ss:$16 sps:$4 sm:$0xff]  }
 0x2a6   :  { %v821_v41 = vrot.slane %v807_v39, %v8551_v48  ;;  %v7353_v39 = vld [vmem:[#allocation8 + $0xcc] ss:$16 sps:$4 sm:$0xff]  }
 0x2a8   :  { %v822_v42 = vcombine.low %v814_v40, %v821_v41  ;;  %v7351_v40 = vld [vmem:[#allocation8 + $0xc8] ss:$16 sps:$4 sm:$0xff]   ;;  %v7356_v41 = vld [vmem:[#allocation8 + $0xec] ss:$16 sps:$4 sm:$0xff]  }
 0x2aa   :  { %v829_v44 = vrot.slane %v822_v42, %v8551_v48  ;;  %v7354_v42 = vld [vmem:[#allocation8 + $0xe8] ss:$16 sps:$4 sm:$0xff]  }
 0x2ac   :  { %v831_v49 = vmul.f32 %v829_v44, %v791_v43  ;;  %v7359_v43 = vld [vmem:[#allocation8 + $0x10c] ss:$16 sps:$4 sm:$0xff]   ;;  %v7357_v44 = vld [vmem:[#allocation8 + $0x108] ss:$16 sps:$4 sm:$0xff]  }
 0x2ae   :  { %v836_v50 = vrot.slane %v831_v49, %v8556_v54  ;;  %v840_v51 = vrot.slane %v831_v49, %v8559_v55  ;;  %v844_v52 = vrot.slane %v831_v49, %v8599_v45  ;;  %v848_v53 = vrot.slane %v831_v49, %v8602_v47  ;;  %v7362_v49 = vld [vmem:[#allocation8 + $0x12c] ss:$16 sps:$4 sm:$0xff]  }
 0x2b0   :  { %v853_v56 = vmul.f32 %v836_v50, %v774_v7  ;;  %v854_v57 = vmul.f32 %v840_v51, %v775_v13  ;;  %v855_v58 = vmul.f32 %v844_v52, %v776_v11  ;;  %v856_v59 = vmul.f32 %v848_v53, %v777_v23 }
 0x2b1   :  { %v890_v60 = vmul.f32 %v848_v53, %v8582_v63  ;;  %v888_v61 = vmul.f32 %v840_v51, %v8580_v15  ;;  %v887_v46 = vmul.f32 %v836_v50, %v8570_v9  ;;  %v889_v62 = vmul.f32 %v844_v52, %v8572_v10  ;;  %v7360_v50 = vld [vmem:[#allocation8 + $0x128] ss:$16 sps:$4 sm:$0xff]   ;;  %v7365_v51 = vld [vmem:[#allocation8 + $0x14c] ss:$16 sps:$4 sm:$0xff]  }
 0x2b2   :  { %v861_v1 = vcombine.low %v853_v56, %v854_v57  ;;  %v862_v2 = vcombine.low %v855_v58, %v856_v59  ;;  %v7363_v52 = vld [vmem:[#allocation8 + $0x148] ss:$16 sps:$4 sm:$0xff]   ;;  %v7368_v53 = vld [vmem:[#allocation8 + $0x16c] ss:$16 sps:$4 sm:$0xff]  }
 0x2b3   :  { %v7366_v56 = vld [vmem:[#allocation8 + $0x168] ss:$16 sps:$4 sm:$0xff]   ;;  %v7371_v57 = vld [vmem:[#allocation8 + $0x18c] ss:$16 sps:$4 sm:$0xff]  }
 0x2b4   :  { %v869_v4 = vrot.slane %v861_v1, %v8551_v48  ;;  %v876_v5 = vrot.slane %v862_v2, %v8551_v48  ;;  %v7369_v58 = vld [vmem:[#allocation8 + $0x188] ss:$16 sps:$4 sm:$0xff]   ;;  %v7374_v59 = vld [vmem:[#allocation8 + $0x1ac] ss:$16 sps:$4 sm:$0xff]  }
 0x2b5   :  { %v7378_v1 = vld [vmem:[#allocation8 + $0x1e8] ss:$16 sps:$4 sm:$0xff]   ;;  %v7383_v2 = vld [vmem:[#allocation8 + $0x20c] ss:$16 sps:$4 sm:$0xff]  }
 0x2b6   :  { %v877_v6 = vcombine.low %v869_v4, %v876_v5  ;;  %v7381_v4 = vld [vmem:[#allocation8 + $0x208] ss:$16 sps:$4 sm:$0xff]   ;;  %v7386_v5 = vld [vmem:[#allocation8 + $0x22c] ss:$16 sps:$4 sm:$0xff]  }
 0x2b8   :  { %v884_v7 = vrot.slane %v877_v6, %v8551_v48  ;;  %v7384_v6 = vld [vmem:[#allocation8 + $0x228] ss:$16 sps:$4 sm:$0xff]  }
 0x2ba   :  { %v886_v11 = vsub.f32 %v793_v8, %v884_v7  ;;  %v7389_v8 = vld [vmem:[#allocation8 + $0x24c] ss:$16 sps:$4 sm:$0xff]   ;;  %v7387_v7 = vld [vmem:[#allocation8 + $0x248] ss:$16 sps:$4 sm:$0xff]  }
 0x2bc   :  { %v907_v12 = vrot.slane %v886_v11, %v8602_v47  ;;  %v899_v63 = vrot.slane %v886_v11, %v8559_v55  ;;  %v895_v15 = vrot.slane %v886_v11, %v8556_v54  ;;  %v903_v9 = vrot.slane %v886_v11, %v8599_v45  ;;  %v7392_v11 = vld [vmem:[#allocation8 + $0x26c] ss:$16 sps:$4 sm:$0xff]  }
 0x2be   :  { %v915_v10 = vadd.f32 %v907_v12, %v890_v60  ;;  %v913_v13 = vadd.f32 %v899_v63, %v888_v61  ;;  %v912_v14 = vadd.f32 %v895_v15, %v887_v46  ;;  %v914_v3 = vadd.f32 %v903_v9, %v889_v62  ;;  %v7372_v60 = vld [vmem:[#allocation8 + $0x1a8] ss:$16 sps:$4 sm:$0xff]   ;;  %v7377_v61 = vld [vmem:[#allocation8 + $0x1cc] ss:$16 sps:$4 sm:$0xff]  }
 0x2bf   :  { %v7375_v46 = vld [vmem:[#allocation8 + $0x1c8] ss:$16 sps:$4 sm:$0xff]   ;;  %v7380_v62 = vld [vmem:[#allocation8 + $0x1ec] ss:$16 sps:$4 sm:$0xff]  }
 0x2c0   :  { %v919_v16 = vmul.f32 0.01, %v915_v10  ;;  %v917_v17 = vmul.f32 0.01, %v913_v13  ;;  %v916_v18 = vmul.f32 0.01, %v912_v14 }
 0x2c1   :  { %v918_v19 = vmul.f32 0.01, %v914_v3  ;;  %v7390_v12 = vld [vmem:[#allocation8 + $0x268] ss:$16 sps:$4 sm:$0xff]   ;;  %v7395_v63 = vld [vmem:[#allocation8 + $0x28c] ss:$16 sps:$4 sm:$0xff]  }
 0x2c2   :  { %v923_v20 = vmax.f32 %v915_v10, %v919_v16  ;;  %v921_v21 = vmax.f32 %v913_v13, %v917_v17  ;;  %v920_v22 = vmax.f32 %v912_v14, %v916_v18  ;;  %v7393_v15 = vld [vmem:[#allocation8 + $0x288] ss:$16 sps:$4 sm:$0xff]   ;;  %v7398_v9 = vld [vmem:[#allocation8 + $0x2ac] ss:$16 sps:$4 sm:$0xff]  }
 0x2c3   :  { %v922_v23 = vmax.f32 %v914_v3, %v918_v19  ;;  %v7396_v10 = vld [vmem:[#allocation8 + $0x2a8] ss:$16 sps:$4 sm:$0xff]   ;;  %v7401_v13 = vld [vmem:[#allocation8 + $0x2cc] ss:$16 sps:$4 sm:$0xff]   ;;  %v7410_v19 = vld [vmem:[#allocation8 + $0x324] ss:$16 sps:$4 sm:$0xff]  }
 0x2c4   :  { %v1025_v24 = vpack.c.bf16 %v921_v21, %v921_v21  ;;  %v8619_v25 = vpack.c.bf16 %v923_v20, %v923_v20  ;;  %v8621_v27 = vpack.c.bf16 %v920_v22, %v920_v22  ;;  %v7399_v14 = vld [vmem:[#allocation8 + $0x2c8] ss:$16 sps:$4 sm:$0xff]   ;;  %v7404_v3 = vld [vmem:[#allocation8 + $0x2ec] ss:$16 sps:$4 sm:$0xff]   ;;  %v7408_v21 = vld [vmem:[#allocation8 + $0x320] ss:$16 sps:$4 sm:$0xff]   ;;  %2507 = vmatprep.subr.bf16.mxu1 %v7410_v19 }
 0x2c5   :  { %v8623_v28 = vpack.c.bf16 %v922_v23, %v922_v23  ;;  %v7402_v16 = vld [vmem:[#allocation8 + $0x2e8] ss:$16 sps:$4 sm:$0xff]   ;;  %v7407_v17 = vld [vmem:[#allocation8 + $0x30c] ss:$16 sps:$4 sm:$0xff]   ;;  %v7416_v23 = vld [vmem:[#allocation8 + $0x344] ss:$16 sps:$4 sm:$0xff]  }
 0x2c6   :  { %1563 = vmatprep.mubr.bf16.mxu1 %v1025_v24  ;;  %6643 = vmatprep.mubr.msk.bf16.mxu0 %vm737_vm3, %v8619_v25  ;;  %v7405_v18 = vld [vmem:[#allocation8 + $0x308] ss:$16 sps:$4 sm:$0xff]   ;;  %v7413_v20 = vld [vmem:[#allocation8 + $0x32c] ss:$16 sps:$4 sm:$0xff]  }
 0x2c7   :  { %1564 = vmatmul.mubr.bf16.vlgmr.msra.gmra.mrb[8].mxu1 %v8621_v27  ;;  %1605 = vmatmul.mubr.bf16.vlgmr.msra.gmra.mrb[4].mxu0 %v8623_v28  ;;  %v7411_v22 = vld [vmem:[#allocation8 + $0x328] ss:$16 sps:$4 sm:$0xff]  }
 0x2c8   :  { %1614 = vmatpush1.bf16.msra.mxu0 %v7333_v26  ;;  %1645 = vmatprep.mubr.bf16.mxu0 %v1025_v24  ;;  %v7419_v24 = vld [vmem:[#allocation8 + $0x34c] ss:$16 sps:$4 sm:$0xff]   ;;  %v7417_v26 = vld [vmem:[#allocation8 + $0x348] ss:$16 sps:$4 sm:$0xff]  }
 0x2c9   :  { %1615 = vmatprep.subr.bf16.mxu0 %v7338_v29  ;;  %2508 = vmatpush1.bf16.msra.mxu1 %v7408_v21  ;;  %v7425_v29 = vld [vmem:[#allocation8 + $0x36c] ss:$16 sps:$4 sm:$0xff]  }
 0x2ca   :  { %2509 = vmatprep.subr.bf16.mxu1 %v7416_v23 }
 0x2cc   :  { %1616 = vmatpush1.bf16.msra.mxu0 %v7336_v30  ;;  %v7420_v30 = vld [vmem:[#allocation8 + $0x360] ss:$16 sps:$4 sm:$0xff]  }
 0x2cd   :  { %1617 = vmatprep.subr.bf16.mxu0 %v7341_v31  ;;  %v7428_v31 = vld [vmem:[#allocation8 + $0x384] ss:$16 sps:$4 sm:$0xff]  }
 0x2d0   :  { %1618 = vmatpush1.bf16.msra.mxu0 %v7339_v32  ;;  %v7431_v32 = vld [vmem:[#allocation8 + $0x38c] ss:$16 sps:$4 sm:$0xff]  }
 0x2d1   :  { %1619 = vmatprep.subr.bf16.mxu0 %v7344_v33  ;;  %v7426_v33 = vld [vmem:[#allocation8 + $0x380] ss:$16 sps:$4 sm:$0xff]  }
 0x2d4   :  { %1620 = vmatpush1.bf16.msra.mxu0 %v7342_v34  ;;  %v7429_v34 = vld [vmem:[#allocation8 + $0x388] ss:$16 sps:$4 sm:$0xff]  }
 0x2d5   :  { %1621 = vmatprep.subr.bf16.mxu0 %v7347_v35  ;;  %v7434_v35 = vld [vmem:[#allocation8 + $0x3a4] ss:$16 sps:$4 sm:$0xff]  }
 0x2d8   :  { %1622 = vmatpush1.bf16.msra.mxu0 %v7345_v36  ;;  %v7437_v36 = vld [vmem:[#allocation8 + $0x3ac] ss:$16 sps:$4 sm:$0xff]  }
 0x2d9   :  { %1623 = vmatprep.subr.bf16.mxu0 %v7350_v37  ;;  %v7432_v37 = vld [vmem:[#allocation8 + $0x3a0] ss:$16 sps:$4 sm:$0xff]  }
 0x2dc   :  { %1624 = vmatpush1.bf16.msra.mxu0 %v7348_v38  ;;  %v7435_v38 = vld [vmem:[#allocation8 + $0x3a8] ss:$16 sps:$4 sm:$0xff]  }
 0x2dd   :  { %1625 = vmatprep.subr.bf16.mxu0 %v7353_v39  ;;  %v7440_v39 = vld [vmem:[#allocation8 + $0x3c4] ss:$16 sps:$4 sm:$0xff]  }
 0x2e0   :  { %1626 = vmatpush1.bf16.msra.mxu0 %v7351_v40  ;;  %v7443_v40 = vld [vmem:[#allocation8 + $0x3cc] ss:$16 sps:$4 sm:$0xff]  }
 0x2e1   :  { %1627 = vmatprep.subr.bf16.mxu0 %v7356_v41  ;;  %v7438_v41 = vld [vmem:[#allocation8 + $0x3c0] ss:$16 sps:$4 sm:$0xff]  }
 0x2e4   :  { %1628 = vmatpush1.bf16.msra.mxu0 %v7354_v42  ;;  %v7441_v42 = vld [vmem:[#allocation8 + $0x3c8] ss:$16 sps:$4 sm:$0xff]  }
 0x2e5   :  { %1629 = vmatprep.subr.bf16.mxu0 %v7359_v43  ;;  %v7446_v43 = vld [vmem:[#allocation8 + $0x3e4] ss:$16 sps:$4 sm:$0xff]  }
 0x2e8   :  { %1630 = vmatpush1.bf16.msra.mxu0 %v7357_v44  ;;  %v7449_v44 = vld [vmem:[#allocation8 + $0x3ec] ss:$16 sps:$4 sm:$0xff]  }
 0x2e9   :  { %1631 = vmatprep.subr.bf16.mxu0 %v7362_v49 }
 0x2ec   :  { %1632 = vmatpush1.bf16.msra.mxu0 %v7360_v50 }
 0x2ed   :  { %1633 = vmatprep.subr.bf16.mxu0 %v7365_v51  ;;  %v7444_v51 = vld [vmem:[#allocation8 + $0x3e0] ss:$16 sps:$4 sm:$0xff]  }
 0x2f0   :  { %1634 = vmatpush1.bf16.msra.mxu0 %v7363_v52  ;;  %v7447_v52 = vld [vmem:[#allocation8 + $0x3e8] ss:$16 sps:$4 sm:$0xff]  }
 0x2f1   :  { %1635 = vmatprep.subr.bf16.mxu0 %v7368_v53 }
 0x2f4   :  { %1636 = vmatpush1.bf16.msra.mxu0 %v7366_v56 }
 0x2f5   :  { %1637 = vmatprep.subr.bf16.mxu0 %v7371_v57 }
 0x2f8   :  { %1638 = vmatpush1.bf16.msra.mxu0 %v7369_v58 }
 0x2f9   :  { %1639 = vmatprep.subr.bf16.mxu0 %v7374_v59 }
 0x2fc   :  { %1640 = vmatpush1.bf16.msra.mxu0 %v7372_v60 }
 0x2fd   :  { %1641 = vmatprep.subr.bf16.mxu0 %v7377_v61 }
 0x300   :  { %1642 = vmatpush1.bf16.msra.mxu0 %v7375_v46 }
 0x301   :  { %1643 = vmatprep.subr.bf16.mxu0 %v7380_v62 }
 0x304   :  { %1644 = vmatpush1.bf16.msra.mxu0 %v7378_v1 }
 0x305   :  { %1654 = vmatprep.subr.bf16.mxu0 %v7383_v2  ;;  %v7452_v2 = vld [vmem:[#allocation8 + $0x404] ss:$16 sps:$4 sm:$0xff]  }
 0x307   :  { %1646 = vmatmul.mubr.bf16.vlgmr.msra.gmra.mrb[8].mxu0 %v8621_v27  ;;  %v7422_v27 = vld [vmem:[#allocation8 + $0x364] ss:$16 sps:$4 sm:$0xff]  }
 0x308   :  { %1655 = vmatpush1.bf16.msra.mxu0 %v7381_v4  ;;  %6644 = vmatprep.mubr.msk.bf16.mxu0 %vm737_vm3, %v8619_v25  ;;  %v7414_v25 = vld [vmem:[#allocation8 + $0x340] ss:$16 sps:$4 sm:$0xff]  }
 0x309   :  { %1656 = vmatprep.subr.bf16.mxu0 %v7386_v5  ;;  %2510 = vmatpush1.bf16.msra.mxu1 %v7414_v25  ;;  %v7464_v25 = vld [vmem:[#allocation8 + $0x444] ss:$16 sps:$4 sm:$0xff]  }
 0x30a   :  { %2511 = vmatprep.subr.bf16.mxu1 %v7422_v27 }
 0x30c   :  { %1657 = vmatpush1.bf16.msra.mxu0 %v7384_v6  ;;  %v7450_v6 = vld [vmem:[#allocation8 + $0x400] ss:$16 sps:$4 sm:$0xff]  }
 0x30d   :  { %1658 = vmatprep.subr.bf16.mxu0 %v7389_v8  ;;  %2512 = vmatpush1.bf16.msra.mxu1 %v7420_v30  ;;  %v7453_v8 = vld [vmem:[#allocation8 + $0x408] ss:$16 sps:$4 sm:$0xff]   ;;  %v7462_v30 = vld [vmem:[#allocation8 + $0x440] ss:$16 sps:$4 sm:$0xff]  }
 0x30e   :  { %2513 = vmatprep.subr.bf16.mxu1 %v7428_v31 }
 0x310   :  { %1659 = vmatpush1.bf16.msra.mxu0 %v7387_v7 }
 0x311   :  { %1660 = vmatprep.subr.bf16.mxu0 %v7392_v11  ;;  %2514 = vmatpush1.bf16.msra.mxu1 %v7426_v33 }
 0x312   :  { %2515 = vmatprep.subr.bf16.mxu1 %v7434_v35 }
 0x314   :  { %1661 = vmatpush1.bf16.msra.mxu0 %v7390_v12  ;;  %v7455_v12 = vld [vmem:[#allocation8 + $0x40c] ss:$16 sps:$4 sm:$0xff]  }
 0x315   :  { %1662 = vmatprep.subr.bf16.mxu0 %v7395_v63  ;;  %2516 = vmatpush1.bf16.msra.mxu1 %v7432_v37  ;;  %v7470_v37 = vld [vmem:[#allocation8 + $0x464] ss:$16 sps:$4 sm:$0xff]  }
 0x316   :  { %2517 = vmatprep.subr.bf16.mxu1 %v7440_v39 }
 0x318   :  { %1663 = vmatpush1.bf16.msra.mxu0 %v7393_v15 }
 0x319   :  { %1664 = vmatprep.subr.bf16.mxu0 %v7398_v9  ;;  %2518 = vmatpush1.bf16.msra.mxu1 %v7438_v41  ;;  %v7468_v41 = vld [vmem:[#allocation8 + $0x460] ss:$16 sps:$4 sm:$0xff]  }
 0x31a   :  { %2519 = vmatprep.subr.bf16.mxu1 %v7446_v43 }
 0x31c   :  { %1665 = vmatpush1.bf16.msra.mxu0 %v7396_v10 }
 0x31d   :  { %1666 = vmatprep.subr.bf16.mxu0 %v7401_v13  ;;  %2520 = vmatpush1.bf16.msra.mxu1 %v7444_v51  ;;  %v7458_v13 = vld [vmem:[#allocation8 + $0x424] ss:$16 sps:$4 sm:$0xff]  }
 0x31e   :  { %2521 = vmatprep.subr.bf16.mxu1 %v7452_v2  ;;  %v7480_v2 = vld [vmem:[#allocation8 + $0x4a0] ss:$16 sps:$4 sm:$0xff]  }
 0x320   :  { %1667 = vmatpush1.bf16.msra.mxu0 %v7399_v14  ;;  %v7461_v14 = vld [vmem:[#allocation8 + $0x42c] ss:$16 sps:$4 sm:$0xff]  }
 0x321   :  { %1668 = vmatprep.subr.bf16.mxu0 %v7404_v3  ;;  %2522 = vmatpush1.bf16.msra.mxu1 %v7450_v6  ;;  %v7491_v6 = vld [vmem:[#allocation8 + $0x4cc] ss:$16 sps:$4 sm:$0xff]  }
 0x322   :  { %2523 = vmatprep.subr.bf16.mxu1 %v7458_v13 }
 0x324   :  { %1669 = vmatpush1.bf16.msra.mxu0 %v7402_v16 }
 0x325   :  { %1670 = vmatprep.subr.bf16.mxu0 %v7407_v17  ;;  %v7456_v17 = vld [vmem:[#allocation8 + $0x420] ss:$16 sps:$4 sm:$0xff]  }
 0x326   :  { %2524 = vmatpush1.bf16.msra.mxu1 %v7456_v17  ;;  %v7501_v17 = vld [vmem:[#allocation8 + $0x508] ss:$16 sps:$4 sm:$0xff]  }
 0x327   :  { %2525 = vmatprep.subr.bf16.mxu1 %v7464_v25 }
 0x328   :  { %1671 = vmatpush1.bf16.msra.mxu0 %v7405_v18  ;;  %v7459_v18 = vld [vmem:[#allocation8 + $0x428] ss:$16 sps:$4 sm:$0xff]  }
 0x329   :  { %2589 = vmatprep.subr.bf16.mxu0 %v7413_v20 }
 0x32a   :  { %2526 = vmatpush1.bf16.msra.mxu1 %v7462_v30 }
 0x32b   :  { %1687 = vmatmul.mubr.bf16.vlgmr.msra.gmra.mrb[8].mxu0 %v8623_v28  ;;  %v7423_v28 = vld [vmem:[#allocation8 + $0x368] ss:$16 sps:$4 sm:$0xff]   ;;  %2527 = vmatprep.subr.bf16.mxu1 %v7470_v37 }
 0x32c   :  { %2590 = vmatpush1.bf16.msra.mxu0 %v7411_v22 }
 0x32d   :  { %2591 = vmatprep.subr.bf16.mxu0 %v7419_v24 }
 0x32e   :  { %2528 = vmatpush1.bf16.msra.mxu1 %v7468_v41 }
 0x330   :  { %2592 = vmatpush1.bf16.msra.mxu0 %v7417_v26  ;;  %v7467_v26 = vld [vmem:[#allocation8 + $0x44c] ss:$16 sps:$4 sm:$0xff]  }
 0x331   :  { %2593 = vmatprep.subr.bf16.mxu0 %v7425_v29 }
 0x334   :  { %2594 = vmatpush1.bf16.msra.mxu0 %v7423_v28  ;;  %v7465_v28 = vld [vmem:[#allocation8 + $0x448] ss:$16 sps:$4 sm:$0xff]  }
 0x335   :  { %2595 = vmatprep.subr.bf16.mxu0 %v7431_v32 }
 0x338   :  { %2596 = vmatpush1.bf16.msra.mxu0 %v7429_v34 }
 0x339   :  { %2597 = vmatprep.subr.bf16.mxu0 %v7437_v36 }
 0x33c   :  { %2598 = vmatpush1.bf16.msra.mxu0 %v7435_v38  ;;  %v7473_v38 = vld [vmem:[#allocation8 + $0x46c] ss:$16 sps:$4 sm:$0xff]  }
 0x33d   :  { %2599 = vmatprep.subr.bf16.mxu0 %v7443_v40 }
 0x340   :  { %2600 = vmatpush1.bf16.msra.mxu0 %v7441_v42  ;;  %v7471_v42 = vld [vmem:[#allocation8 + $0x468] ss:$16 sps:$4 sm:$0xff]  }
 0x341   :  { %2601 = vmatprep.subr.bf16.mxu0 %v7449_v44 }
 0x344   :  { %2602 = vmatpush1.bf16.msra.mxu0 %v7447_v52  ;;  %v7476_v52 = vld [vmem:[#allocation8 + $0x484] ss:$16 sps:$4 sm:$0xff]  }
 0x345   :  { %2603 = vmatprep.subr.bf16.mxu0 %v7455_v12  ;;  %2529 = vmatprep.subr.bf16.mxu1 %v7476_v52  ;;  %v7497_v12 = vld [vmem:[#allocation8 + $0x4ec] ss:$16 sps:$4 sm:$0xff]  }
 0x348   :  { %2604 = vmatpush1.bf16.msra.mxu0 %v7453_v8  ;;  %v7486_v8 = vld [vmem:[#allocation8 + $0x4c0] ss:$16 sps:$4 sm:$0xff]  }
 0x349   :  { %2605 = vmatprep.subr.bf16.mxu0 %v7461_v14  ;;  %v7500_v14 = vld [vmem:[#allocation8 + $0x504] ss:$16 sps:$4 sm:$0xff]  }
 0x34c   :  { %2606 = vmatpush1.bf16.msra.mxu0 %v7459_v18  ;;  %v7506_v18 = vld [vmem:[#allocation8 + $0x524] ss:$16 sps:$4 sm:$0xff]  }
 0x34d   :  { %2607 = vmatprep.subr.bf16.mxu0 %v7467_v26 }
 0x350   :  { %2608 = vmatpush1.bf16.msra.mxu0 %v7465_v28 }
 0x351   :  { %2609 = vmatprep.subr.bf16.mxu0 %v7473_v38 }
 0x354   :  { %2610 = vmatpush1.bf16.msra.mxu0 %v7471_v42 }
 0x39a   :  { %v1565_v49 = vpop.f32.mrb[8].mxu1  ;;  %v1606_v50 = vpop.f32.mrb[4].mxu0 }
 0x39b   :  { %v8633_v53 = vadd.f32 %v1606_v50, %v1565_v49  ;;  %v1567_v56 = vpop.f32.mrb[9].mxu1  ;;  %v1608_v57 = vpop.f32.mrb[5].mxu0 }
 0x39c   :  { %v8635_v58 = vadd.f32 %v1608_v57, %v1567_v56  ;;  %v1569_v59 = vpop.f32.mrb[10].mxu1  ;;  %v1610_v60 = vpop.f32.mrb[6].mxu0  ;;  %v7479_v56 = vld [vmem:[#allocation8 + $0x48c] ss:$16 sps:$4 sm:$0xff]  }
 0x39d   :  { %v1695_v61 = vrot.slane %v8633_v53, 4  ;;  %v1720_v46 = vmul.f32 %v8633_v53, %v8633_v53  ;;  %v1570_v62 = vpop.f32.mrb[11].mxu1  ;;  %v1611_v1 = vpop.f32.mrb[7].mxu0  ;;  %v7474_v59 = vld [vmem:[#allocation8 + $0x480] ss:$16 sps:$4 sm:$0xff]   ;;  %2611 = vmatprep.subr.bf16.mxu0 %v7479_v56 }
 0x39e   :  { %v1701_v4 = vrot.slane %v8635_v58, 4  ;;  %v1721_v5 = vmul.f32 %v8635_v58, %v8635_v58  ;;  %v7477_v60 = vld [vmem:[#allocation8 + $0x488] ss:$16 sps:$4 sm:$0xff]   ;;  %2530 = vmatpush1.bf16.msra.mxu1 %v7474_v59  ;;  %v7482_v62 = vld [vmem:[#allocation8 + $0x4a4] ss:$16 sps:$4 sm:$0xff]  }
 0x39f   :  { %v1696_v7 = vadd.f32 %v1695_v61, %v8633_v53  ;;  %v1724_v11 = vrot.slane %v1720_v46, 4  ;;  %v7485_v1 = vld [vmem:[#allocation8 + $0x4ac] ss:$16 sps:$4 sm:$0xff]   ;;  %2612 = vmatpush1.bf16.msra.mxu0 %v7477_v60  ;;  %2531 = vmatprep.subr.bf16.mxu1 %v7482_v62 }
 0x3a0   :  { %v1702_v63 = vadd.f32 %v1701_v4, %v8635_v58  ;;  %v1730_v15 = vrot.slane %v1721_v5, 4  ;;  %v7483_v4 = vld [vmem:[#allocation8 + $0x4a8] ss:$16 sps:$4 sm:$0xff]   ;;  %2613 = vmatprep.subr.bf16.mxu0 %v7485_v1 }
 0x3a1   :  { %v1697_v9 = vrot.slane %v1696_v7, 2  ;;  %v1725_v10 = vadd.f32 %v1724_v11, %v1720_v46  ;;  %v7494_v11 = vld [vmem:[#allocation8 + $0x4e4] ss:$16 sps:$4 sm:$0xff]  }
 0x3a2   :  { %v1703_v3 = vrot.slane %v1702_v63, 2  ;;  %v1731_v16 = vadd.f32 %v1730_v15, %v1721_v5  ;;  %2532 = vmatpush1.bf16.msra.mxu1 %v7480_v2  ;;  %v7488_v5 = vld [vmem:[#allocation8 + $0x4c4] ss:$16 sps:$4 sm:$0xff]   ;;  %v7495_v15 = vld [vmem:[#allocation8 + $0x4e8] ss:$16 sps:$4 sm:$0xff]  }
 0x3a3   :  { %v1698_v19 = vadd.f32 %v1697_v9, %v1696_v7  ;;  %v1726_v20 = vrot.slane %v1725_v10, 2  ;;  %2614 = vmatpush1.bf16.msra.mxu0 %v7483_v4  ;;  %v7489_v7 = vld [vmem:[#allocation8 + $0x4c8] ss:$16 sps:$4 sm:$0xff]   ;;  %2533 = vmatprep.subr.bf16.mxu1 %v7488_v5 }
 0x3a4   :  { %v1704_v21 = vadd.f32 %v1703_v3, %v1702_v63  ;;  %v1732_v22 = vrot.slane %v1731_v16, 2  ;;  %2615 = vmatprep.subr.bf16.mxu0 %v7491_v6  ;;  %v7492_v63 = vld [vmem:[#allocation8 + $0x4e0] ss:$16 sps:$4 sm:$0xff]   ;;  %v7503_v3 = vld [vmem:[#allocation8 + $0x50c] ss:$16 sps:$4 sm:$0xff]  }
 0x3a5   :  { %v1699_v23 = vrot.slane %v1698_v19, 1  ;;  %v1727_v24 = vadd.f32 %v1726_v20, %v1725_v10 }
 0x3a6   :  { %v1705_v27 = vrot.slane %v1704_v21, 1  ;;  %v1733_v29 = vadd.f32 %v1732_v22, %v1731_v16  ;;  %2534 = vmatpush1.bf16.msra.mxu1 %v7486_v8  ;;  %v7498_v16 = vld [vmem:[#allocation8 + $0x500] ss:$16 sps:$4 sm:$0xff]  }
 0x3a7   :  { %v1700_v31 = vadd.f32 %v1699_v23, %v1698_v19  ;;  %v1728_v32 = vrot.slane %v1727_v24, 1  ;;  %2616 = vmatpush1.bf16.msra.mxu0 %v7489_v7  ;;  %2535 = vmatprep.subr.bf16.mxu1 %v7494_v11  ;;  %v7509_v19 = vld [vmem:[#allocation8 + $0x52c] ss:$16 sps:$4 sm:$0xff]  }
 0x3a8   :  { %v1706_v33 = vadd.f32 %v1705_v27, %v1704_v21  ;;  %v1734_v34 = vrot.slane %v1733_v29, 1  ;;  %2617 = vmatprep.subr.bf16.mxu0 %v7497_v12 }
 0x3a9   :  { %v1729_v35 = vadd.f32 %v1728_v32, %v1727_v24  ;;  %v8645_v36 = vmul.f32 0.125, %v1700_v31 }
 0x3aa   :  { %v1735_v39 = vadd.f32 %v1734_v34, %v1733_v29  ;;  %v8647_v40 = vmul.f32 0.125, %v1706_v33  ;;  %2536 = vmatpush1.bf16.msra.mxu1 %v7492_v63 }
 0x3ab   :  { %v1753_v43 = vmul.f32 0.125, %v1729_v35  ;;  %v1757_v44 = vmul.f32 %v8645_v36, %v8645_v36  ;;  %2618 = vmatpush1.bf16.msra.mxu0 %v7495_v15  ;;  %2537 = vmatprep.subr.bf16.mxu1 %v7500_v14 }
 0x3ac   :  { %v1754_v49 = vmul.f32 0.125, %v1735_v39  ;;  %v1758_v50 = vmul.f32 %v8647_v40, %v8647_v40  ;;  %2619 = vmatprep.subr.bf16.mxu0 %v7503_v3  ;;  %v1766_v3 = vld [vmem:[#allocation11 + $0x2] ss:$8 sm:$0xf] }
 0x3ad   :  { %v1761_v51 = vsub.f32 %v1753_v43, %v1757_v44 }
 0x3ae   :  { %v1762_v57 = vsub.f32 %v1754_v49, %v1758_v50  ;;  %2538 = vmatpush1.bf16.msra.mxu1 %v7498_v16 }
 0x3af   :  { %v1769_v61 = vadd.f32 1e-05, %v1761_v51  ;;  %2620 = vmatpush1.bf16.msra.mxu0 %v7501_v17  ;;  %2548 = vmatprep.subr.bf16.mxu1 %v7506_v18 }
 0x3b0   :  { %v1770_v46 = vadd.f32 1e-05, %v1762_v57  ;;  %2630 = vmatprep.subr.bf16.mxu0 %v7509_v19 }
 0x3b1   :  { %8108 = vrsqrt.f32 %v1769_v61 }
 0x3b2   :  { %8110 = vrsqrt.f32 %v1770_v46 }
 0x3bb   :  { %v8653_v9 = vpop.eup %8108 }
 0x3bc   :  { %v8655_v10 = vpop.eup %8110 }
 0x3bd   :  { %v1781_v13 = vcombine.low %v8653_v9, %v8655_v10 }
 0x3bf   :  { %v1789_v9 = vrot.slane %v1781_v13, %v8551_v48 }
 0x3fe   :  { %v8659_v20 = vpop.f32.mrb[8].mxu0 }
 0x3ff   :  { %v1707_v21 = vrot.slane %v8659_v20, 4  ;;  %v1722_v22 = vmul.f32 %v8659_v20, %v8659_v20  ;;  %v1690_v23 = vpop.f32.mrb[9].mxu0 }
 0x400   :  { %v1713_v24 = vsel %vm737_vm3, %v1690_v23, 0.0  ;;  %v1723_v25 = vmul.f32 %v1690_v23, %v1690_v23  ;;  %v1692_v26 = vpop.f32.mrb[10].mxu0 }
 0x401   :  { %v1708_v27 = vadd.f32 %v1707_v21, %v8659_v20  ;;  %v1736_v29 = vrot.slane %v1722_v22, 4  ;;  %v1714_v30 = vrot.slane %v1713_v24, 4  ;;  %v1693_v28 = vpop.f32.mrb[11].mxu0 }
 0x402   :  { %v1742_v31 = vsel %vm737_vm3, %v1723_v25, 0.0 }
 0x403   :  { %v1709_v32 = vrot.slane %v1708_v27, 2  ;;  %v1737_v33 = vadd.f32 %v1736_v29, %v1722_v22  ;;  %v1715_v34 = vadd.f32 %v1714_v30, %v1713_v24  ;;  %v1743_v35 = vrot.slane %v1742_v31, 4 }
 0x405   :  { %v1710_v37 = vadd.f32 %v1709_v32, %v1708_v27  ;;  %v1738_v38 = vrot.slane %v1737_v33, 2  ;;  %v1716_v39 = vrot.slane %v1715_v34, 2  ;;  %v1744_v41 = vadd.f32 %v1743_v35, %v1742_v31 }
 0x407   :  { %v1711_v42 = vrot.slane %v1710_v37, 1  ;;  %v1739_v43 = vadd.f32 %v1738_v38, %v1737_v33  ;;  %v1717_v44 = vadd.f32 %v1716_v39, %v1715_v34  ;;  %v1745_v49 = vrot.slane %v1744_v41, 2 }
 0x409   :  { %v1712_v50 = vadd.f32 %v1711_v42, %v1710_v37  ;;  %v1740_v51 = vrot.slane %v1739_v43, 1  ;;  %v1718_v52 = vrot.slane %v1717_v44, 1  ;;  %v1746_v56 = vadd.f32 %v1745_v49, %v1744_v41  ;;  %v1768_v37 = vld [vmem:[#allocation13 + $0x2] ss:$8 sm:$0xf] }
 0x40b   :  { %v1741_v57 = vadd.f32 %v1740_v51, %v1739_v43  ;;  %v1751_v59 = vmul.f32 0.125, %v1712_v50  ;;  %v1719_v60 = vadd.f32 %v1718_v52, %v1717_v44  ;;  %v1747_v61 = vrot.slane %v1746_v56, 1 }
 0x40d   :  { %v1755_v46 = vmul.f32 0.125, %v1741_v57  ;;  %v1759_v62 = vmul.f32 %v1751_v59, %v1751_v59  ;;  %v1748_v1 = vadd.f32 %v1747_v61, %v1746_v56  ;;  %v1752_v2 = vmul.f32 0.125, %v1719_v60  ;;  %v7504_v57 = vld [vmem:[#allocation8 + $0x520] ss:$16 sps:$4 sm:$0xff]   ;;  %v7512_v61 = vld [vmem:[#allocation8 + $0x544] ss:$16 sps:$4 sm:$0xff]  }
 0x40f   :  { %v1763_v4 = vsub.f32 %v1755_v46, %v1759_v62  ;;  %v1756_v5 = vmul.f32 0.125, %v1748_v1  ;;  %v1760_v6 = vmul.f32 %v1752_v2, %v1752_v2  ;;  %v7515_v46 = vld [vmem:[#allocation8 + $0x54c] ss:$16 sps:$4 sm:$0xff]   ;;  %v7510_v1 = vld [vmem:[#allocation8 + $0x540] ss:$16 sps:$4 sm:$0xff]  }
 0x411   :  { %v1771_v8 = vadd.f32 1e-05, %v1763_v4  ;;  %v1764_v7 = vsub.f32 %v1756_v5, %v1760_v6  ;;  %v7518_v4 = vld [vmem:[#allocation8 + $0x564] ss:$16 sps:$4 sm:$0xff]   ;;  %v7521_v5 = vld [vmem:[#allocation8 + $0x56c] ss:$16 sps:$4 sm:$0xff]  }
 0x412   :  { %v7516_v6 = vld [vmem:[#allocation8 + $0x560] ss:$16 sps:$4 sm:$0xff]  }
 0x413   :  { %v1772_v11 = vadd.f32 1e-05, %v1764_v7  ;;  %8112 = vrsqrt.f32 %v1771_v8  ;;  %v7519_v8 = vld [vmem:[#allocation8 + $0x568] ss:$16 sps:$4 sm:$0xff]   ;;  %v7524_v7 = vld [vmem:[#allocation8 + $0x584] ss:$16 sps:$4 sm:$0xff]  }
 0x415   :  { %8114 = vrsqrt.f32 %v1772_v11  ;;  %v7527_v11 = vld [vmem:[#allocation8 + $0x58c] ss:$16 sps:$4 sm:$0xff]  }
 0x41d   :  { %v8113_v12 = vpop.eup %8112 }
 0x41f   :  { %v8115_v63 = vpop.eup %8114 }
 0x420   :  { %v1782_v15 = vcombine.low %v8113_v12, %v8115_v63  ;;  %v7522_v12 = vld [vmem:[#allocation8 + $0x580] ss:$16 sps:$4 sm:$0xff]   ;;  %v7525_v63 = vld [vmem:[#allocation8 + $0x588] ss:$16 sps:$4 sm:$0xff]  }
 0x422   :  { %v1796_v10 = vrot.slane %v1782_v15, %v8551_v48  ;;  %v7530_v15 = vld [vmem:[#allocation8 + $0x5a4] ss:$16 sps:$4 sm:$0xff]  }
 0x424   :  { %v1797_v14 = vcombine.low %v1789_v9, %v1796_v10  ;;  %v7533_v9 = vld [vmem:[#allocation8 + $0x5ac] ss:$16 sps:$4 sm:$0xff]   ;;  %v7528_v10 = vld [vmem:[#allocation8 + $0x5a0] ss:$16 sps:$4 sm:$0xff]  }
 0x426   :  { %v1804_v16 = vrot.slane %v1797_v14, %v8551_v48  ;;  %v7531_v14 = vld [vmem:[#allocation8 + $0x5a8] ss:$16 sps:$4 sm:$0xff]  }
 0x428   :  { %v1806_v17 = vmul.f32 %v1804_v16, %v1766_v3  ;;  %v7536_v3 = vld [vmem:[#allocation8 + $0x5c4] ss:$16 sps:$4 sm:$0xff]   ;;  %v7539_v16 = vld [vmem:[#allocation8 + $0x5cc] ss:$16 sps:$4 sm:$0xff]  }
 0x42a   :  { %v1811_v18 = vrot.slane %v1806_v17, %v8556_v54  ;;  %v1815_v19 = vrot.slane %v1806_v17, %v8559_v55  ;;  %v1819_v21 = vrot.slane %v1806_v17, %v8599_v45  ;;  %v1823_v22 = vrot.slane %v1806_v17, %v8602_v47  ;;  %v7534_v17 = vld [vmem:[#allocation8 + $0x5c0] ss:$16 sps:$4 sm:$0xff]  }
 0x42c   :  { %v1828_v24 = vmul.f32 %v1811_v18, %v8645_v36  ;;  %v1829_v25 = vmul.f32 %v1815_v19, %v8647_v40  ;;  %v1830_v13 = vmul.f32 %v1819_v21, %v1751_v59  ;;  %v1831_v26 = vmul.f32 %v1823_v22, %v1752_v2  ;;  %v7507_v59 = vld [vmem:[#allocation8 + $0x528] ss:$16 sps:$4 sm:$0xff]  }
 0x42d   :  { %v1865_v27 = vmul.f32 %v1823_v22, %v1690_v23  ;;  %v1863_v29 = vmul.f32 %v1815_v19, %v8635_v58  ;;  %v1862_v30 = vmul.f32 %v1811_v18, %v8633_v53  ;;  %v1864_v28 = vmul.f32 %v1819_v21, %v8659_v20  ;;  %v7513_v2 = vld [vmem:[#allocation8 + $0x548] ss:$16 sps:$4 sm:$0xff]   ;;  %v7542_v19 = vld [vmem:[#allocation8 + $0x5e4] ss:$16 sps:$4 sm:$0xff]   ;;  %v7545_v21 = vld [vmem:[#allocation8 + $0x5ec] ss:$16 sps:$4 sm:$0xff]  }
 0x42e   :  { %v1836_v31 = vcombine.low %v1828_v24, %v1829_v25  ;;  %v1837_v32 = vcombine.low %v1830_v13, %v1831_v26  ;;  %v7537_v18 = vld [vmem:[#allocation8 + $0x5c8] ss:$16 sps:$4 sm:$0xff]   ;;  %v7540_v22 = vld [vmem:[#allocation8 + $0x5e0] ss:$16 sps:$4 sm:$0xff]   ;;  %v7548_v25 = vld [vmem:[#allocation8 + $0x604] ss:$16 sps:$4 sm:$0xff]  }
 0x42f   :  { %v7543_v24 = vld [vmem:[#allocation8 + $0x5e8] ss:$16 sps:$4 sm:$0xff]   ;;  %v7551_v13 = vld [vmem:[#allocation8 + $0x60c] ss:$16 sps:$4 sm:$0xff]   ;;  %v7546_v26 = vld [vmem:[#allocation8 + $0x600] ss:$16 sps:$4 sm:$0xff]  }
 0x430   :  { %v1844_v33 = vrot.slane %v1836_v31, %v8551_v48  ;;  %v1851_v34 = vrot.slane %v1837_v32, %v8551_v48  ;;  %v7552_v31 = vld [vmem:[#allocation8 + $0x620] ss:$16 sps:$4 sm:$0xff]   ;;  %v7555_v32 = vld [vmem:[#allocation8 + $0x628] ss:$16 sps:$4 sm:$0xff]  }
 0x432   :  { %v1852_v35 = vcombine.low %v1844_v33, %v1851_v34 }
 0x434   :  { %v1859_v36 = vrot.slane %v1852_v35, %v8551_v48  ;;  %v7560_v35 = vld [vmem:[#allocation8 + $0x644] ss:$16 sps:$4 sm:$0xff]  }
 0x436   :  { %v1861_v40 = vsub.f32 %v1768_v37, %v1859_v36  ;;  %v7563_v37 = vld [vmem:[#allocation8 + $0x64c] ss:$16 sps:$4 sm:$0xff]   ;;  %v7558_v36 = vld [vmem:[#allocation8 + $0x640] ss:$16 sps:$4 sm:$0xff]  }
 0x438   :  { %v1882_v38 = vrot.slane %v1861_v40, %v8602_v47  ;;  %v1874_v23 = vrot.slane %v1861_v40, %v8559_v55  ;;  %v1870_v58 = vrot.slane %v1861_v40, %v8556_v54  ;;  %v1878_v53 = vrot.slane %v1861_v40, %v8599_v45  ;;  %v7561_v40 = vld [vmem:[#allocation8 + $0x648] ss:$16 sps:$4 sm:$0xff]  }
 0x43a   :  { %v1890_v20 = vadd.f32 %v1882_v38, %v1865_v27  ;;  %v1888_v39 = vadd.f32 %v1874_v23, %v1863_v29  ;;  %v1887_v41 = vadd.f32 %v1870_v58, %v1862_v30  ;;  %v8686_v42 = vadd.f32 %v1878_v53, %v1864_v28  ;;  %v7549_v27 = vld [vmem:[#allocation8 + $0x608] ss:$16 sps:$4 sm:$0xff]   ;;  %v7554_v29 = vld [vmem:[#allocation8 + $0x624] ss:$16 sps:$4 sm:$0xff]   ;;  %v7557_v30 = vld [vmem:[#allocation8 + $0x62c] ss:$16 sps:$4 sm:$0xff]  }
 0x43b   :  { %v7566_v38 = vld [vmem:[#allocation8 + $0x664] ss:$16 sps:$4 sm:$0xff]   ;;  %v7569_v23 = vld [vmem:[#allocation8 + $0x66c] ss:$16 sps:$4 sm:$0xff]   ;;  %v7564_v58 = vld [vmem:[#allocation8 + $0x660] ss:$16 sps:$4 sm:$0xff]  }
 0x43c   :  { %v1894_v43 = vmul.f32 0.01, %v1890_v20  ;;  %v1892_v44 = vmul.f32 0.01, %v1888_v39  ;;  %v1891_v49 = vmul.f32 0.01, %v1887_v41 }
 0x43d   :  { %v1893_v28 = vmul.f32 0.01, %v8686_v42  ;;  %v7567_v53 = vld [vmem:[#allocation8 + $0x668] ss:$16 sps:$4 sm:$0xff]  }
 0x43e   :  { %v1896_v50 = vmax.f32 %v1888_v39, %v1892_v44  ;;  %v1895_v51 = vmax.f32 %v1887_v41, %v1891_v49  ;;  %v1898_v52 = vmax.f32 %v1890_v20, %v1894_v43  ;;  %v7572_v20 = vld [vmem:[#allocation8 + $0x684] ss:$16 sps:$4 sm:$0xff]   ;;  %v7575_v39 = vld [vmem:[#allocation8 + $0x68c] ss:$16 sps:$4 sm:$0xff]   ;;  %v7570_v41 = vld [vmem:[#allocation8 + $0x680] ss:$16 sps:$4 sm:$0xff]  }
 0x43f   :  { %v1897_v33 = vmax.f32 %v8686_v42, %v1893_v28  ;;  %v7573_v42 = vld [vmem:[#allocation8 + $0x688] ss:$16 sps:$4 sm:$0xff]   ;;  %v7578_v43 = vld [vmem:[#allocation8 + $0x6a4] ss:$16 sps:$4 sm:$0xff]   ;;  %v7581_v44 = vld [vmem:[#allocation8 + $0x6ac] ss:$16 sps:$4 sm:$0xff]  }
 0x440   :  { %v2001_v56 = vpack.c.bf16 %v1896_v50, %v1896_v50  ;;  %v2000_v60 = vpack.c.bf16 %v1895_v51, %v1895_v51  ;;  %v2003_v62 = vpack.c.bf16 %v1898_v52, %v1898_v52  ;;  %v7576_v49 = vld [vmem:[#allocation8 + $0x6a0] ss:$16 sps:$4 sm:$0xff]   ;;  %v7579_v50 = vld [vmem:[#allocation8 + $0x6a8] ss:$16 sps:$4 sm:$0xff]   ;;  %v7584_v51 = vld [vmem:[#allocation8 + $0x6c4] ss:$16 sps:$4 sm:$0xff]  }
 0x441   :  { %v2002_v34 = vpack.c.bf16 %v1897_v33, %v1897_v33  ;;  %v7587_v52 = vld [vmem:[#allocation8 + $0x6cc] ss:$16 sps:$4 sm:$0xff]   ;;  %v7644_v33 = vld [vmem:[#allocation8 + $0x804] ss:$16 sps:$4 sm:$0xff]  }
 0x442   :  { %2539 = vmatprep.mubr.bf16.mxu1 %v2001_v56  ;;  %2621 = vmatprep.mubr.bf16.mxu0 %v2001_v56  ;;  %v7582_v56 = vld [vmem:[#allocation8 + $0x6c0] ss:$16 sps:$4 sm:$0xff]   ;;  %v7641_v28 = vld [vmem:[#allocation8 + $0x7ec] ss:$16 sps:$4 sm:$0xff]  }
 0x443   :  { %2540 = vmatmul.mubr.bf16.vlgmr.msra.gmra.mrb[12].mxu1 %v2000_v60  ;;  %2622 = vmatmul.mubr.bf16.vlgmr.msra.gmra.mrb[12].mxu0 %v2000_v60  ;;  %v7593_v60 = vld [vmem:[#allocation8 + $0x6ec] ss:$16 sps:$4 sm:$0xff]  }
 0x444   :  { %2549 = vmatpush1.bf16.msra.mxu1 %v7504_v57  ;;  %2631 = vmatpush1.bf16.msra.mxu0 %v7507_v59  ;;  %v7585_v57 = vld [vmem:[#allocation8 + $0x6c8] ss:$16 sps:$4 sm:$0xff]   ;;  %v7590_v59 = vld [vmem:[#allocation8 + $0x6e4] ss:$16 sps:$4 sm:$0xff]  }
 0x445   :  { %6745 = vmatprep.mubr.msk.bf16.mxu1 %vm737_vm3, %v2003_v62  ;;  %6746 = vmatprep.mubr.msk.bf16.mxu0 %vm737_vm3, %v2003_v62  ;;  %v7596_v62 = vld [vmem:[#allocation8 + $0x704] ss:$16 sps:$4 sm:$0xff]  }
 0x446   :  { %2550 = vmatprep.subr.bf16.mxu1 %v7512_v61  ;;  %2632 = vmatprep.subr.bf16.mxu0 %v7515_v46  ;;  %v7588_v61 = vld [vmem:[#allocation8 + $0x6e0] ss:$16 sps:$4 sm:$0xff]   ;;  %v7591_v46 = vld [vmem:[#allocation8 + $0x6e8] ss:$16 sps:$4 sm:$0xff]  }
 0x448   :  { %2551 = vmatpush1.bf16.msra.mxu1 %v7510_v1  ;;  %2633 = vmatpush1.bf16.msra.mxu0 %v7513_v2  ;;  %v7599_v1 = vld [vmem:[#allocation8 + $0x70c] ss:$16 sps:$4 sm:$0xff]   ;;  %v7594_v2 = vld [vmem:[#allocation8 + $0x700] ss:$16 sps:$4 sm:$0xff]  }
 0x449   :  { %2552 = vmatprep.subr.bf16.mxu1 %v7518_v4  ;;  %2634 = vmatprep.subr.bf16.mxu0 %v7521_v5  ;;  %v7597_v4 = vld [vmem:[#allocation8 + $0x708] ss:$16 sps:$4 sm:$0xff]   ;;  %v7602_v5 = vld [vmem:[#allocation8 + $0x724] ss:$16 sps:$4 sm:$0xff]  }
 0x44c   :  { %2553 = vmatpush1.bf16.msra.mxu1 %v7516_v6  ;;  %2635 = vmatpush1.bf16.msra.mxu0 %v7519_v8  ;;  %v7605_v6 = vld [vmem:[#allocation8 + $0x72c] ss:$16 sps:$4 sm:$0xff]   ;;  %v7600_v8 = vld [vmem:[#allocation8 + $0x720] ss:$16 sps:$4 sm:$0xff]  }
 0x44d   :  { %2554 = vmatprep.subr.bf16.mxu1 %v7524_v7  ;;  %2636 = vmatprep.subr.bf16.mxu0 %v7527_v11  ;;  %v7603_v7 = vld [vmem:[#allocation8 + $0x728] ss:$16 sps:$4 sm:$0xff]   ;;  %v7608_v11 = vld [vmem:[#allocation8 + $0x744] ss:$16 sps:$4 sm:$0xff]  }
 0x450   :  { %2555 = vmatpush1.bf16.msra.mxu1 %v7522_v12  ;;  %2637 = vmatpush1.bf16.msra.mxu0 %v7525_v63  ;;  %v7611_v12 = vld [vmem:[#allocation8 + $0x74c] ss:$16 sps:$4 sm:$0xff]   ;;  %v7606_v63 = vld [vmem:[#allocation8 + $0x740] ss:$16 sps:$4 sm:$0xff]  }
 0x451   :  { %2556 = vmatprep.subr.bf16.mxu1 %v7530_v15  ;;  %2638 = vmatprep.subr.bf16.mxu0 %v7533_v9  ;;  %v7609_v15 = vld [vmem:[#allocation8 + $0x748] ss:$16 sps:$4 sm:$0xff]   ;;  %v7614_v9 = vld [vmem:[#allocation8 + $0x764] ss:$16 sps:$4 sm:$0xff]  }
 0x454   :  { %2557 = vmatpush1.bf16.msra.mxu1 %v7528_v10  ;;  %2639 = vmatpush1.bf16.msra.mxu0 %v7531_v14  ;;  %v7617_v10 = vld [vmem:[#allocation8 + $0x76c] ss:$16 sps:$4 sm:$0xff]   ;;  %v7612_v14 = vld [vmem:[#allocation8 + $0x760] ss:$16 sps:$4 sm:$0xff]  }
 0x455   :  { %2558 = vmatprep.subr.bf16.mxu1 %v7536_v3  ;;  %2640 = vmatprep.subr.bf16.mxu0 %v7539_v16  ;;  %v7615_v3 = vld [vmem:[#allocation8 + $0x768] ss:$16 sps:$4 sm:$0xff]   ;;  %v7620_v16 = vld [vmem:[#allocation8 + $0x784] ss:$16 sps:$4 sm:$0xff]  }
 0x458   :  { %2559 = vmatpush1.bf16.msra.mxu1 %v7534_v17  ;;  %2641 = vmatpush1.bf16.msra.mxu0 %v7537_v18  ;;  %v7623_v17 = vld [vmem:[#allocation8 + $0x78c] ss:$16 sps:$4 sm:$0xff]   ;;  %v7618_v18 = vld [vmem:[#allocation8 + $0x780] ss:$16 sps:$4 sm:$0xff]  }
 0x459   :  { %2560 = vmatprep.subr.bf16.mxu1 %v7542_v19  ;;  %2642 = vmatprep.subr.bf16.mxu0 %v7545_v21  ;;  %v7621_v19 = vld [vmem:[#allocation8 + $0x788] ss:$16 sps:$4 sm:$0xff]   ;;  %v7626_v21 = vld [vmem:[#allocation8 + $0x7a4] ss:$16 sps:$4 sm:$0xff]  }
 0x45c   :  { %2561 = vmatpush1.bf16.msra.mxu1 %v7540_v22  ;;  %2643 = vmatpush1.bf16.msra.mxu0 %v7543_v24  ;;  %v7629_v22 = vld [vmem:[#allocation8 + $0x7ac] ss:$16 sps:$4 sm:$0xff]   ;;  %v7624_v24 = vld [vmem:[#allocation8 + $0x7a0] ss:$16 sps:$4 sm:$0xff]  }
 0x45d   :  { %2562 = vmatprep.subr.bf16.mxu1 %v7548_v25  ;;  %2644 = vmatprep.subr.bf16.mxu0 %v7551_v13  ;;  %v7627_v25 = vld [vmem:[#allocation8 + $0x7a8] ss:$16 sps:$4 sm:$0xff]   ;;  %v7632_v13 = vld [vmem:[#allocation8 + $0x7c4] ss:$16 sps:$4 sm:$0xff]  }
 0x460   :  { %2563 = vmatpush1.bf16.msra.mxu1 %v7546_v26  ;;  %2645 = vmatpush1.bf16.msra.mxu0 %v7549_v27  ;;  %v7635_v26 = vld [vmem:[#allocation8 + $0x7cc] ss:$16 sps:$4 sm:$0xff]   ;;  %v7630_v27 = vld [vmem:[#allocation8 + $0x7c0] ss:$16 sps:$4 sm:$0xff]  }
 0x461   :  { %2564 = vmatprep.subr.bf16.mxu1 %v7554_v29  ;;  %2646 = vmatprep.subr.bf16.mxu0 %v7557_v30  ;;  %v7633_v29 = vld [vmem:[#allocation8 + $0x7c8] ss:$16 sps:$4 sm:$0xff]   ;;  %v7638_v30 = vld [vmem:[#allocation8 + $0x7e4] ss:$16 sps:$4 sm:$0xff]  }
 0x464   :  { %2565 = vmatpush1.bf16.msra.mxu1 %v7552_v31  ;;  %2647 = vmatpush1.bf16.msra.mxu0 %v7555_v32  ;;  %v7636_v31 = vld [vmem:[#allocation8 + $0x7e0] ss:$16 sps:$4 sm:$0xff]   ;;  %v7639_v32 = vld [vmem:[#allocation8 + $0x7e8] ss:$16 sps:$4 sm:$0xff]  }
 0x465   :  { %3483 = vmatprep.subr.bf16.mxu1 %v7560_v35  ;;  %3565 = vmatprep.subr.bf16.mxu0 %v7563_v37  ;;  %v7642_v35 = vld [vmem:[#allocation8 + $0x800] ss:$16 sps:$4 sm:$0xff]   ;;  %v7645_v37 = vld [vmem:[#allocation8 + $0x808] ss:$16 sps:$4 sm:$0xff]  }
 0x467   :  { %2581 = vmatmul.mubr.bf16.vlgmr.msra.gmra.mrb[12].mxu1 %v2002_v34  ;;  %2663 = vmatmul.mubr.bf16.vlgmr.msra.gmra.mrb[12].mxu0 %v2002_v34  ;;  %v7647_v34 = vld [vmem:[#allocation8 + $0x80c] ss:$16 sps:$4 sm:$0xff]  }
 0x468   :  { %3484 = vmatpush1.bf16.msra.mxu1 %v7558_v36  ;;  %3566 = vmatpush1.bf16.msra.mxu0 %v7561_v40  ;;  %v7650_v36 = vld [vmem:[#allocation8 + $0x824] ss:$16 sps:$4 sm:$0xff]   ;;  %v7653_v40 = vld [vmem:[#allocation8 + $0x82c] ss:$16 sps:$4 sm:$0xff]  }
 0x469   :  { %3485 = vmatprep.subr.bf16.mxu1 %v7566_v38  ;;  %3567 = vmatprep.subr.bf16.mxu0 %v7569_v23  ;;  %v7648_v38 = vld [vmem:[#allocation8 + $0x820] ss:$16 sps:$4 sm:$0xff]   ;;  %v7651_v23 = vld [vmem:[#allocation8 + $0x828] ss:$16 sps:$4 sm:$0xff]  }
 0x46c   :  { %3486 = vmatpush1.bf16.msra.mxu1 %v7564_v58  ;;  %3568 = vmatpush1.bf16.msra.mxu0 %v7567_v53  ;;  %v7656_v58 = vld [vmem:[#allocation8 + $0x844] ss:$16 sps:$4 sm:$0xff]   ;;  %v7659_v53 = vld [vmem:[#allocation8 + $0x84c] ss:$16 sps:$4 sm:$0xff]  }
 0x46d   :  { %3487 = vmatprep.subr.bf16.mxu1 %v7572_v20  ;;  %3569 = vmatprep.subr.bf16.mxu0 %v7575_v39 }
 0x470   :  { %3488 = vmatpush1.bf16.msra.mxu1 %v7570_v41  ;;  %3570 = vmatpush1.bf16.msra.mxu0 %v7573_v42 }
 0x471   :  { %3489 = vmatprep.subr.bf16.mxu1 %v7578_v43  ;;  %3571 = vmatprep.subr.bf16.mxu0 %v7581_v44 }
 0x474   :  { %3490 = vmatpush1.bf16.msra.mxu1 %v7576_v49  ;;  %3572 = vmatpush1.bf16.msra.mxu0 %v7579_v50 }
 0x475   :  { %3491 = vmatprep.subr.bf16.mxu1 %v7584_v51  ;;  %3573 = vmatprep.subr.bf16.mxu0 %v7587_v52 }
 0x478   :  { %3492 = vmatpush1.bf16.msra.mxu1 %v7582_v56  ;;  %3574 = vmatpush1.bf16.msra.mxu0 %v7585_v57 }
 0x479   :  { %3493 = vmatprep.subr.bf16.mxu1 %v7590_v59  ;;  %3575 = vmatprep.subr.bf16.mxu0 %v7593_v60 }
 0x47c   :  { %3494 = vmatpush1.bf16.msra.mxu1 %v7588_v61  ;;  %3576 = vmatpush1.bf16.msra.mxu0 %v7591_v46 }
 0x47d   :  { %3495 = vmatprep.subr.bf16.mxu1 %v7596_v62  ;;  %3577 = vmatprep.subr.bf16.mxu0 %v7599_v1 }
 0x480   :  { %3496 = vmatpush1.bf16.msra.mxu1 %v7594_v2  ;;  %3578 = vmatpush1.bf16.msra.mxu0 %v7597_v4 }
 0x481   :  { %3497 = vmatprep.subr.bf16.mxu1 %v7602_v5  ;;  %3579 = vmatprep.subr.bf16.mxu0 %v7605_v6 }
 0x484   :  { %3498 = vmatpush1.bf16.msra.mxu1 %v7600_v8  ;;  %3580 = vmatpush1.bf16.msra.mxu0 %v7603_v7 }
 0x485   :  { %3499 = vmatprep.subr.bf16.mxu1 %v7608_v11  ;;  %3581 = vmatprep.subr.bf16.mxu0 %v7611_v12 }
 0x488   :  { %3500 = vmatpush1.bf16.msra.mxu1 %v7606_v63  ;;  %3582 = vmatpush1.bf16.msra.mxu0 %v7609_v15 }
 0x489   :  { %3501 = vmatprep.subr.bf16.mxu1 %v7614_v9  ;;  %3583 = vmatprep.subr.bf16.mxu0 %v7617_v10 }
 0x48c   :  { %3502 = vmatpush1.bf16.msra.mxu1 %v7612_v14  ;;  %3584 = vmatpush1.bf16.msra.mxu0 %v7615_v3 }
 0x48d   :  { %3503 = vmatprep.subr.bf16.mxu1 %v7620_v16  ;;  %3585 = vmatprep.subr.bf16.mxu0 %v7623_v17 }
 0x490   :  { %3504 = vmatpush1.bf16.msra.mxu1 %v7618_v18  ;;  %3586 = vmatpush1.bf16.msra.mxu0 %v7621_v19 }
 0x491   :  { %3505 = vmatprep.subr.bf16.mxu1 %v7626_v21  ;;  %3587 = vmatprep.subr.bf16.mxu0 %v7629_v22 }
 0x494   :  { %3506 = vmatpush1.bf16.msra.mxu1 %v7624_v24  ;;  %3588 = vmatpush1.bf16.msra.mxu0 %v7627_v25 }
 0x495   :  { %3507 = vmatprep.subr.bf16.mxu1 %v7632_v13  ;;  %3589 = vmatprep.subr.bf16.mxu0 %v7635_v26 }
 0x498   :  { %3508 = vmatpush1.bf16.msra.mxu1 %v7630_v27  ;;  %3590 = vmatpush1.bf16.msra.mxu0 %v7633_v29 }
 0x499   :  { %3509 = vmatprep.subr.bf16.mxu1 %v7638_v30  ;;  %3591 = vmatprep.subr.bf16.mxu0 %v7641_v28 }
 0x49c   :  { %3510 = vmatpush1.bf16.msra.mxu1 %v7636_v31  ;;  %3592 = vmatpush1.bf16.msra.mxu0 %v7639_v32 }
 0x49d   :  { %3511 = vmatprep.subr.bf16.mxu1 %v7644_v33  ;;  %3593 = vmatprep.subr.bf16.mxu0 %v7647_v34 }
 0x4a0   :  { %3512 = vmatpush1.bf16.msra.mxu1 %v7642_v35  ;;  %3594 = vmatpush1.bf16.msra.mxu0 %v7645_v37 }
 0x4a1   :  { %3513 = vmatprep.subr.bf16.mxu1 %v7650_v36  ;;  %3595 = vmatprep.subr.bf16.mxu0 %v7653_v40 }
 0x4a4   :  { %3514 = vmatpush1.bf16.msra.mxu1 %v7648_v38  ;;  %3596 = vmatpush1.bf16.msra.mxu0 %v7651_v23 }
 0x4a5   :  { %3524 = vmatprep.subr.bf16.mxu1 %v7656_v58  ;;  %3606 = vmatprep.subr.bf16.mxu0 %v7659_v53 }
 0x53a   :  { %v8692_v20 = vpop.f32.mrb[12].mxu1  ;;  %v8694_v39 = vpop.f32.mrb[12].mxu0 }
 0x53b   :  { %v2671_v41 = vrot.slane %v8692_v20, 4  ;;  %v2696_v42 = vmul.f32 %v8692_v20, %v8692_v20  ;;  %v2683_v43 = vrot.slane %v8694_v39, 4  ;;  %v2698_v44 = vmul.f32 %v8694_v39, %v8694_v39  ;;  %v8702_v49 = vpop.f32.mrb[13].mxu1  ;;  %v8704_v50 = vpop.f32.mrb[13].mxu0 }
 0x53c   :  { %v2677_v51 = vrot.slane %v8702_v49, 4  ;;  %v2697_v52 = vmul.f32 %v8702_v49, %v8702_v49  ;;  %v2689_v56 = vsel %vm737_vm3, %v8704_v50, 0.0  ;;  %v2699_v57 = vmul.f32 %v8704_v50, %v8704_v50  ;;  %v2586_v59 = vpop.f32.mrb[14].mxu1  ;;  %v2668_v60 = vpop.f32.mrb[14].mxu0 }
 0x53d   :  { %v2672_v61 = vadd.f32 %v2671_v41, %v8692_v20  ;;  %v2700_v46 = vrot.slane %v2696_v42, 4  ;;  %v2684_v62 = vadd.f32 %v2683_v43, %v8694_v39  ;;  %v2712_v1 = vrot.slane %v2698_v44, 4  ;;  %v2587_v2 = vpop.f32.mrb[15].mxu1  ;;  %v2669_v4 = vpop.f32.mrb[15].mxu0 }
 0x53e   :  { %v2678_v5 = vadd.f32 %v2677_v51, %v8702_v49  ;;  %v2706_v6 = vrot.slane %v2697_v52, 4  ;;  %v2690_v8 = vrot.slane %v2689_v56, 4  ;;  %v2718_v7 = vsel %vm737_vm3, %v2699_v57, 0.0 }
 0x53f   :  { %v2673_v11 = vrot.slane %v2672_v61, 2  ;;  %v2701_v12 = vadd.f32 %v2700_v46, %v2696_v42  ;;  %v2685_v63 = vrot.slane %v2684_v62, 2  ;;  %v2713_v15 = vadd.f32 %v2712_v1, %v2698_v44 }
 0x540   :  { %v2679_v9 = vrot.slane %v2678_v5, 2  ;;  %v2707_v10 = vadd.f32 %v2706_v6, %v2697_v52  ;;  %v2691_v14 = vadd.f32 %v2690_v8, %v2689_v56  ;;  %v2719_v3 = vrot.slane %v2718_v7, 4 }
 0x541   :  { %v2674_v16 = vadd.f32 %v2673_v11, %v2672_v61  ;;  %v2702_v17 = vrot.slane %v2701_v12, 2  ;;  %v2686_v18 = vadd.f32 %v2685_v63, %v2684_v62  ;;  %v2714_v19 = vrot.slane %v2713_v15, 2 }
 0x542   :  { %v2680_v21 = vadd.f32 %v2679_v9, %v2678_v5  ;;  %v2708_v22 = vrot.slane %v2707_v10, 2  ;;  %v2692_v24 = vrot.slane %v2691_v14, 2  ;;  %v2720_v25 = vadd.f32 %v2719_v3, %v2718_v7 }
 0x543   :  { %v2675_v13 = vrot.slane %v2674_v16, 1  ;;  %v2703_v26 = vadd.f32 %v2702_v17, %v2701_v12  ;;  %v2687_v27 = vrot.slane %v2686_v18, 1  ;;  %v2715_v29 = vadd.f32 %v2714_v19, %v2713_v15 }
 0x544   :  { %v2681_v30 = vrot.slane %v2680_v21, 1  ;;  %v2709_v28 = vadd.f32 %v2708_v22, %v2707_v10  ;;  %v2693_v31 = vadd.f32 %v2692_v24, %v2691_v14  ;;  %v2721_v32 = vrot.slane %v2720_v25, 2  ;;  %v2742_v22 = vld [vmem:[#allocation11 + $0x3] ss:$8 sm:$0xf] }
 0x545   :  { %v2676_v33 = vadd.f32 %v2675_v13, %v2674_v16  ;;  %v2704_v34 = vrot.slane %v2703_v26, 1  ;;  %v2688_v35 = vadd.f32 %v2687_v27, %v2686_v18  ;;  %v2716_v37 = vrot.slane %v2715_v29, 1 }
 0x546   :  { %v2682_v36 = vadd.f32 %v2681_v30, %v2680_v21  ;;  %v2710_v40 = vrot.slane %v2709_v28, 1  ;;  %v2694_v38 = vrot.slane %v2693_v31, 1  ;;  %v2722_v23 = vadd.f32 %v2721_v32, %v2720_v25 }
 0x547   :  { %v2705_v58 = vadd.f32 %v2704_v34, %v2703_v26  ;;  %v2725_v53 = vmul.f32 0.125, %v2676_v33  ;;  %v2717_v41 = vadd.f32 %v2716_v37, %v2715_v29  ;;  %v2727_v42 = vmul.f32 0.125, %v2688_v35 }
 0x548   :  { %v2711_v43 = vadd.f32 %v2710_v40, %v2709_v28  ;;  %v2726_v44 = vmul.f32 0.125, %v2682_v36  ;;  %v2695_v51 = vadd.f32 %v2694_v38, %v2693_v31  ;;  %v2723_v52 = vrot.slane %v2722_v23, 1 }
 0x549   :  { %v2729_v56 = vmul.f32 0.125, %v2705_v58  ;;  %v2733_v57 = vmul.f32 %v2725_v53, %v2725_v53  ;;  %v2731_v59 = vmul.f32 0.125, %v2717_v41  ;;  %v2735_v60 = vmul.f32 %v2727_v42, %v2727_v42  ;;  %v2744_v41 = vld [vmem:[#allocation13 + $0x3] ss:$8 sm:$0xf] }
 0x54a   :  { %v2730_v61 = vmul.f32 0.125, %v2711_v43  ;;  %v2734_v46 = vmul.f32 %v2726_v44, %v2726_v44  ;;  %v2724_v62 = vadd.f32 %v2723_v52, %v2722_v23  ;;  %v2728_v1 = vmul.f32 0.125, %v2695_v51 }
 0x54b   :  { %v2737_v2 = vsub.f32 %v2729_v56, %v2733_v57  ;;  %v2739_v4 = vsub.f32 %v2731_v59, %v2735_v60 }
 0x54c   :  { %v2738_v5 = vsub.f32 %v2730_v61, %v2734_v46  ;;  %v2732_v6 = vmul.f32 0.125, %v2724_v62  ;;  %v2736_v8 = vmul.f32 %v2728_v1, %v2728_v1 }
 0x54d   :  { %v2745_v7 = vadd.f32 1e-05, %v2737_v2  ;;  %v2747_v11 = vadd.f32 1e-05, %v2739_v4  ;;  %v7657_v2 = vld [vmem:[#allocation8 + $0x848] ss:$16 sps:$4 sm:$0xff]  }
 0x54e   :  { %v2746_v12 = vadd.f32 1e-05, %v2738_v5  ;;  %v2740_v63 = vsub.f32 %v2732_v6, %v2736_v8  ;;  %v7662_v5 = vld [vmem:[#allocation8 + $0x864] ss:$16 sps:$4 sm:$0xff]   ;;  %v7665_v6 = vld [vmem:[#allocation8 + $0x86c] ss:$16 sps:$4 sm:$0xff]  }
 0x54f   :  { %8116 = vrsqrt.f32 %v2745_v7  ;;  %v7660_v7 = vld [vmem:[#allocation8 + $0x860] ss:$16 sps:$4 sm:$0xff]  }
 0x550   :  { %8118 = vrsqrt.f32 %v2747_v11  ;;  %v2748_v15 = vadd.f32 1e-05, %v2740_v63  ;;  %v7663_v11 = vld [vmem:[#allocation8 + $0x868] ss:$16 sps:$4 sm:$0xff]   ;;  %v7671_v63 = vld [vmem:[#allocation8 + $0x88c] ss:$16 sps:$4 sm:$0xff]  }
 0x551   :  { %8120 = vrsqrt.f32 %v2746_v12  ;;  %v7668_v12 = vld [vmem:[#allocation8 + $0x884] ss:$16 sps:$4 sm:$0xff]  }
 0x552   :  { %8122 = vrsqrt.f32 %v2748_v15  ;;  %v7666_v15 = vld [vmem:[#allocation8 + $0x880] ss:$16 sps:$4 sm:$0xff]  }
 0x559   :  { %v8117_v9 = vpop.eup %8116 }
 0x55a   :  { %v8119_v10 = vpop.eup %8118 }
 0x55b   :  { %v8121_v14 = vpop.eup %8120 }
 0x55c   :  { %v8123_v3 = vpop.eup %8122  ;;  %v2757_v16 = vcombine.low %v8117_v9, %v8121_v14  ;;  %v7669_v9 = vld [vmem:[#allocation8 + $0x888] ss:$16 sps:$4 sm:$0xff]   ;;  %v7677_v14 = vld [vmem:[#allocation8 + $0x8ac] ss:$16 sps:$4 sm:$0xff]  }
 0x55d   :  { %v2758_v17 = vcombine.low %v8119_v10, %v8123_v3  ;;  %v7674_v10 = vld [vmem:[#allocation8 + $0x8a4] ss:$16 sps:$4 sm:$0xff]   ;;  %v7672_v3 = vld [vmem:[#allocation8 + $0x8a0] ss:$16 sps:$4 sm:$0xff]  }
 0x55e   :  { %v2765_v18 = vrot.slane %v2757_v16, %v8551_v48  ;;  %v7675_v16 = vld [vmem:[#allocation8 + $0x8a8] ss:$16 sps:$4 sm:$0xff]  }
 0x55f   :  { %v2772_v19 = vrot.slane %v2758_v17, %v8551_v48  ;;  %v7680_v17 = vld [vmem:[#allocation8 + $0x8c4] ss:$16 sps:$4 sm:$0xff]  }
 0x561   :  { %v2773_v21 = vcombine.low %v2765_v18, %v2772_v19  ;;  %v7683_v18 = vld [vmem:[#allocation8 + $0x8cc] ss:$16 sps:$4 sm:$0xff]   ;;  %v7678_v19 = vld [vmem:[#allocation8 + $0x8c0] ss:$16 sps:$4 sm:$0xff]  }
 0x563   :  { %v2780_v24 = vrot.slane %v2773_v21, %v8551_v48  ;;  %v7681_v21 = vld [vmem:[#allocation8 + $0x8c8] ss:$16 sps:$4 sm:$0xff]  }
 0x565   :  { %v2782_v25 = vmul.f32 %v2780_v24, %v2742_v22  ;;  %v7686_v22 = vld [vmem:[#allocation8 + $0x8e4] ss:$16 sps:$4 sm:$0xff]   ;;  %v7689_v24 = vld [vmem:[#allocation8 + $0x8ec] ss:$16 sps:$4 sm:$0xff]  }
 0x567   :  { %v2787_v13 = vrot.slane %v2782_v25, %v8556_v54  ;;  %v2791_v26 = vrot.slane %v2782_v25, %v8559_v55  ;;  %v2795_v27 = vrot.slane %v2782_v25, %v8599_v45  ;;  %v2799_v29 = vrot.slane %v2782_v25, %v8602_v47  ;;  %v7684_v25 = vld [vmem:[#allocation8 + $0x8e0] ss:$16 sps:$4 sm:$0xff]  }
 0x569   :  { %v2804_v30 = vmul.f32 %v2787_v13, %v2725_v53  ;;  %v2805_v28 = vmul.f32 %v2791_v26, %v2726_v44  ;;  %v2806_v31 = vmul.f32 %v2795_v27, %v2727_v42  ;;  %v2807_v32 = vmul.f32 %v2799_v29, %v2728_v1  ;;  %v7654_v1 = vld [vmem:[#allocation8 + $0x840] ss:$16 sps:$4 sm:$0xff]  }
 0x56a   :  { %v2841_v33 = vmul.f32 %v2799_v29, %v8704_v50  ;;  %v2839_v34 = vmul.f32 %v2791_v26, %v8702_v49  ;;  %v2838_v35 = vmul.f32 %v2787_v13, %v8692_v20  ;;  %v2840_v37 = vmul.f32 %v2795_v27, %v8694_v39  ;;  %v7687_v13 = vld [vmem:[#allocation8 + $0x8e8] ss:$16 sps:$4 sm:$0xff]   ;;  %v7692_v26 = vld [vmem:[#allocation8 + $0x904] ss:$16 sps:$4 sm:$0xff]   ;;  %v7695_v27 = vld [vmem:[#allocation8 + $0x90c] ss:$16 sps:$4 sm:$0xff]  }
 0x56b   :  { %v2812_v36 = vcombine.low %v2804_v30, %v2805_v28  ;;  %v2813_v40 = vcombine.low %v2806_v31, %v2807_v32  ;;  %v7690_v29 = vld [vmem:[#allocation8 + $0x900] ss:$16 sps:$4 sm:$0xff]   ;;  %v7693_v30 = vld [vmem:[#allocation8 + $0x908] ss:$16 sps:$4 sm:$0xff]   ;;  %v7698_v28 = vld [vmem:[#allocation8 + $0x924] ss:$16 sps:$4 sm:$0xff]  }
 0x56c   :  { %v7701_v31 = vld [vmem:[#allocation8 + $0x92c] ss:$16 sps:$4 sm:$0xff]   ;;  %v7696_v32 = vld [vmem:[#allocation8 + $0x920] ss:$16 sps:$4 sm:$0xff]  }
 0x56d   :  { %v2820_v38 = vrot.slane %v2812_v36, %v8551_v48  ;;  %v2827_v23 = vrot.slane %v2813_v40, %v8551_v48  ;;  %v7702_v36 = vld [vmem:[#allocation8 + $0x940] ss:$16 sps:$4 sm:$0xff]   ;;  %v7705_v40 = vld [vmem:[#allocation8 + $0x948] ss:$16 sps:$4 sm:$0xff]  }
 0x56f   :  { %v2828_v58 = vcombine.low %v2820_v38, %v2827_v23 }
 0x571   :  { %v2835_v53 = vrot.slane %v2828_v58, %v8551_v48  ;;  %v7710_v58 = vld [vmem:[#allocation8 + $0x964] ss:$16 sps:$4 sm:$0xff]  }
 0x573   :  { %v2837_v42 = vsub.f32 %v2744_v41, %v2835_v53  ;;  %v7713_v41 = vld [vmem:[#allocation8 + $0x96c] ss:$16 sps:$4 sm:$0xff]   ;;  %v7708_v53 = vld [vmem:[#allocation8 + $0x960] ss:$16 sps:$4 sm:$0xff]  }
 0x575   :  { %v2858_v43 = vrot.slane %v2837_v42, %v8602_v47  ;;  %v2850_v50 = vrot.slane %v2837_v42, %v8559_v55  ;;  %v2846_v49 = vrot.slane %v2837_v42, %v8556_v54  ;;  %v2854_v20 = vrot.slane %v2837_v42, %v8599_v45  ;;  %v7711_v42 = vld [vmem:[#allocation8 + $0x968] ss:$16 sps:$4 sm:$0xff]  }
 0x577   :  { %v2866_v39 = vadd.f32 %v2858_v43, %v2841_v33  ;;  %v2864_v44 = vadd.f32 %v2850_v50, %v2839_v34  ;;  %v2863_v51 = vadd.f32 %v2846_v49, %v2838_v35  ;;  %v8735_v52 = vadd.f32 %v2854_v20, %v2840_v37  ;;  %v7699_v33 = vld [vmem:[#allocation8 + $0x928] ss:$16 sps:$4 sm:$0xff]   ;;  %v7704_v34 = vld [vmem:[#allocation8 + $0x944] ss:$16 sps:$4 sm:$0xff]   ;;  %v7707_v35 = vld [vmem:[#allocation8 + $0x94c] ss:$16 sps:$4 sm:$0xff]  }
 0x578   :  { %v7716_v43 = vld [vmem:[#allocation8 + $0x984] ss:$16 sps:$4 sm:$0xff]   ;;  %v7719_v50 = vld [vmem:[#allocation8 + $0x98c] ss:$16 sps:$4 sm:$0xff]   ;;  %v7714_v49 = vld [vmem:[#allocation8 + $0x980] ss:$16 sps:$4 sm:$0xff]  }
 0x579   :  { %v2870_v56 = vmul.f32 0.01, %v2866_v39  ;;  %v2868_v57 = vmul.f32 0.01, %v2864_v44  ;;  %v2867_v59 = vmul.f32 0.01, %v2863_v51 }
 0x57a   :  { %v2869_v37 = vmul.f32 0.01, %v8735_v52  ;;  %v7717_v20 = vld [vmem:[#allocation8 + $0x988] ss:$16 sps:$4 sm:$0xff]  }
 0x57b   :  { %v2872_v60 = vmax.f32 %v2864_v44, %v2868_v57  ;;  %v2871_v61 = vmax.f32 %v2863_v51, %v2867_v59  ;;  %v2874_v46 = vmax.f32 %v2866_v39, %v2870_v56  ;;  %v7722_v39 = vld [vmem:[#allocation8 + $0x9a4] ss:$16 sps:$4 sm:$0xff]   ;;  %v7725_v44 = vld [vmem:[#allocation8 + $0x9ac] ss:$16 sps:$4 sm:$0xff]   ;;  %v7720_v51 = vld [vmem:[#allocation8 + $0x9a0] ss:$16 sps:$4 sm:$0xff]  }
 0x57c   :  { %v2873_v38 = vmax.f32 %v8735_v52, %v2869_v37  ;;  %v7723_v52 = vld [vmem:[#allocation8 + $0x9a8] ss:$16 sps:$4 sm:$0xff]   ;;  %v7728_v56 = vld [vmem:[#allocation8 + $0x9c4] ss:$16 sps:$4 sm:$0xff]   ;;  %v7731_v57 = vld [vmem:[#allocation8 + $0x9cc] ss:$16 sps:$4 sm:$0xff]  }
 0x57d   :  { %v2977_v62 = vpack.c.bf16 %v2872_v60, %v2872_v60  ;;  %v2976_v4 = vpack.c.bf16 %v2871_v61, %v2871_v61  ;;  %v2979_v8 = vpack.c.bf16 %v2874_v46, %v2874_v46  ;;  %v7726_v59 = vld [vmem:[#allocation8 + $0x9c0] ss:$16 sps:$4 sm:$0xff]   ;;  %v7729_v60 = vld [vmem:[#allocation8 + $0x9c8] ss:$16 sps:$4 sm:$0xff]   ;;  %v7734_v61 = vld [vmem:[#allocation8 + $0x9e4] ss:$16 sps:$4 sm:$0xff]  }
 0x57e   :  { %v2978_v23 = vpack.c.bf16 %v2873_v38, %v2873_v38  ;;  %v7737_v46 = vld [vmem:[#allocation8 + $0x9ec] ss:$16 sps:$4 sm:$0xff]   ;;  %v7794_v38 = vld [vmem:[#allocation8 + $0xb24] ss:$16 sps:$4 sm:$0xff]  }
 0x57f   :  { %3515 = vmatprep.mubr.bf16.mxu1 %v2977_v62  ;;  %3597 = vmatprep.mubr.bf16.mxu0 %v2977_v62  ;;  %v7732_v62 = vld [vmem:[#allocation8 + $0x9e0] ss:$16 sps:$4 sm:$0xff]   ;;  %v7791_v37 = vld [vmem:[#allocation8 + $0xb0c] ss:$16 sps:$4 sm:$0xff]  }
 0x580   :  { %3516 = vmatmul.mubr.bf16.vlgmr.msra.gmra.mrb[16].mxu1 %v2976_v4  ;;  %3598 = vmatmul.mubr.bf16.vlgmr.msra.gmra.mrb[16].mxu0 %v2976_v4  ;;  %v7743_v4 = vld [vmem:[#allocation8 + $0xa0c] ss:$16 sps:$4 sm:$0xff]  }
 0x581   :  { %3525 = vmatpush1.bf16.msra.mxu1 %v7654_v1  ;;  %3607 = vmatpush1.bf16.msra.mxu0 %v7657_v2  ;;  %v7735_v1 = vld [vmem:[#allocation8 + $0x9e8] ss:$16 sps:$4 sm:$0xff]   ;;  %v7740_v2 = vld [vmem:[#allocation8 + $0xa04] ss:$16 sps:$4 sm:$0xff]  }
 0x582   :  { %6847 = vmatprep.mubr.msk.bf16.mxu1 %vm737_vm3, %v2979_v8  ;;  %6848 = vmatprep.mubr.msk.bf16.mxu0 %vm737_vm3, %v2979_v8  ;;  %v7746_v8 = vld [vmem:[#allocation8 + $0xa24] ss:$16 sps:$4 sm:$0xff]  }
 0x583   :  { %3526 = vmatprep.subr.bf16.mxu1 %v7662_v5  ;;  %3608 = vmatprep.subr.bf16.mxu0 %v7665_v6  ;;  %v7738_v5 = vld [vmem:[#allocation8 + $0xa00] ss:$16 sps:$4 sm:$0xff]   ;;  %v7741_v6 = vld [vmem:[#allocation8 + $0xa08] ss:$16 sps:$4 sm:$0xff]  }
 0x585   :  { %3527 = vmatpush1.bf16.msra.mxu1 %v7660_v7  ;;  %3609 = vmatpush1.bf16.msra.mxu0 %v7663_v11  ;;  %v7749_v7 = vld [vmem:[#allocation8 + $0xa2c] ss:$16 sps:$4 sm:$0xff]   ;;  %v7744_v11 = vld [vmem:[#allocation8 + $0xa20] ss:$16 sps:$4 sm:$0xff]  }
 0x586   :  { %3528 = vmatprep.subr.bf16.mxu1 %v7668_v12  ;;  %3610 = vmatprep.subr.bf16.mxu0 %v7671_v63  ;;  %v7747_v12 = vld [vmem:[#allocation8 + $0xa28] ss:$16 sps:$4 sm:$0xff]   ;;  %v7752_v63 = vld [vmem:[#allocation8 + $0xa44] ss:$16 sps:$4 sm:$0xff]  }
 0x589   :  { %3529 = vmatpush1.bf16.msra.mxu1 %v7666_v15  ;;  %3611 = vmatpush1.bf16.msra.mxu0 %v7669_v9  ;;  %v7755_v15 = vld [vmem:[#allocation8 + $0xa4c] ss:$16 sps:$4 sm:$0xff]   ;;  %v7750_v9 = vld [vmem:[#allocation8 + $0xa40] ss:$16 sps:$4 sm:$0xff]  }
 0x58a   :  { %3530 = vmatprep.subr.bf16.mxu1 %v7674_v10  ;;  %3612 = vmatprep.subr.bf16.mxu0 %v7677_v14  ;;  %v7753_v10 = vld [vmem:[#allocation8 + $0xa48] ss:$16 sps:$4 sm:$0xff]   ;;  %v7758_v14 = vld [vmem:[#allocation8 + $0xa64] ss:$16 sps:$4 sm:$0xff]  }
 0x58d   :  { %3531 = vmatpush1.bf16.msra.mxu1 %v7672_v3  ;;  %3613 = vmatpush1.bf16.msra.mxu0 %v7675_v16  ;;  %v7761_v3 = vld [vmem:[#allocation8 + $0xa6c] ss:$16 sps:$4 sm:$0xff]   ;;  %v7756_v16 = vld [vmem:[#allocation8 + $0xa60] ss:$16 sps:$4 sm:$0xff]  }
 0x58e   :  { %3532 = vmatprep.subr.bf16.mxu1 %v7680_v17  ;;  %3614 = vmatprep.subr.bf16.mxu0 %v7683_v18  ;;  %v7759_v17 = vld [vmem:[#allocation8 + $0xa68] ss:$16 sps:$4 sm:$0xff]   ;;  %v7764_v18 = vld [vmem:[#allocation8 + $0xa84] ss:$16 sps:$4 sm:$0xff]  }
 0x591   :  { %3533 = vmatpush1.bf16.msra.mxu1 %v7678_v19  ;;  %3615 = vmatpush1.bf16.msra.mxu0 %v7681_v21  ;;  %v7767_v19 = vld [vmem:[#allocation8 + $0xa8c] ss:$16 sps:$4 sm:$0xff]   ;;  %v7762_v21 = vld [vmem:[#allocation8 + $0xa80] ss:$16 sps:$4 sm:$0xff]  }
 0x592   :  { %3534 = vmatprep.subr.bf16.mxu1 %v7686_v22  ;;  %3616 = vmatprep.subr.bf16.mxu0 %v7689_v24  ;;  %v7765_v22 = vld [vmem:[#allocation8 + $0xa88] ss:$16 sps:$4 sm:$0xff]   ;;  %v7770_v24 = vld [vmem:[#allocation8 + $0xaa4] ss:$16 sps:$4 sm:$0xff]  }
 0x595   :  { %3535 = vmatpush1.bf16.msra.mxu1 %v7684_v25  ;;  %3617 = vmatpush1.bf16.msra.mxu0 %v7687_v13  ;;  %v7773_v25 = vld [vmem:[#allocation8 + $0xaac] ss:$16 sps:$4 sm:$0xff]   ;;  %v7768_v13 = vld [vmem:[#allocation8 + $0xaa0] ss:$16 sps:$4 sm:$0xff]  }
 0x596   :  { %3536 = vmatprep.subr.bf16.mxu1 %v7692_v26  ;;  %3618 = vmatprep.subr.bf16.mxu0 %v7695_v27  ;;  %v7771_v26 = vld [vmem:[#allocation8 + $0xaa8] ss:$16 sps:$4 sm:$0xff]   ;;  %v7776_v27 = vld [vmem:[#allocation8 + $0xac4] ss:$16 sps:$4 sm:$0xff]  }
 0x599   :  { %3537 = vmatpush1.bf16.msra.mxu1 %v7690_v29  ;;  %3619 = vmatpush1.bf16.msra.mxu0 %v7693_v30  ;;  %v7779_v29 = vld [vmem:[#allocation8 + $0xacc] ss:$16 sps:$4 sm:$0xff]   ;;  %v7774_v30 = vld [vmem:[#allocation8 + $0xac0] ss:$16 sps:$4 sm:$0xff]  }
 0x59a   :  { %3538 = vmatprep.subr.bf16.mxu1 %v7698_v28  ;;  %3620 = vmatprep.subr.bf16.mxu0 %v7701_v31  ;;  %v7777_v28 = vld [vmem:[#allocation8 + $0xac8] ss:$16 sps:$4 sm:$0xff]   ;;  %v7782_v31 = vld [vmem:[#allocation8 + $0xae4] ss:$16 sps:$4 sm:$0xff]  }
 0x59d   :  { %3539 = vmatpush1.bf16.msra.mxu1 %v7696_v32  ;;  %3621 = vmatpush1.bf16.msra.mxu0 %v7699_v33  ;;  %v7785_v32 = vld [vmem:[#allocation8 + $0xaec] ss:$16 sps:$4 sm:$0xff]   ;;  %v7780_v33 = vld [vmem:[#allocation8 + $0xae0] ss:$16 sps:$4 sm:$0xff]  }
 0x59e   :  { %3540 = vmatprep.subr.bf16.mxu1 %v7704_v34  ;;  %3622 = vmatprep.subr.bf16.mxu0 %v7707_v35  ;;  %v7783_v34 = vld [vmem:[#allocation8 + $0xae8] ss:$16 sps:$4 sm:$0xff]   ;;  %v7788_v35 = vld [vmem:[#allocation8 + $0xb04] ss:$16 sps:$4 sm:$0xff]  }
 0x5a1   :  { %3541 = vmatpush1.bf16.msra.mxu1 %v7702_v36  ;;  %3623 = vmatpush1.bf16.msra.mxu0 %v7705_v40  ;;  %v7786_v36 = vld [vmem:[#allocation8 + $0xb00] ss:$16 sps:$4 sm:$0xff]   ;;  %v7789_v40 = vld [vmem:[#allocation8 + $0xb08] ss:$16 sps:$4 sm:$0xff]  }
 0x5a2   :  { %4459 = vmatprep.subr.bf16.mxu1 %v7710_v58  ;;  %4541 = vmatprep.subr.bf16.mxu0 %v7713_v41  ;;  %v7792_v58 = vld [vmem:[#allocation8 + $0xb20] ss:$16 sps:$4 sm:$0xff]   ;;  %v7795_v41 = vld [vmem:[#allocation8 + $0xb28] ss:$16 sps:$4 sm:$0xff]  }
 0x5a4   :  { %3557 = vmatmul.mubr.bf16.vlgmr.msra.gmra.mrb[16].mxu1 %v2978_v23  ;;  %3639 = vmatmul.mubr.bf16.vlgmr.msra.gmra.mrb[16].mxu0 %v2978_v23  ;;  %v7797_v23 = vld [vmem:[#allocation8 + $0xb2c] ss:$16 sps:$4 sm:$0xff]  }
 0x5a5   :  { %4460 = vmatpush1.bf16.msra.mxu1 %v7708_v53  ;;  %4542 = vmatpush1.bf16.msra.mxu0 %v7711_v42  ;;  %v7800_v53 = vld [vmem:[#allocation8 + $0xb44] ss:$16 sps:$4 sm:$0xff]   ;;  %v7803_v42 = vld [vmem:[#allocation8 + $0xb4c] ss:$16 sps:$4 sm:$0xff]  }
 0x5a6   :  { %4461 = vmatprep.subr.bf16.mxu1 %v7716_v43  ;;  %4543 = vmatprep.subr.bf16.mxu0 %v7719_v50  ;;  %v7798_v43 = vld [vmem:[#allocation8 + $0xb40] ss:$16 sps:$4 sm:$0xff]   ;;  %v7801_v50 = vld [vmem:[#allocation8 + $0xb48] ss:$16 sps:$4 sm:$0xff]  }
 0x5a9   :  { %4462 = vmatpush1.bf16.msra.mxu1 %v7714_v49  ;;  %4544 = vmatpush1.bf16.msra.mxu0 %v7717_v20  ;;  %v7806_v49 = vld [vmem:[#allocation8 + $0xb64] ss:$16 sps:$4 sm:$0xff]   ;;  %v7809_v20 = vld [vmem:[#allocation8 + $0xb6c] ss:$16 sps:$4 sm:$0xff]  }
 0x5aa   :  { %4463 = vmatprep.subr.bf16.mxu1 %v7722_v39  ;;  %4545 = vmatprep.subr.bf16.mxu0 %v7725_v44 }
 0x5ad   :  { %4464 = vmatpush1.bf16.msra.mxu1 %v7720_v51  ;;  %4546 = vmatpush1.bf16.msra.mxu0 %v7723_v52 }
 0x5ae   :  { %4465 = vmatprep.subr.bf16.mxu1 %v7728_v56  ;;  %4547 = vmatprep.subr.bf16.mxu0 %v7731_v57 }
 0x5b1   :  { %4466 = vmatpush1.bf16.msra.mxu1 %v7726_v59  ;;  %4548 = vmatpush1.bf16.msra.mxu0 %v7729_v60 }
 0x5b2   :  { %4467 = vmatprep.subr.bf16.mxu1 %v7734_v61  ;;  %4549 = vmatprep.subr.bf16.mxu0 %v7737_v46 }
 0x5b5   :  { %4468 = vmatpush1.bf16.msra.mxu1 %v7732_v62  ;;  %4550 = vmatpush1.bf16.msra.mxu0 %v7735_v1 }
 0x5b6   :  { %4469 = vmatprep.subr.bf16.mxu1 %v7740_v2  ;;  %4551 = vmatprep.subr.bf16.mxu0 %v7743_v4 }
 0x5b9   :  { %4470 = vmatpush1.bf16.msra.mxu1 %v7738_v5  ;;  %4552 = vmatpush1.bf16.msra.mxu0 %v7741_v6 }
 0x5ba   :  { %4471 = vmatprep.subr.bf16.mxu1 %v7746_v8  ;;  %4553 = vmatprep.subr.bf16.mxu0 %v7749_v7 }
 0x5bd   :  { %4472 = vmatpush1.bf16.msra.mxu1 %v7744_v11  ;;  %4554 = vmatpush1.bf16.msra.mxu0 %v7747_v12 }
 0x5be   :  { %4473 = vmatprep.subr.bf16.mxu1 %v7752_v63  ;;  %4555 = vmatprep.subr.bf16.mxu0 %v7755_v15 }
 0x5c1   :  { %4474 = vmatpush1.bf16.msra.mxu1 %v7750_v9  ;;  %4556 = vmatpush1.bf16.msra.mxu0 %v7753_v10 }
 0x5c2   :  { %4475 = vmatprep.subr.bf16.mxu1 %v7758_v14  ;;  %4557 = vmatprep.subr.bf16.mxu0 %v7761_v3 }
 0x5c5   :  { %4476 = vmatpush1.bf16.msra.mxu1 %v7756_v16  ;;  %4558 = vmatpush1.bf16.msra.mxu0 %v7759_v17 }
 0x5c6   :  { %4477 = vmatprep.subr.bf16.mxu1 %v7764_v18  ;;  %4559 = vmatprep.subr.bf16.mxu0 %v7767_v19 }
 0x5c9   :  { %4478 = vmatpush1.bf16.msra.mxu1 %v7762_v21  ;;  %4560 = vmatpush1.bf16.msra.mxu0 %v7765_v22 }
 0x5ca   :  { %4479 = vmatprep.subr.bf16.mxu1 %v7770_v24  ;;  %4561 = vmatprep.subr.bf16.mxu0 %v7773_v25 }
 0x5cd   :  { %4480 = vmatpush1.bf16.msra.mxu1 %v7768_v13  ;;  %4562 = vmatpush1.bf16.msra.mxu0 %v7771_v26 }
 0x5ce   :  { %4481 = vmatprep.subr.bf16.mxu1 %v7776_v27  ;;  %4563 = vmatprep.subr.bf16.mxu0 %v7779_v29 }
 0x5d1   :  { %4482 = vmatpush1.bf16.msra.mxu1 %v7774_v30  ;;  %4564 = vmatpush1.bf16.msra.mxu0 %v7777_v28 }
 0x5d2   :  { %4483 = vmatprep.subr.bf16.mxu1 %v7782_v31  ;;  %4565 = vmatprep.subr.bf16.mxu0 %v7785_v32 }
 0x5d5   :  { %4484 = vmatpush1.bf16.msra.mxu1 %v7780_v33  ;;  %4566 = vmatpush1.bf16.msra.mxu0 %v7783_v34 }
 0x5d6   :  { %4485 = vmatprep.subr.bf16.mxu1 %v7788_v35  ;;  %4567 = vmatprep.subr.bf16.mxu0 %v7791_v37 }
 0x5d9   :  { %4486 = vmatpush1.bf16.msra.mxu1 %v7786_v36  ;;  %4568 = vmatpush1.bf16.msra.mxu0 %v7789_v40 }
 0x5da   :  { %4487 = vmatprep.subr.bf16.mxu1 %v7794_v38  ;;  %4569 = vmatprep.subr.bf16.mxu0 %v7797_v23 }
 0x5dd   :  { %4488 = vmatpush1.bf16.msra.mxu1 %v7792_v58  ;;  %4570 = vmatpush1.bf16.msra.mxu0 %v7795_v41 }
 0x5de   :  { %4489 = vmatprep.subr.bf16.mxu1 %v7800_v53  ;;  %4571 = vmatprep.subr.bf16.mxu0 %v7803_v42 }
 0x5e1   :  { %4490 = vmatpush1.bf16.msra.mxu1 %v7798_v43  ;;  %4572 = vmatpush1.bf16.msra.mxu0 %v7801_v50 }
 0x5e2   :  { %4500 = vmatprep.subr.bf16.mxu1 %v7806_v49  ;;  %4582 = vmatprep.subr.bf16.mxu0 %v7809_v20 }
 0x677   :  { %v8741_v39 = vpop.f32.mrb[16].mxu1  ;;  %v8743_v44 = vpop.f32.mrb[16].mxu0 }
 0x678   :  { %v3647_v51 = vrot.slane %v8741_v39, 4  ;;  %v3672_v52 = vmul.f32 %v8741_v39, %v8741_v39  ;;  %v3659_v56 = vrot.slane %v8743_v44, 4  ;;  %v3674_v57 = vmul.f32 %v8743_v44, %v8743_v44  ;;  %v8751_v59 = vpop.f32.mrb[17].mxu1  ;;  %v8753_v60 = vpop.f32.mrb[17].mxu0 }
 0x679   :  { %v3653_v61 = vrot.slane %v8751_v59, 4  ;;  %v3673_v46 = vmul.f32 %v8751_v59, %v8751_v59  ;;  %v3665_v62 = vsel %vm737_vm3, %v8753_v60, 0.0  ;;  %v3675_v1 = vmul.f32 %v8753_v60, %v8753_v60  ;;  %v3562_v2 = vpop.f32.mrb[18].mxu1  ;;  %v3644_v4 = vpop.f32.mrb[18].mxu0 }
 0x67a   :  { %v3648_v5 = vadd.f32 %v3647_v51, %v8741_v39  ;;  %v3676_v6 = vrot.slane %v3672_v52, 4  ;;  %v3660_v8 = vadd.f32 %v3659_v56, %v8743_v44  ;;  %v3688_v7 = vrot.slane %v3674_v57, 4  ;;  %v3563_v11 = vpop.f32.mrb[19].mxu1  ;;  %v3645_v12 = vpop.f32.mrb[19].mxu0 }
 0x67b   :  { %v3654_v63 = vadd.f32 %v3653_v61, %v8751_v59  ;;  %v3682_v15 = vrot.slane %v3673_v46, 4  ;;  %v3666_v9 = vrot.slane %v3665_v62, 4  ;;  %v3694_v10 = vsel %vm737_vm3, %v3675_v1, 0.0 }
 0x67c   :  { %v3649_v14 = vrot.slane %v3648_v5, 2  ;;  %v3677_v3 = vadd.f32 %v3676_v6, %v3672_v52  ;;  %v3661_v16 = vrot.slane %v3660_v8, 2  ;;  %v3689_v17 = vadd.f32 %v3688_v7, %v3674_v57 }
 0x67d   :  { %v3655_v18 = vrot.slane %v3654_v63, 2  ;;  %v3683_v19 = vadd.f32 %v3682_v15, %v3673_v46  ;;  %v3667_v21 = vadd.f32 %v3666_v9, %v3665_v62  ;;  %v3695_v22 = vrot.slane %v3694_v10, 4 }
 0x67e   :  { %v3650_v24 = vadd.f32 %v3649_v14, %v3648_v5  ;;  %v3678_v25 = vrot.slane %v3677_v3, 2  ;;  %v3662_v13 = vadd.f32 %v3661_v16, %v3660_v8  ;;  %v3690_v26 = vrot.slane %v3689_v17, 2 }
 0x67f   :  { %v3656_v27 = vadd.f32 %v3655_v18, %v3654_v63  ;;  %v3684_v29 = vrot.slane %v3683_v19, 2  ;;  %v3668_v30 = vrot.slane %v3667_v21, 2  ;;  %v3696_v28 = vadd.f32 %v3695_v22, %v3694_v10 }
 0x680   :  { %v3651_v31 = vrot.slane %v3650_v24, 1  ;;  %v3679_v32 = vadd.f32 %v3678_v25, %v3677_v3  ;;  %v3663_v33 = vrot.slane %v3662_v13, 1  ;;  %v3691_v34 = vadd.f32 %v3690_v26, %v3689_v17 }
 0x681   :  { %v3657_v35 = vrot.slane %v3656_v27, 1  ;;  %v3685_v37 = vadd.f32 %v3684_v29, %v3683_v19  ;;  %v3669_v36 = vadd.f32 %v3668_v30, %v3667_v21  ;;  %v3697_v40 = vrot.slane %v3696_v28, 2  ;;  %v3718_v29 = vld [vmem:[#allocation11 + $0x4] ss:$8 sm:$0xf] }
 0x682   :  { %v3652_v38 = vadd.f32 %v3651_v31, %v3650_v24  ;;  %v3680_v23 = vrot.slane %v3679_v32, 1  ;;  %v3664_v58 = vadd.f32 %v3663_v33, %v3662_v13  ;;  %v3692_v41 = vrot.slane %v3691_v34, 1 }
 0x683   :  { %v3658_v53 = vadd.f32 %v3657_v35, %v3656_v27  ;;  %v3686_v42 = vrot.slane %v3685_v37, 1  ;;  %v3670_v43 = vrot.slane %v3669_v36, 1  ;;  %v3698_v50 = vadd.f32 %v3697_v40, %v3696_v28 }
 0x684   :  { %v3681_v49 = vadd.f32 %v3680_v23, %v3679_v32  ;;  %v3701_v20 = vmul.f32 0.125, %v3652_v38  ;;  %v3693_v51 = vadd.f32 %v3692_v41, %v3691_v34  ;;  %v3703_v52 = vmul.f32 0.125, %v3664_v58 }
 0x685   :  { %v3687_v56 = vadd.f32 %v3686_v42, %v3685_v37  ;;  %v3702_v57 = vmul.f32 0.125, %v3658_v53  ;;  %v3671_v61 = vadd.f32 %v3670_v43, %v3669_v36  ;;  %v3699_v46 = vrot.slane %v3698_v50, 1 }
 0x686   :  { %v3705_v62 = vmul.f32 0.125, %v3681_v49  ;;  %v3709_v1 = vmul.f32 %v3701_v20, %v3701_v20  ;;  %v3707_v2 = vmul.f32 0.125, %v3693_v51  ;;  %v3711_v4 = vmul.f32 %v3703_v52, %v3703_v52  ;;  %v3720_v51 = vld [vmem:[#allocation13 + $0x4] ss:$8 sm:$0xf] }
 0x687   :  { %v3706_v5 = vmul.f32 0.125, %v3687_v56  ;;  %v3710_v6 = vmul.f32 %v3702_v57, %v3702_v57  ;;  %v3700_v8 = vadd.f32 %v3699_v46, %v3698_v50  ;;  %v3704_v7 = vmul.f32 0.125, %v3671_v61 }
 0x688   :  { %v3713_v11 = vsub.f32 %v3705_v62, %v3709_v1  ;;  %v3715_v12 = vsub.f32 %v3707_v2, %v3711_v4 }
 0x689   :  { %v3714_v63 = vsub.f32 %v3706_v5, %v3710_v6  ;;  %v3708_v15 = vmul.f32 0.125, %v3700_v8  ;;  %v3712_v9 = vmul.f32 %v3704_v7, %v3704_v7 }
 0x68a   :  { %v3721_v10 = vadd.f32 1e-05, %v3713_v11  ;;  %v3723_v14 = vadd.f32 1e-05, %v3715_v12  ;;  %v7807_v11 = vld [vmem:[#allocation8 + $0xb68] ss:$16 sps:$4 sm:$0xff]  }
 0x68b   :  { %v3722_v3 = vadd.f32 1e-05, %v3714_v63  ;;  %v3716_v16 = vsub.f32 %v3708_v15, %v3712_v9  ;;  %v7812_v63 = vld [vmem:[#allocation8 + $0xb84] ss:$16 sps:$4 sm:$0xff]   ;;  %v7815_v15 = vld [vmem:[#allocation8 + $0xb8c] ss:$16 sps:$4 sm:$0xff]  }
 0x68c   :  { %8124 = vrsqrt.f32 %v3721_v10  ;;  %v7810_v10 = vld [vmem:[#allocation8 + $0xb80] ss:$16 sps:$4 sm:$0xff]  }
 0x68d   :  { %8126 = vrsqrt.f32 %v3723_v14  ;;  %v3724_v17 = vadd.f32 1e-05, %v3716_v16  ;;  %v7813_v14 = vld [vmem:[#allocation8 + $0xb88] ss:$16 sps:$4 sm:$0xff]   ;;  %v7821_v16 = vld [vmem:[#allocation8 + $0xbac] ss:$16 sps:$4 sm:$0xff]  }
 0x68e   :  { %8128 = vrsqrt.f32 %v3722_v3  ;;  %v7818_v3 = vld [vmem:[#allocation8 + $0xba4] ss:$16 sps:$4 sm:$0xff]  }
 0x68f   :  { %8130 = vrsqrt.f32 %v3724_v17  ;;  %v7816_v17 = vld [vmem:[#allocation8 + $0xba0] ss:$16 sps:$4 sm:$0xff]  }
 0x696   :  { %v8125_v18 = vpop.eup %8124 }
 0x697   :  { %v8127_v19 = vpop.eup %8126 }
 0x698   :  { %v8129_v21 = vpop.eup %8128 }
 0x699   :  { %v8131_v22 = vpop.eup %8130  ;;  %v3733_v24 = vcombine.low %v8125_v18, %v8129_v21  ;;  %v7819_v18 = vld [vmem:[#allocation8 + $0xba8] ss:$16 sps:$4 sm:$0xff]   ;;  %v7827_v21 = vld [vmem:[#allocation8 + $0xbcc] ss:$16 sps:$4 sm:$0xff]  }
 0x69a   :  { %v3734_v25 = vcombine.low %v8127_v19, %v8131_v22  ;;  %v7824_v19 = vld [vmem:[#allocation8 + $0xbc4] ss:$16 sps:$4 sm:$0xff]   ;;  %v7822_v22 = vld [vmem:[#allocation8 + $0xbc0] ss:$16 sps:$4 sm:$0xff]  }
 0x69b   :  { %v3741_v13 = vrot.slane %v3733_v24, %v8551_v48  ;;  %v7825_v24 = vld [vmem:[#allocation8 + $0xbc8] ss:$16 sps:$4 sm:$0xff]  }
 0x69c   :  { %v3748_v26 = vrot.slane %v3734_v25, %v8551_v48  ;;  %v7830_v25 = vld [vmem:[#allocation8 + $0xbe4] ss:$16 sps:$4 sm:$0xff]  }
 0x69e   :  { %v3749_v27 = vcombine.low %v3741_v13, %v3748_v26  ;;  %v7833_v13 = vld [vmem:[#allocation8 + $0xbec] ss:$16 sps:$4 sm:$0xff]   ;;  %v7828_v26 = vld [vmem:[#allocation8 + $0xbe0] ss:$16 sps:$4 sm:$0xff]  }
 0x6a0   :  { %v3756_v30 = vrot.slane %v3749_v27, %v8551_v48  ;;  %v7831_v27 = vld [vmem:[#allocation8 + $0xbe8] ss:$16 sps:$4 sm:$0xff]  }
 0x6a2   :  { %v3758_v28 = vmul.f32 %v3756_v30, %v3718_v29  ;;  %v7836_v29 = vld [vmem:[#allocation8 + $0xc04] ss:$16 sps:$4 sm:$0xff]   ;;  %v7839_v30 = vld [vmem:[#allocation8 + $0xc0c] ss:$16 sps:$4 sm:$0xff]  }
 0x6a4   :  { %v3763_v31 = vrot.slane %v3758_v28, %v8556_v54  ;;  %v3767_v32 = vrot.slane %v3758_v28, %v8559_v55  ;;  %v3771_v33 = vrot.slane %v3758_v28, %v8599_v45  ;;  %v3775_v34 = vrot.slane %v3758_v28, %v8602_v47  ;;  %v7834_v28 = vld [vmem:[#allocation8 + $0xc00] ss:$16 sps:$4 sm:$0xff]  }
 0x6a6   :  { %v3780_v35 = vmul.f32 %v3763_v31, %v3701_v20  ;;  %v3781_v37 = vmul.f32 %v3767_v32, %v3702_v57  ;;  %v3782_v36 = vmul.f32 %v3771_v33, %v3703_v52  ;;  %v3783_v40 = vmul.f32 %v3775_v34, %v3704_v7  ;;  %v7804_v7 = vld [vmem:[#allocation8 + $0xb60] ss:$16 sps:$4 sm:$0xff]  }
 0x6a7   :  { %v3817_v38 = vmul.f32 %v3775_v34, %v8753_v60  ;;  %v3815_v23 = vmul.f32 %v3767_v32, %v8751_v59  ;;  %v3814_v58 = vmul.f32 %v3763_v31, %v8741_v39  ;;  %v3816_v41 = vmul.f32 %v3771_v33, %v8743_v44  ;;  %v7837_v31 = vld [vmem:[#allocation8 + $0xc08] ss:$16 sps:$4 sm:$0xff]   ;;  %v7842_v32 = vld [vmem:[#allocation8 + $0xc24] ss:$16 sps:$4 sm:$0xff]   ;;  %v7845_v33 = vld [vmem:[#allocation8 + $0xc2c] ss:$16 sps:$4 sm:$0xff]  }
 0x6a8   :  { %v3788_v53 = vcombine.low %v3780_v35, %v3781_v37  ;;  %v3789_v42 = vcombine.low %v3782_v36, %v3783_v40  ;;  %v7840_v34 = vld [vmem:[#allocation8 + $0xc20] ss:$16 sps:$4 sm:$0xff]   ;;  %v7843_v35 = vld [vmem:[#allocation8 + $0xc28] ss:$16 sps:$4 sm:$0xff]   ;;  %v7848_v37 = vld [vmem:[#allocation8 + $0xc44] ss:$16 sps:$4 sm:$0xff]  }
 0x6a9   :  { %v7851_v36 = vld [vmem:[#allocation8 + $0xc4c] ss:$16 sps:$4 sm:$0xff]   ;;  %v7846_v40 = vld [vmem:[#allocation8 + $0xc40] ss:$16 sps:$4 sm:$0xff]  }
 0x6aa   :  { %v3796_v43 = vrot.slane %v3788_v53, %v8551_v48  ;;  %v3803_v50 = vrot.slane %v3789_v42, %v8551_v48  ;;  %v7852_v53 = vld [vmem:[#allocation8 + $0xc60] ss:$16 sps:$4 sm:$0xff]   ;;  %v7855_v42 = vld [vmem:[#allocation8 + $0xc68] ss:$16 sps:$4 sm:$0xff]  }
 0x6ac   :  { %v3804_v49 = vcombine.low %v3796_v43, %v3803_v50 }
 0x6ae   :  { %v3811_v20 = vrot.slane %v3804_v49, %v8551_v48  ;;  %v7860_v49 = vld [vmem:[#allocation8 + $0xc84] ss:$16 sps:$4 sm:$0xff]  }
 0x6b0   :  { %v3813_v52 = vsub.f32 %v3720_v51, %v3811_v20  ;;  %v7863_v51 = vld [vmem:[#allocation8 + $0xc8c] ss:$16 sps:$4 sm:$0xff]   ;;  %v7858_v20 = vld [vmem:[#allocation8 + $0xc80] ss:$16 sps:$4 sm:$0xff]  }
 0x6b2   :  { %v3834_v56 = vrot.slane %v3813_v52, %v8602_v47  ;;  %v3826_v60 = vrot.slane %v3813_v52, %v8559_v55  ;;  %v3822_v59 = vrot.slane %v3813_v52, %v8556_v54  ;;  %v3830_v39 = vrot.slane %v3813_v52, %v8599_v45  ;;  %v7861_v52 = vld [vmem:[#allocation8 + $0xc88] ss:$16 sps:$4 sm:$0xff]  }
 0x6b4   :  { %v3842_v44 = vadd.f32 %v3834_v56, %v3817_v38  ;;  %v3840_v57 = vadd.f32 %v3826_v60, %v3815_v23  ;;  %v3839_v61 = vadd.f32 %v3822_v59, %v3814_v58  ;;  %v8784_v46 = vadd.f32 %v3830_v39, %v3816_v41  ;;  %v7849_v38 = vld [vmem:[#allocation8 + $0xc48] ss:$16 sps:$4 sm:$0xff]   ;;  %v7854_v23 = vld [vmem:[#allocation8 + $0xc64] ss:$16 sps:$4 sm:$0xff]   ;;  %v7857_v58 = vld [vmem:[#allocation8 + $0xc6c] ss:$16 sps:$4 sm:$0xff]  }
 0x6b5   :  { %v7866_v56 = vld [vmem:[#allocation8 + $0xca4] ss:$16 sps:$4 sm:$0xff]   ;;  %v7869_v60 = vld [vmem:[#allocation8 + $0xcac] ss:$16 sps:$4 sm:$0xff]   ;;  %v7864_v59 = vld [vmem:[#allocation8 + $0xca0] ss:$16 sps:$4 sm:$0xff]  }
 0x6b6   :  { %v3846_v62 = vmul.f32 0.01, %v3842_v44  ;;  %v3844_v1 = vmul.f32 0.01, %v3840_v57  ;;  %v3843_v2 = vmul.f32 0.01, %v3839_v61 }
 0x6b7   :  { %v3845_v41 = vmul.f32 0.01, %v8784_v46  ;;  %v7867_v39 = vld [vmem:[#allocation8 + $0xca8] ss:$16 sps:$4 sm:$0xff]  }
 0x6b8   :  { %v3848_v4 = vmax.f32 %v3840_v57, %v3844_v1  ;;  %v3847_v5 = vmax.f32 %v3839_v61, %v3843_v2  ;;  %v3850_v6 = vmax.f32 %v3842_v44, %v3846_v62  ;;  %v7872_v44 = vld [vmem:[#allocation8 + $0xcc4] ss:$16 sps:$4 sm:$0xff]   ;;  %v7875_v57 = vld [vmem:[#allocation8 + $0xccc] ss:$16 sps:$4 sm:$0xff]   ;;  %v7870_v61 = vld [vmem:[#allocation8 + $0xcc0] ss:$16 sps:$4 sm:$0xff]  }
 0x6b9   :  { %v3849_v43 = vmax.f32 %v8784_v46, %v3845_v41  ;;  %v7873_v46 = vld [vmem:[#allocation8 + $0xcc8] ss:$16 sps:$4 sm:$0xff]   ;;  %v7878_v62 = vld [vmem:[#allocation8 + $0xce4] ss:$16 sps:$4 sm:$0xff]   ;;  %v7881_v1 = vld [vmem:[#allocation8 + $0xcec] ss:$16 sps:$4 sm:$0xff]  }
 0x6ba   :  { %v3953_v8 = vpack.c.bf16 %v3848_v4, %v3848_v4  ;;  %v3952_v12 = vpack.c.bf16 %v3847_v5, %v3847_v5  ;;  %v3955_v9 = vpack.c.bf16 %v3850_v6, %v3850_v6  ;;  %v7876_v2 = vld [vmem:[#allocation8 + $0xce0] ss:$16 sps:$4 sm:$0xff]   ;;  %v7879_v4 = vld [vmem:[#allocation8 + $0xce8] ss:$16 sps:$4 sm:$0xff]   ;;  %v7884_v5 = vld [vmem:[#allocation8 + $0xd04] ss:$16 sps:$4 sm:$0xff]  }
 0x6bb   :  { %v3954_v50 = vpack.c.bf16 %v3849_v43, %v3849_v43  ;;  %v7887_v6 = vld [vmem:[#allocation8 + $0xd0c] ss:$16 sps:$4 sm:$0xff]   ;;  %v7944_v43 = vld [vmem:[#allocation8 + $0xe44] ss:$16 sps:$4 sm:$0xff]  }
 0x6bc   :  { %4491 = vmatprep.mubr.bf16.mxu1 %v3953_v8  ;;  %4573 = vmatprep.mubr.bf16.mxu0 %v3953_v8  ;;  %v7882_v8 = vld [vmem:[#allocation8 + $0xd00] ss:$16 sps:$4 sm:$0xff]   ;;  %v7941_v41 = vld [vmem:[#allocation8 + $0xe2c] ss:$16 sps:$4 sm:$0xff]  }
 0x6bd   :  { %4492 = vmatmul.mubr.bf16.vlgmr.msra.gmra.mrb[20].mxu1 %v3952_v12  ;;  %4574 = vmatmul.mubr.bf16.vlgmr.msra.gmra.mrb[20].mxu0 %v3952_v12  ;;  %v7893_v12 = vld [vmem:[#allocation8 + $0xd2c] ss:$16 sps:$4 sm:$0xff]  }
 0x6be   :  { %4501 = vmatpush1.bf16.msra.mxu1 %v7804_v7  ;;  %4583 = vmatpush1.bf16.msra.mxu0 %v7807_v11  ;;  %v7885_v7 = vld [vmem:[#allocation8 + $0xd08] ss:$16 sps:$4 sm:$0xff]   ;;  %v7890_v11 = vld [vmem:[#allocation8 + $0xd24] ss:$16 sps:$4 sm:$0xff]  }
 0x6bf   :  { %6949 = vmatprep.mubr.msk.bf16.mxu1 %vm737_vm3, %v3955_v9  ;;  %6950 = vmatprep.mubr.msk.bf16.mxu0 %vm737_vm3, %v3955_v9  ;;  %v7896_v9 = vld [vmem:[#allocation8 + $0xd44] ss:$16 sps:$4 sm:$0xff]  }
 0x6c0   :  { %4502 = vmatprep.subr.bf16.mxu1 %v7812_v63  ;;  %4584 = vmatprep.subr.bf16.mxu0 %v7815_v15  ;;  %v7888_v63 = vld [vmem:[#allocation8 + $0xd20] ss:$16 sps:$4 sm:$0xff]   ;;  %v7891_v15 = vld [vmem:[#allocation8 + $0xd28] ss:$16 sps:$4 sm:$0xff]  }
 0x6c2   :  { %4503 = vmatpush1.bf16.msra.mxu1 %v7810_v10  ;;  %4585 = vmatpush1.bf16.msra.mxu0 %v7813_v14  ;;  %v7899_v10 = vld [vmem:[#allocation8 + $0xd4c] ss:$16 sps:$4 sm:$0xff]   ;;  %v7894_v14 = vld [vmem:[#allocation8 + $0xd40] ss:$16 sps:$4 sm:$0xff]  }
 0x6c3   :  { %4504 = vmatprep.subr.bf16.mxu1 %v7818_v3  ;;  %4586 = vmatprep.subr.bf16.mxu0 %v7821_v16  ;;  %v7897_v3 = vld [vmem:[#allocation8 + $0xd48] ss:$16 sps:$4 sm:$0xff]   ;;  %v7902_v16 = vld [vmem:[#allocation8 + $0xd64] ss:$16 sps:$4 sm:$0xff]  }
 0x6c6   :  { %4505 = vmatpush1.bf16.msra.mxu1 %v7816_v17  ;;  %4587 = vmatpush1.bf16.msra.mxu0 %v7819_v18  ;;  %v7905_v17 = vld [vmem:[#allocation8 + $0xd6c] ss:$16 sps:$4 sm:$0xff]   ;;  %v7900_v18 = vld [vmem:[#allocation8 + $0xd60] ss:$16 sps:$4 sm:$0xff]  }
 0x6c7   :  { %4506 = vmatprep.subr.bf16.mxu1 %v7824_v19  ;;  %4588 = vmatprep.subr.bf16.mxu0 %v7827_v21  ;;  %v7903_v19 = vld [vmem:[#allocation8 + $0xd68] ss:$16 sps:$4 sm:$0xff]   ;;  %v7908_v21 = vld [vmem:[#allocation8 + $0xd84] ss:$16 sps:$4 sm:$0xff]  }
 0x6ca   :  { %4507 = vmatpush1.bf16.msra.mxu1 %v7822_v22  ;;  %4589 = vmatpush1.bf16.msra.mxu0 %v7825_v24  ;;  %v7911_v22 = vld [vmem:[#allocation8 + $0xd8c] ss:$16 sps:$4 sm:$0xff]   ;;  %v7906_v24 = vld [vmem:[#allocation8 + $0xd80] ss:$16 sps:$4 sm:$0xff]  }
 0x6cb   :  { %4508 = vmatprep.subr.bf16.mxu1 %v7830_v25  ;;  %4590 = vmatprep.subr.bf16.mxu0 %v7833_v13  ;;  %v7909_v25 = vld [vmem:[#allocation8 + $0xd88] ss:$16 sps:$4 sm:$0xff]   ;;  %v7914_v13 = vld [vmem:[#allocation8 + $0xda4] ss:$16 sps:$4 sm:$0xff]  }
 0x6ce   :  { %4509 = vmatpush1.bf16.msra.mxu1 %v7828_v26  ;;  %4591 = vmatpush1.bf16.msra.mxu0 %v7831_v27  ;;  %v7917_v26 = vld [vmem:[#allocation8 + $0xdac] ss:$16 sps:$4 sm:$0xff]   ;;  %v7912_v27 = vld [vmem:[#allocation8 + $0xda0] ss:$16 sps:$4 sm:$0xff]  }
 0x6cf   :  { %4510 = vmatprep.subr.bf16.mxu1 %v7836_v29  ;;  %4592 = vmatprep.subr.bf16.mxu0 %v7839_v30  ;;  %v7915_v29 = vld [vmem:[#allocation8 + $0xda8] ss:$16 sps:$4 sm:$0xff]   ;;  %v7920_v30 = vld [vmem:[#allocation8 + $0xdc4] ss:$16 sps:$4 sm:$0xff]  }
 0x6d2   :  { %4511 = vmatpush1.bf16.msra.mxu1 %v7834_v28  ;;  %4593 = vmatpush1.bf16.msra.mxu0 %v7837_v31  ;;  %v7923_v28 = vld [vmem:[#allocation8 + $0xdcc] ss:$16 sps:$4 sm:$0xff]   ;;  %v7918_v31 = vld [vmem:[#allocation8 + $0xdc0] ss:$16 sps:$4 sm:$0xff]  }
 0x6d3   :  { %4512 = vmatprep.subr.bf16.mxu1 %v7842_v32  ;;  %4594 = vmatprep.subr.bf16.mxu0 %v7845_v33  ;;  %v7921_v32 = vld [vmem:[#allocation8 + $0xdc8] ss:$16 sps:$4 sm:$0xff]   ;;  %v7926_v33 = vld [vmem:[#allocation8 + $0xde4] ss:$16 sps:$4 sm:$0xff]  }
 0x6d6   :  { %4513 = vmatpush1.bf16.msra.mxu1 %v7840_v34  ;;  %4595 = vmatpush1.bf16.msra.mxu0 %v7843_v35  ;;  %v7929_v34 = vld [vmem:[#allocation8 + $0xdec] ss:$16 sps:$4 sm:$0xff]   ;;  %v7924_v35 = vld [vmem:[#allocation8 + $0xde0] ss:$16 sps:$4 sm:$0xff]  }
 0x6d7   :  { %4514 = vmatprep.subr.bf16.mxu1 %v7848_v37  ;;  %4596 = vmatprep.subr.bf16.mxu0 %v7851_v36  ;;  %v7927_v37 = vld [vmem:[#allocation8 + $0xde8] ss:$16 sps:$4 sm:$0xff]   ;;  %v7932_v36 = vld [vmem:[#allocation8 + $0xe04] ss:$16 sps:$4 sm:$0xff]  }
 0x6da   :  { %4515 = vmatpush1.bf16.msra.mxu1 %v7846_v40  ;;  %4597 = vmatpush1.bf16.msra.mxu0 %v7849_v38  ;;  %v7935_v40 = vld [vmem:[#allocation8 + $0xe0c] ss:$16 sps:$4 sm:$0xff]   ;;  %v7930_v38 = vld [vmem:[#allocation8 + $0xe00] ss:$16 sps:$4 sm:$0xff]  }
 0x6db   :  { %4516 = vmatprep.subr.bf16.mxu1 %v7854_v23  ;;  %4598 = vmatprep.subr.bf16.mxu0 %v7857_v58  ;;  %v7933_v23 = vld [vmem:[#allocation8 + $0xe08] ss:$16 sps:$4 sm:$0xff]   ;;  %v7938_v58 = vld [vmem:[#allocation8 + $0xe24] ss:$16 sps:$4 sm:$0xff]  }
 0x6de   :  { %4517 = vmatpush1.bf16.msra.mxu1 %v7852_v53  ;;  %4599 = vmatpush1.bf16.msra.mxu0 %v7855_v42  ;;  %v7936_v53 = vld [vmem:[#allocation8 + $0xe20] ss:$16 sps:$4 sm:$0xff]   ;;  %v7939_v42 = vld [vmem:[#allocation8 + $0xe28] ss:$16 sps:$4 sm:$0xff]  }
 0x6df   :  { %5435 = vmatprep.subr.bf16.mxu1 %v7860_v49  ;;  %5517 = vmatprep.subr.bf16.mxu0 %v7863_v51  ;;  %v7942_v49 = vld [vmem:[#allocation8 + $0xe40] ss:$16 sps:$4 sm:$0xff]   ;;  %v7945_v51 = vld [vmem:[#allocation8 + $0xe48] ss:$16 sps:$4 sm:$0xff]  }
 0x6e1   :  { %4533 = vmatmul.mubr.bf16.vlgmr.msra.gmra.mrb[20].mxu1 %v3954_v50  ;;  %4615 = vmatmul.mubr.bf16.vlgmr.msra.gmra.mrb[20].mxu0 %v3954_v50  ;;  %v7947_v50 = vld [vmem:[#allocation8 + $0xe4c] ss:$16 sps:$4 sm:$0xff]  }
 0x6e2   :  { %5436 = vmatpush1.bf16.msra.mxu1 %v7858_v20  ;;  %5518 = vmatpush1.bf16.msra.mxu0 %v7861_v52  ;;  %v7950_v20 = vld [vmem:[#allocation8 + $0xe64] ss:$16 sps:$4 sm:$0xff]   ;;  %v7953_v52 = vld [vmem:[#allocation8 + $0xe6c] ss:$16 sps:$4 sm:$0xff]  }
 0x6e3   :  { %5437 = vmatprep.subr.bf16.mxu1 %v7866_v56  ;;  %5519 = vmatprep.subr.bf16.mxu0 %v7869_v60  ;;  %v7948_v56 = vld [vmem:[#allocation8 + $0xe60] ss:$16 sps:$4 sm:$0xff]   ;;  %v7951_v60 = vld [vmem:[#allocation8 + $0xe68] ss:$16 sps:$4 sm:$0xff]  }
 0x6e6   :  { %5438 = vmatpush1.bf16.msra.mxu1 %v7864_v59  ;;  %5520 = vmatpush1.bf16.msra.mxu0 %v7867_v39  ;;  %v7956_v59 = vld [vmem:[#allocation8 + $0xe84] ss:$16 sps:$4 sm:$0xff]   ;;  %v7959_v39 = vld [vmem:[#allocation8 + $0xe8c] ss:$16 sps:$4 sm:$0xff]  }
 0x6e7   :  { %5439 = vmatprep.subr.bf16.mxu1 %v7872_v44  ;;  %5521 = vmatprep.subr.bf16.mxu0 %v7875_v57 }
 0x6ea   :  { %5440 = vmatpush1.bf16.msra.mxu1 %v7870_v61  ;;  %5522 = vmatpush1.bf16.msra.mxu0 %v7873_v46 }
 0x6eb   :  { %5441 = vmatprep.subr.bf16.mxu1 %v7878_v62  ;;  %5523 = vmatprep.subr.bf16.mxu0 %v7881_v1 }
 0x6ee   :  { %5442 = vmatpush1.bf16.msra.mxu1 %v7876_v2  ;;  %5524 = vmatpush1.bf16.msra.mxu0 %v7879_v4 }
 0x6ef   :  { %5443 = vmatprep.subr.bf16.mxu1 %v7884_v5  ;;  %5525 = vmatprep.subr.bf16.mxu0 %v7887_v6 }
 0x6f2   :  { %5444 = vmatpush1.bf16.msra.mxu1 %v7882_v8  ;;  %5526 = vmatpush1.bf16.msra.mxu0 %v7885_v7 }
 0x6f3   :  { %5445 = vmatprep.subr.bf16.mxu1 %v7890_v11  ;;  %5527 = vmatprep.subr.bf16.mxu0 %v7893_v12 }
 0x6f6   :  { %5446 = vmatpush1.bf16.msra.mxu1 %v7888_v63  ;;  %5528 = vmatpush1.bf16.msra.mxu0 %v7891_v15 }
 0x6f7   :  { %5447 = vmatprep.subr.bf16.mxu1 %v7896_v9  ;;  %5529 = vmatprep.subr.bf16.mxu0 %v7899_v10 }
 0x6fa   :  { %5448 = vmatpush1.bf16.msra.mxu1 %v7894_v14  ;;  %5530 = vmatpush1.bf16.msra.mxu0 %v7897_v3 }
 0x6fb   :  { %5449 = vmatprep.subr.bf16.mxu1 %v7902_v16  ;;  %5531 = vmatprep.subr.bf16.mxu0 %v7905_v17 }
 0x6fe   :  { %5450 = vmatpush1.bf16.msra.mxu1 %v7900_v18  ;;  %5532 = vmatpush1.bf16.msra.mxu0 %v7903_v19 }
 0x6ff   :  { %5451 = vmatprep.subr.bf16.mxu1 %v7908_v21  ;;  %5533 = vmatprep.subr.bf16.mxu0 %v7911_v22 }
 0x702   :  { %5452 = vmatpush1.bf16.msra.mxu1 %v7906_v24  ;;  %5534 = vmatpush1.bf16.msra.mxu0 %v7909_v25 }
 0x703   :  { %5453 = vmatprep.subr.bf16.mxu1 %v7914_v13  ;;  %5535 = vmatprep.subr.bf16.mxu0 %v7917_v26 }
 0x706   :  { %5454 = vmatpush1.bf16.msra.mxu1 %v7912_v27  ;;  %5536 = vmatpush1.bf16.msra.mxu0 %v7915_v29 }
 0x707   :  { %5455 = vmatprep.subr.bf16.mxu1 %v7920_v30  ;;  %5537 = vmatprep.subr.bf16.mxu0 %v7923_v28 }
 0x70a   :  { %5456 = vmatpush1.bf16.msra.mxu1 %v7918_v31  ;;  %5538 = vmatpush1.bf16.msra.mxu0 %v7921_v32 }
 0x70b   :  { %5457 = vmatprep.subr.bf16.mxu1 %v7926_v33  ;;  %5539 = vmatprep.subr.bf16.mxu0 %v7929_v34 }
 0x70e   :  { %5458 = vmatpush1.bf16.msra.mxu1 %v7924_v35  ;;  %5540 = vmatpush1.bf16.msra.mxu0 %v7927_v37 }
 0x70f   :  { %5459 = vmatprep.subr.bf16.mxu1 %v7932_v36  ;;  %5541 = vmatprep.subr.bf16.mxu0 %v7935_v40 }
 0x712   :  { %5460 = vmatpush1.bf16.msra.mxu1 %v7930_v38  ;;  %5542 = vmatpush1.bf16.msra.mxu0 %v7933_v23 }
 0x713   :  { %5461 = vmatprep.subr.bf16.mxu1 %v7938_v58  ;;  %5543 = vmatprep.subr.bf16.mxu0 %v7941_v41 }
 0x716   :  { %5462 = vmatpush1.bf16.msra.mxu1 %v7936_v53  ;;  %5544 = vmatpush1.bf16.msra.mxu0 %v7939_v42 }
 0x717   :  { %5463 = vmatprep.subr.bf16.mxu1 %v7944_v43  ;;  %5545 = vmatprep.subr.bf16.mxu0 %v7947_v50 }
 0x71a   :  { %5464 = vmatpush1.bf16.msra.mxu1 %v7942_v49  ;;  %5546 = vmatpush1.bf16.msra.mxu0 %v7945_v51 }
 0x71b   :  { %5465 = vmatprep.subr.bf16.mxu1 %v7950_v20  ;;  %5547 = vmatprep.subr.bf16.mxu0 %v7953_v52 }
 0x71e   :  { %5466 = vmatpush1.bf16.msra.mxu1 %v7948_v56  ;;  %5548 = vmatpush1.bf16.msra.mxu0 %v7951_v60 }
 0x71f   :  { %5476 = vmatprep.subr.bf16.mxu1 %v7956_v59  ;;  %5558 = vmatprep.subr.bf16.mxu0 %v7959_v39 }
 0x7b4   :  { %v8790_v44 = vpop.f32.mrb[20].mxu1  ;;  %v8792_v57 = vpop.f32.mrb[20].mxu0 }
 0x7b5   :  { %v4623_v61 = vrot.slane %v8790_v44, 4  ;;  %v4648_v46 = vmul.f32 %v8790_v44, %v8790_v44  ;;  %v4635_v62 = vrot.slane %v8792_v57, 4  ;;  %v4650_v1 = vmul.f32 %v8792_v57, %v8792_v57  ;;  %v8800_v2 = vpop.f32.mrb[21].mxu1  ;;  %v8802_v4 = vpop.f32.mrb[21].mxu0 }
 0x7b6   :  { %v4629_v5 = vrot.slane %v8800_v2, 4  ;;  %v4649_v6 = vmul.f32 %v8800_v2, %v8800_v2  ;;  %v4641_v8 = vsel %vm737_vm3, %v8802_v4, 0.0  ;;  %v4651_v7 = vmul.f32 %v8802_v4, %v8802_v4  ;;  %v4538_v11 = vpop.f32.mrb[22].mxu1  ;;  %v4620_v12 = vpop.f32.mrb[22].mxu0 }
 0x7b7   :  { %v4624_v63 = vadd.f32 %v4623_v61, %v8790_v44  ;;  %v4652_v15 = vrot.slane %v4648_v46, 4  ;;  %v4636_v9 = vadd.f32 %v4635_v62, %v8792_v57  ;;  %v4664_v10 = vrot.slane %v4650_v1, 4  ;;  %v4539_v14 = vpop.f32.mrb[23].mxu1  ;;  %v4621_v3 = vpop.f32.mrb[23].mxu0 }
 0x7b8   :  { %v4630_v16 = vadd.f32 %v4629_v5, %v8800_v2  ;;  %v4658_v17 = vrot.slane %v4649_v6, 4  ;;  %v4642_v18 = vrot.slane %v4641_v8, 4  ;;  %v4670_v19 = vsel %vm737_vm3, %v4651_v7, 0.0 }
 0x7b9   :  { %v4625_v21 = vrot.slane %v4624_v63, 2  ;;  %v4653_v22 = vadd.f32 %v4652_v15, %v4648_v46  ;;  %v4637_v24 = vrot.slane %v4636_v9, 2  ;;  %v4665_v25 = vadd.f32 %v4664_v10, %v4650_v1 }
 0x7ba   :  { %v4631_v13 = vrot.slane %v4630_v16, 2  ;;  %v4659_v26 = vadd.f32 %v4658_v17, %v4649_v6  ;;  %v4643_v27 = vadd.f32 %v4642_v18, %v4641_v8  ;;  %v4671_v29 = vrot.slane %v4670_v19, 4 }
 0x7bb   :  { %v4626_v30 = vadd.f32 %v4625_v21, %v4624_v63  ;;  %v4654_v28 = vrot.slane %v4653_v22, 2  ;;  %v4638_v31 = vadd.f32 %v4637_v24, %v4636_v9  ;;  %v4666_v32 = vrot.slane %v4665_v25, 2 }
 0x7bc   :  { %v4632_v33 = vadd.f32 %v4631_v13, %v4630_v16  ;;  %v4660_v34 = vrot.slane %v4659_v26, 2  ;;  %v4644_v35 = vrot.slane %v4643_v27, 2  ;;  %v4672_v37 = vadd.f32 %v4671_v29, %v4670_v19 }
 0x7bd   :  { %v4627_v36 = vrot.slane %v4626_v30, 1  ;;  %v4655_v40 = vadd.f32 %v4654_v28, %v4653_v22  ;;  %v4639_v38 = vrot.slane %v4638_v31, 1  ;;  %v4667_v23 = vadd.f32 %v4666_v32, %v4665_v25 }
 0x7be   :  { %v4633_v58 = vrot.slane %v4632_v33, 1  ;;  %v4661_v41 = vadd.f32 %v4660_v34, %v4659_v26  ;;  %v4645_v53 = vadd.f32 %v4644_v35, %v4643_v27  ;;  %v4673_v42 = vrot.slane %v4672_v37, 2  ;;  %v4694_v34 = vld [vmem:[#allocation11 + $0x5] ss:$8 sm:$0xf] }
 0x7bf   :  { %v4628_v43 = vadd.f32 %v4627_v36, %v4626_v30  ;;  %v4656_v50 = vrot.slane %v4655_v40, 1  ;;  %v4640_v49 = vadd.f32 %v4639_v38, %v4638_v31  ;;  %v4668_v51 = vrot.slane %v4667_v23, 1 }
 0x7c0   :  { %v4634_v20 = vadd.f32 %v4633_v58, %v4632_v33  ;;  %v4662_v52 = vrot.slane %v4661_v41, 1  ;;  %v4646_v56 = vrot.slane %v4645_v53, 1  ;;  %v4674_v60 = vadd.f32 %v4673_v42, %v4672_v37 }
 0x7c1   :  { %v4657_v59 = vadd.f32 %v4656_v50, %v4655_v40  ;;  %v4677_v39 = vmul.f32 0.125, %v4628_v43  ;;  %v4669_v61 = vadd.f32 %v4668_v51, %v4667_v23  ;;  %v4679_v46 = vmul.f32 0.125, %v4640_v49 }
 0x7c2   :  { %v4663_v62 = vadd.f32 %v4662_v52, %v4661_v41  ;;  %v4678_v1 = vmul.f32 0.125, %v4634_v20  ;;  %v4647_v5 = vadd.f32 %v4646_v56, %v4645_v53  ;;  %v4675_v6 = vrot.slane %v4674_v60, 1 }
 0x7c3   :  { %v4681_v8 = vmul.f32 0.125, %v4657_v59  ;;  %v4685_v7 = vmul.f32 %v4677_v39, %v4677_v39  ;;  %v4683_v11 = vmul.f32 0.125, %v4669_v61  ;;  %v4687_v12 = vmul.f32 %v4679_v46, %v4679_v46  ;;  %v4696_v61 = vld [vmem:[#allocation13 + $0x5] ss:$8 sm:$0xf] }
 0x7c4   :  { %v4682_v63 = vmul.f32 0.125, %v4663_v62  ;;  %v4686_v15 = vmul.f32 %v4678_v1, %v4678_v1  ;;  %v4676_v9 = vadd.f32 %v4675_v6, %v4674_v60  ;;  %v4680_v10 = vmul.f32 0.125, %v4647_v5 }
 0x7c5   :  { %v4689_v14 = vsub.f32 %v4681_v8, %v4685_v7  ;;  %v4691_v3 = vsub.f32 %v4683_v11, %v4687_v12 }
 0x7c6   :  { %v4690_v16 = vsub.f32 %v4682_v63, %v4686_v15  ;;  %v4684_v17 = vmul.f32 0.125, %v4676_v9  ;;  %v4688_v18 = vmul.f32 %v4680_v10, %v4680_v10 }
 0x7c7   :  { %v4697_v19 = vadd.f32 1e-05, %v4689_v14  ;;  %v4699_v21 = vadd.f32 1e-05, %v4691_v3  ;;  %v7957_v14 = vld [vmem:[#allocation8 + $0xe88] ss:$16 sps:$4 sm:$0xff]  }
 0x7c8   :  { %v4698_v22 = vadd.f32 1e-05, %v4690_v16  ;;  %v4692_v24 = vsub.f32 %v4684_v17, %v4688_v18  ;;  %v7962_v16 = vld [vmem:[#allocation8 + $0xea4] ss:$16 sps:$4 sm:$0xff]   ;;  %v7965_v17 = vld [vmem:[#allocation8 + $0xeac] ss:$16 sps:$4 sm:$0xff]  }
 0x7c9   :  { %8132 = vrsqrt.f32 %v4697_v19  ;;  %v7960_v19 = vld [vmem:[#allocation8 + $0xea0] ss:$16 sps:$4 sm:$0xff]  }
 0x7ca   :  { %8134 = vrsqrt.f32 %v4699_v21  ;;  %v4700_v25 = vadd.f32 1e-05, %v4692_v24  ;;  %v7963_v21 = vld [vmem:[#allocation8 + $0xea8] ss:$16 sps:$4 sm:$0xff]   ;;  %v7971_v24 = vld [vmem:[#allocation8 + $0xecc] ss:$16 sps:$4 sm:$0xff]  }
 0x7cb   :  { %8136 = vrsqrt.f32 %v4698_v22  ;;  %v7968_v22 = vld [vmem:[#allocation8 + $0xec4] ss:$16 sps:$4 sm:$0xff]  }
 0x7cc   :  { %8138 = vrsqrt.f32 %v4700_v25  ;;  %v7966_v25 = vld [vmem:[#allocation8 + $0xec0] ss:$16 sps:$4 sm:$0xff]  }
 0x7d3   :  { %v8133_v13 = vpop.eup %8132 }
 0x7d4   :  { %v8135_v26 = vpop.eup %8134 }
 0x7d5   :  { %v8137_v27 = vpop.eup %8136 }
 0x7d6   :  { %v8139_v29 = vpop.eup %8138  ;;  %v4709_v30 = vcombine.low %v8133_v13, %v8137_v27  ;;  %v7969_v13 = vld [vmem:[#allocation8 + $0xec8] ss:$16 sps:$4 sm:$0xff]   ;;  %v7977_v27 = vld [vmem:[#allocation8 + $0xeec] ss:$16 sps:$4 sm:$0xff]  }
 0x7d7   :  { %v4710_v28 = vcombine.low %v8135_v26, %v8139_v29  ;;  %v7974_v26 = vld [vmem:[#allocation8 + $0xee4] ss:$16 sps:$4 sm:$0xff]   ;;  %v7972_v29 = vld [vmem:[#allocation8 + $0xee0] ss:$16 sps:$4 sm:$0xff]  }
 0x7d8   :  { %v4717_v31 = vrot.slane %v4709_v30, %v8551_v48  ;;  %v7975_v30 = vld [vmem:[#allocation8 + $0xee8] ss:$16 sps:$4 sm:$0xff]  }
 0x7d9   :  { %v4724_v32 = vrot.slane %v4710_v28, %v8551_v48  ;;  %v7980_v28 = vld [vmem:[#allocation8 + $0xf04] ss:$16 sps:$4 sm:$0xff]  }
 0x7db   :  { %v4725_v33 = vcombine.low %v4717_v31, %v4724_v32  ;;  %v7983_v31 = vld [vmem:[#allocation8 + $0xf0c] ss:$16 sps:$4 sm:$0xff]   ;;  %v7978_v32 = vld [vmem:[#allocation8 + $0xf00] ss:$16 sps:$4 sm:$0xff]  }
 0x7dd   :  { %v4732_v35 = vrot.slane %v4725_v33, %v8551_v48  ;;  %v7981_v33 = vld [vmem:[#allocation8 + $0xf08] ss:$16 sps:$4 sm:$0xff]  }
 0x7df   :  { %v4734_v37 = vmul.f32 %v4732_v35, %v4694_v34  ;;  %v7986_v34 = vld [vmem:[#allocation8 + $0xf24] ss:$16 sps:$4 sm:$0xff]   ;;  %v7989_v35 = vld [vmem:[#allocation8 + $0xf2c] ss:$16 sps:$4 sm:$0xff]  }
 0x7e1   :  { %v4739_v36 = vrot.slane %v4734_v37, %v8556_v54  ;;  %v4743_v40 = vrot.slane %v4734_v37, %v8559_v55  ;;  %v4747_v38 = vrot.slane %v4734_v37, %v8599_v45  ;;  %v4751_v23 = vrot.slane %v4734_v37, %v8602_v47  ;;  %v7984_v37 = vld [vmem:[#allocation8 + $0xf20] ss:$16 sps:$4 sm:$0xff]  }
 0x7e3   :  { %v4756_v58 = vmul.f32 %v4739_v36, %v4677_v39  ;;  %v4757_v41 = vmul.f32 %v4743_v40, %v4678_v1  ;;  %v4758_v53 = vmul.f32 %v4747_v38, %v4679_v46  ;;  %v4759_v42 = vmul.f32 %v4751_v23, %v4680_v10  ;;  %v7954_v10 = vld [vmem:[#allocation8 + $0xe80] ss:$16 sps:$4 sm:$0xff]  }
 0x7e4   :  { %v4793_v43 = vmul.f32 %v4751_v23, %v8802_v4  ;;  %v4791_v50 = vmul.f32 %v4743_v40, %v8800_v2  ;;  %v4790_v49 = vmul.f32 %v4739_v36, %v8790_v44  ;;  %v4792_v51 = vmul.f32 %v4747_v38, %v8792_v57  ;;  %v7987_v36 = vld [vmem:[#allocation8 + $0xf28] ss:$16 sps:$4 sm:$0xff]   ;;  %v7992_v40 = vld [vmem:[#allocation8 + $0xf44] ss:$16 sps:$4 sm:$0xff]   ;;  %v7995_v38 = vld [vmem:[#allocation8 + $0xf4c] ss:$16 sps:$4 sm:$0xff]  }
 0x7e5   :  { %v4764_v20 = vcombine.low %v4756_v58, %v4757_v41  ;;  %v4765_v52 = vcombine.low %v4758_v53, %v4759_v42  ;;  %v7990_v23 = vld [vmem:[#allocation8 + $0xf40] ss:$16 sps:$4 sm:$0xff]   ;;  %v7993_v58 = vld [vmem:[#allocation8 + $0xf48] ss:$16 sps:$4 sm:$0xff]   ;;  %v7998_v41 = vld [vmem:[#allocation8 + $0xf64] ss:$16 sps:$4 sm:$0xff]  }
 0x7e6   :  { %v8001_v53 = vld [vmem:[#allocation8 + $0xf6c] ss:$16 sps:$4 sm:$0xff]   ;;  %v7996_v42 = vld [vmem:[#allocation8 + $0xf60] ss:$16 sps:$4 sm:$0xff]  }
 0x7e7   :  { %v4772_v56 = vrot.slane %v4764_v20, %v8551_v48  ;;  %v4779_v60 = vrot.slane %v4765_v52, %v8551_v48  ;;  %v8002_v20 = vld [vmem:[#allocation8 + $0xf80] ss:$16 sps:$4 sm:$0xff]   ;;  %v8005_v52 = vld [vmem:[#allocation8 + $0xf88] ss:$16 sps:$4 sm:$0xff]  }
 0x7e9   :  { %v4780_v59 = vcombine.low %v4772_v56, %v4779_v60 }
 0x7eb   :  { %v4787_v39 = vrot.slane %v4780_v59, %v8551_v48  ;;  %v8010_v59 = vld [vmem:[#allocation10 + $0x4] ss:$8 sps:$4 sm:$0xff]  }
 0x7ed   :  { %v4789_v46 = vsub.f32 %v4696_v61, %v4787_v39  ;;  %v8008_v61 = vld [vmem:[#allocation10] ss:$8 sps:$4 sm:$0xff]   ;;  %v8013_v39 = vld [vmem:[#allocation10 + $0x14] ss:$8 sps:$4 sm:$0xff]  }
 0x7ef   :  { %v4810_v62 = vrot.slane %v4789_v46, %v8602_v47  ;;  %v4802_v4 = vrot.slane %v4789_v46, %v8559_v55  ;;  %v4798_v2 = vrot.slane %v4789_v46, %v8556_v54  ;;  %v4806_v44 = vrot.slane %v4789_v46, %v8599_v45  ;;  %v8011_v46 = vld [vmem:[#allocation10 + $0x10] ss:$8 sps:$4 sm:$0xff]  }
 0x7f1   :  { %v4818_v57 = vadd.f32 %v4810_v62, %v4793_v43  ;;  %v4816_v1 = vadd.f32 %v4802_v4, %v4791_v50  ;;  %v4815_v5 = vadd.f32 %v4798_v2, %v4790_v49  ;;  %v8833_v6 = vadd.f32 %v4806_v44, %v4792_v51  ;;  %v7999_v43 = vld [vmem:[#allocation8 + $0xf68] ss:$16 sps:$4 sm:$0xff]   ;;  %v8004_v50 = vld [vmem:[#allocation8 + $0xf84] ss:$16 sps:$4 sm:$0xff]   ;;  %v8007_v49 = vld [vmem:[#allocation8 + $0xf8c] ss:$16 sps:$4 sm:$0xff]  }
 0x7f2   :  { %v8016_v62 = vld [vmem:[#allocation10 + $0x24] ss:$8 sps:$4 sm:$0xff]   ;;  %v8014_v4 = vld [vmem:[#allocation10 + $0x20] ss:$8 sps:$4 sm:$0xff]   ;;  %v8019_v2 = vld [vmem:[#allocation10 + $0x34] ss:$8 sps:$4 sm:$0xff]  }
 0x7f3   :  { %v4822_v8 = vmul.f32 0.01, %v4818_v57  ;;  %v4820_v7 = vmul.f32 0.01, %v4816_v1  ;;  %v4819_v11 = vmul.f32 0.01, %v4815_v5 }
 0x7f4   :  { %v4821_v51 = vmul.f32 0.01, %v8833_v6  ;;  %v8017_v44 = vld [vmem:[#allocation10 + $0x30] ss:$8 sps:$4 sm:$0xff]  }
 0x7f5   :  { %v4824_v12 = vmax.f32 %v4816_v1, %v4820_v7  ;;  %v4823_v63 = vmax.f32 %v4815_v5, %v4819_v11  ;;  %v4826_v15 = vmax.f32 %v4818_v57, %v4822_v8  ;;  %v8022_v57 = vld [vmem:[#allocation10 + $0x44] ss:$8 sps:$4 sm:$0xff]   ;;  %v8020_v1 = vld [vmem:[#allocation10 + $0x40] ss:$8 sps:$4 sm:$0xff]   ;;  %v8025_v5 = vld [vmem:[#allocation10 + $0x54] ss:$8 sps:$4 sm:$0xff]  }
 0x7f6   :  { %v4825_v56 = vmax.f32 %v8833_v6, %v4821_v51  ;;  %v8023_v6 = vld [vmem:[#allocation10 + $0x50] ss:$8 sps:$4 sm:$0xff]   ;;  %v8028_v8 = vld [vmem:[#allocation10 + $0x64] ss:$8 sps:$4 sm:$0xff]   ;;  %v8026_v7 = vld [vmem:[#allocation10 + $0x60] ss:$8 sps:$4 sm:$0xff]  }
 0x7f7   :  { %v4929_v9 = vpack.c.bf16 %v4824_v12, %v4824_v12  ;;  %v4928_v3 = vpack.c.bf16 %v4823_v63, %v4823_v63  ;;  %v4931_v18 = vpack.c.bf16 %v4826_v15, %v4826_v15  ;;  %v8031_v11 = vld [vmem:[#allocation10 + $0x74] ss:$8 sps:$4 sm:$0xff]   ;;  %v8029_v12 = vld [vmem:[#allocation10 + $0x70] ss:$8 sps:$4 sm:$0xff]   ;;  %v8034_v63 = vld [vmem:[#allocation10 + $0x84] ss:$8 sps:$4 sm:$0xff]  }
 0x7f8   :  { %v4930_v60 = vpack.c.bf16 %v4825_v56, %v4825_v56  ;;  %v8032_v15 = vld [vmem:[#allocation10 + $0x80] ss:$8 sps:$4 sm:$0xff]  }
 0x7f9   :  { %5467 = vmatprep.mubr.bf16.mxu1 %v4929_v9  ;;  %5549 = vmatprep.mubr.bf16.mxu0 %v4929_v9  ;;  %v8037_v9 = vld [vmem:[#allocation10 + $0x94] ss:$8 sps:$4 sm:$0xff]  }
 0x7fa   :  { %5468 = vmatmul.mubr.bf16.vlgmr.msra.gmra.mrb[24].mxu1 %v4928_v3  ;;  %5550 = vmatmul.mubr.bf16.vlgmr.msra.gmra.mrb[24].mxu0 %v4928_v3  ;;  %v8038_v3 = vld [vmem:[#allocation10 + $0xa0] ss:$8 sps:$4 sm:$0xff]  }
 0x7fb   :  { %5477 = vmatpush1.bf16.msra.mxu1 %v7954_v10  ;;  %5559 = vmatpush1.bf16.msra.mxu0 %v7957_v14  ;;  %v8035_v10 = vld [vmem:[#allocation10 + $0x90] ss:$8 sps:$4 sm:$0xff]   ;;  %v8040_v14 = vld [vmem:[#allocation10 + $0xa4] ss:$8 sps:$4 sm:$0xff]  }
 0x7fc   :  { %7051 = vmatprep.mubr.msk.bf16.mxu1 %vm737_vm3, %v4931_v18  ;;  %7052 = vmatprep.mubr.msk.bf16.mxu0 %vm737_vm3, %v4931_v18  ;;  %v8046_v18 = vld [vmem:[#allocation10 + $0xc4] ss:$8 sps:$4 sm:$0xff]  }
 0x7fd   :  { %5478 = vmatprep.subr.bf16.mxu1 %v7962_v16  ;;  %5560 = vmatprep.subr.bf16.mxu0 %v7965_v17  ;;  %v8043_v16 = vld [vmem:[#allocation10 + $0xb4] ss:$8 sps:$4 sm:$0xff]   ;;  %v8041_v17 = vld [vmem:[#allocation10 + $0xb0] ss:$8 sps:$4 sm:$0xff]  }
 0x7ff   :  { %5479 = vmatpush1.bf16.msra.mxu1 %v7960_v19  ;;  %5561 = vmatpush1.bf16.msra.mxu0 %v7963_v21  ;;  %v8044_v19 = vld [vmem:[#allocation10 + $0xc0] ss:$8 sps:$4 sm:$0xff]   ;;  %v8049_v21 = vld [vmem:[#allocation10 + $0xd4] ss:$8 sps:$4 sm:$0xff]  }
 0x800   :  { %5480 = vmatprep.subr.bf16.mxu1 %v7968_v22  ;;  %5562 = vmatprep.subr.bf16.mxu0 %v7971_v24  ;;  %v8047_v22 = vld [vmem:[#allocation10 + $0xd0] ss:$8 sps:$4 sm:$0xff]   ;;  %v8052_v24 = vld [vmem:[#allocation10 + $0xe4] ss:$8 sps:$4 sm:$0xff]  }
 0x803   :  { %5481 = vmatpush1.bf16.msra.mxu1 %v7966_v25  ;;  %5563 = vmatpush1.bf16.msra.mxu0 %v7969_v13  ;;  %v8050_v25 = vld [vmem:[#allocation10 + $0xe0] ss:$8 sps:$4 sm:$0xff]   ;;  %v8055_v13 = vld [vmem:[#allocation10 + $0xf4] ss:$8 sps:$4 sm:$0xff]  }
 0x804   :  { %5482 = vmatprep.subr.bf16.mxu1 %v7974_v26  ;;  %5564 = vmatprep.subr.bf16.mxu0 %v7977_v27  ;;  %v8053_v26 = vld [vmem:[#allocation10 + $0xf0] ss:$8 sps:$4 sm:$0xff]   ;;  %v8058_v27 = vld [vmem:[#allocation10 + $0x104] ss:$8 sps:$4 sm:$0xff]  }
 0x807   :  { %5483 = vmatpush1.bf16.msra.mxu1 %v7972_v29  ;;  %5565 = vmatpush1.bf16.msra.mxu0 %v7975_v30 }
 0x808   :  { %5484 = vmatprep.subr.bf16.mxu1 %v7980_v28  ;;  %5566 = vmatprep.subr.bf16.mxu0 %v7983_v31 }
 0x80b   :  { %5485 = vmatpush1.bf16.msra.mxu1 %v7978_v32  ;;  %5567 = vmatpush1.bf16.msra.mxu0 %v7981_v33 }
 0x80c   :  { %5486 = vmatprep.subr.bf16.mxu1 %v7986_v34  ;;  %5568 = vmatprep.subr.bf16.mxu0 %v7989_v35 }
 0x80f   :  { %5487 = vmatpush1.bf16.msra.mxu1 %v7984_v37  ;;  %5569 = vmatpush1.bf16.msra.mxu0 %v7987_v36 }
 0x810   :  { %5488 = vmatprep.subr.bf16.mxu1 %v7992_v40  ;;  %5570 = vmatprep.subr.bf16.mxu0 %v7995_v38 }
 0x813   :  { %5489 = vmatpush1.bf16.msra.mxu1 %v7990_v23  ;;  %5571 = vmatpush1.bf16.msra.mxu0 %v7993_v58 }
 0x814   :  { %5490 = vmatprep.subr.bf16.mxu1 %v7998_v41  ;;  %5572 = vmatprep.subr.bf16.mxu0 %v8001_v53 }
 0x817   :  { %5491 = vmatpush1.bf16.msra.mxu1 %v7996_v42  ;;  %5573 = vmatpush1.bf16.msra.mxu0 %v7999_v43 }
 0x818   :  { %5492 = vmatprep.subr.bf16.mxu1 %v8004_v50  ;;  %5574 = vmatprep.subr.bf16.mxu0 %v8007_v49 }
 0x81b   :  { %5493 = vmatpush1.bf16.msra.mxu1 %v8002_v20  ;;  %5575 = vmatpush1.bf16.msra.mxu0 %v8005_v52 }
 0x81c   :  { %6421 = vmatprep.subr.bf16.mxu0 %v8374_v0  ;;  %6110 = vmatprep.subr.bf16.mxu1 %v8010_v59 }
 0x81e   :  { %5509 = vmatmul.mubr.bf16.vlgmr.msra.gmra.mrb[24].mxu1 %v4930_v60  ;;  %5591 = vmatmul.mubr.bf16.vlgmr.msra.gmra.mrb[24].mxu0 %v4930_v60 }
 0x81f   :  { %6111 = vmatpush1.bf16.msra.mxu1 %v8008_v61 }
 0x820   :  { %6112 = vmatprep.subr.bf16.mxu1 %v8013_v39 }
 0x823   :  { %6113 = vmatpush1.bf16.msra.mxu1 %v8011_v46 }
 0x824   :  { %6114 = vmatprep.subr.bf16.mxu1 %v8016_v62 }
 0x827   :  { %6115 = vmatpush1.bf16.msra.mxu1 %v8014_v4 }
 0x828   :  { %6116 = vmatprep.subr.bf16.mxu1 %v8019_v2 }
 0x82b   :  { %6117 = vmatpush1.bf16.msra.mxu1 %v8017_v44 }
 0x82c   :  { %6118 = vmatprep.subr.bf16.mxu1 %v8022_v57 }
 0x82f   :  { %6119 = vmatpush1.bf16.msra.mxu1 %v8020_v1 }
 0x830   :  { %6120 = vmatprep.subr.bf16.mxu1 %v8025_v5 }
 0x833   :  { %6121 = vmatpush1.bf16.msra.mxu1 %v8023_v6 }
 0x834   :  { %6122 = vmatprep.subr.bf16.mxu1 %v8028_v8 }
 0x837   :  { %6123 = vmatpush1.bf16.msra.mxu1 %v8026_v7 }
 0x838   :  { %6124 = vmatprep.subr.bf16.mxu1 %v8031_v11 }
 0x83b   :  { %6125 = vmatpush1.bf16.msra.mxu1 %v8029_v12 }
 0x83c   :  { %6126 = vmatprep.subr.bf16.mxu1 %v8034_v63 }
 0x83f   :  { %6127 = vmatpush1.bf16.msra.mxu1 %v8032_v15 }
 0x840   :  { %6128 = vmatprep.subr.bf16.mxu1 %v8037_v9 }
 0x843   :  { %6129 = vmatpush1.bf16.msra.mxu1 %v8035_v10 }
 0x844   :  { %6130 = vmatprep.subr.bf16.mxu1 %v8040_v14 }
 0x847   :  { %6131 = vmatpush1.bf16.msra.mxu1 %v8038_v3 }
 0x848   :  { %6132 = vmatprep.subr.bf16.mxu1 %v8043_v16 }
 0x84b   :  { %6133 = vmatpush1.bf16.msra.mxu1 %v8041_v17 }
 0x84c   :  { %6134 = vmatprep.subr.bf16.mxu1 %v8046_v18 }
 0x84f   :  { %6135 = vmatpush1.bf16.msra.mxu1 %v8044_v19 }
 0x850   :  { %6136 = vmatprep.subr.bf16.mxu1 %v8049_v21 }
 0x853   :  { %6137 = vmatpush1.bf16.msra.mxu1 %v8047_v22 }
 0x854   :  { %6138 = vmatprep.subr.bf16.mxu1 %v8052_v24 }
 0x857   :  { %6139 = vmatpush1.bf16.msra.mxu1 %v8050_v25 }
 0x858   :  { %6140 = vmatprep.subr.bf16.mxu1 %v8055_v13 }
 0x85b   :  { %6141 = vmatpush1.bf16.msra.mxu1 %v8053_v26 }
 0x85c   :  { %6151 = vmatprep.subr.bf16.mxu1 %v8058_v27 }
 0x8f1   :  { %v8840_v29 = vpop.f32.mrb[24].mxu1  ;;  %v8842_v30 = vpop.f32.mrb[24].mxu0 }
 0x8f2   :  { %v5599_v28 = vrot.slane %v8840_v29, 4  ;;  %v5624_v31 = vmul.f32 %v8840_v29, %v8840_v29  ;;  %v5611_v32 = vrot.slane %v8842_v30, 4  ;;  %v5626_v33 = vmul.f32 %v8842_v30, %v8842_v30  ;;  %v8850_v34 = vpop.f32.mrb[25].mxu1  ;;  %v8852_v35 = vpop.f32.mrb[25].mxu0 }
 0x8f3   :  { %v5605_v37 = vrot.slane %v8850_v34, 4  ;;  %v5625_v36 = vmul.f32 %v8850_v34, %v8850_v34  ;;  %v5617_v40 = vsel %vm737_vm3, %v8852_v35, 0.0  ;;  %v5627_v38 = vmul.f32 %v8852_v35, %v8852_v35  ;;  %v5514_v23 = vpop.f32.mrb[26].mxu1  ;;  %v5596_v58 = vpop.f32.mrb[26].mxu0 }
 0x8f4   :  { %v5600_v41 = vadd.f32 %v5599_v28, %v8840_v29  ;;  %v5628_v53 = vrot.slane %v5624_v31, 4  ;;  %v5612_v42 = vadd.f32 %v5611_v32, %v8842_v30  ;;  %v5640_v43 = vrot.slane %v5626_v33, 4  ;;  %v5515_v50 = vpop.f32.mrb[27].mxu1  ;;  %v5597_v49 = vpop.f32.mrb[27].mxu0 }
 0x8f5   :  { %v5606_v51 = vadd.f32 %v5605_v37, %v8850_v34  ;;  %v5634_v20 = vrot.slane %v5625_v36, 4  ;;  %v5618_v52 = vrot.slane %v5617_v40, 4  ;;  %v5646_v56 = vsel %vm737_vm3, %v5627_v38, 0.0 }
 0x8f6   :  { %v5601_v60 = vrot.slane %v5600_v41, 2  ;;  %v5629_v59 = vadd.f32 %v5628_v53, %v5624_v31  ;;  %v5613_v61 = vrot.slane %v5612_v42, 2  ;;  %v5641_v39 = vadd.f32 %v5640_v43, %v5626_v33 }
 0x8f7   :  { %v5607_v46 = vrot.slane %v5606_v51, 2  ;;  %v5635_v62 = vadd.f32 %v5634_v20, %v5625_v36  ;;  %v5619_v4 = vadd.f32 %v5618_v52, %v5617_v40  ;;  %v5647_v2 = vrot.slane %v5646_v56, 4 }
 0x8f8   :  { %v5602_v44 = vadd.f32 %v5601_v60, %v5600_v41  ;;  %v5630_v57 = vrot.slane %v5629_v59, 2  ;;  %v5614_v1 = vadd.f32 %v5613_v61, %v5612_v42  ;;  %v5642_v5 = vrot.slane %v5641_v39, 2 }
 0x8f9   :  { %v5608_v6 = vadd.f32 %v5607_v46, %v5606_v51  ;;  %v5636_v8 = vrot.slane %v5635_v62, 2  ;;  %v5620_v7 = vrot.slane %v5619_v4, 2  ;;  %v5648_v11 = vadd.f32 %v5647_v2, %v5646_v56 }
 0x8fa   :  { %v5603_v12 = vrot.slane %v5602_v44, 1  ;;  %v5631_v63 = vadd.f32 %v5630_v57, %v5629_v59  ;;  %v5615_v15 = vrot.slane %v5614_v1, 1  ;;  %v5643_v9 = vadd.f32 %v5642_v5, %v5641_v39 }
 0x8fb   :  { %v5609_v10 = vrot.slane %v5608_v6, 1  ;;  %v5637_v14 = vadd.f32 %v5636_v8, %v5635_v62  ;;  %v5621_v3 = vadd.f32 %v5620_v7, %v5619_v4  ;;  %v5649_v16 = vrot.slane %v5648_v11, 2  ;;  %v5670_v8 = vld [vmem:[#allocation11 + $0x6] ss:$8 sm:$0xf] }
 0x8fc   :  { %v5604_v17 = vadd.f32 %v5603_v12, %v5602_v44  ;;  %v5632_v18 = vrot.slane %v5631_v63, 1  ;;  %v5616_v19 = vadd.f32 %v5615_v15, %v5614_v1  ;;  %v5644_v21 = vrot.slane %v5643_v9, 1 }
 0x8fd   :  { %v5610_v22 = vadd.f32 %v5609_v10, %v5608_v6  ;;  %v5638_v24 = vrot.slane %v5637_v14, 1  ;;  %v5622_v25 = vrot.slane %v5621_v3, 1  ;;  %v5650_v13 = vadd.f32 %v5649_v16, %v5648_v11 }
 0x8fe   :  { %v5633_v26 = vadd.f32 %v5632_v18, %v5631_v63  ;;  %v5653_v27 = vmul.f32 0.125, %v5604_v17  ;;  %v5645_v28 = vadd.f32 %v5644_v21, %v5643_v9  ;;  %v5655_v31 = vmul.f32 0.125, %v5616_v19 }
 0x8ff   :  { %v5639_v32 = vadd.f32 %v5638_v24, %v5637_v14  ;;  %v5654_v33 = vmul.f32 0.125, %v5610_v22  ;;  %v5623_v37 = vadd.f32 %v5622_v25, %v5621_v3  ;;  %v5651_v36 = vrot.slane %v5650_v13, 1 }
 0x900   :  { %v5657_v40 = vmul.f32 0.125, %v5633_v26  ;;  %v5661_v38 = vmul.f32 %v5653_v27, %v5653_v27  ;;  %v5659_v23 = vmul.f32 0.125, %v5645_v28  ;;  %v5663_v58 = vmul.f32 %v5655_v31, %v5655_v31  ;;  %v5672_v28 = vld [vmem:[#allocation13 + $0x6] ss:$8 sm:$0xf] }
 0x901   :  { %v5658_v41 = vmul.f32 0.125, %v5639_v32  ;;  %v5662_v53 = vmul.f32 %v5654_v33, %v5654_v33  ;;  %v5652_v42 = vadd.f32 %v5651_v36, %v5650_v13  ;;  %v5656_v43 = vmul.f32 0.125, %v5623_v37 }
 0x902   :  { %v5665_v50 = vsub.f32 %v5657_v40, %v5661_v38  ;;  %v5667_v49 = vsub.f32 %v5659_v23, %v5663_v58 }
 0x903   :  { %v5666_v51 = vsub.f32 %v5658_v41, %v5662_v53  ;;  %v5660_v20 = vmul.f32 0.125, %v5652_v42  ;;  %v5664_v52 = vmul.f32 %v5656_v43, %v5656_v43 }
 0x904   :  { %v5673_v56 = vadd.f32 1e-05, %v5665_v50  ;;  %v5675_v60 = vadd.f32 1e-05, %v5667_v49 }
 0x905   :  { %v5674_v59 = vadd.f32 1e-05, %v5666_v51  ;;  %v5668_v61 = vsub.f32 %v5660_v20, %v5664_v52  ;;  %v8064_v51 = vld [vmem:[#allocation10 + $0x124] ss:$8 sps:$4 sm:$0xff]   ;;  %v8062_v20 = vld [vmem:[#allocation10 + $0x120] ss:$8 sps:$4 sm:$0xff]  }
 0x906   :  { %8140 = vrsqrt.f32 %v5673_v56  ;;  %v8067_v52 = vld [vmem:[#allocation10 + $0x134] ss:$8 sps:$4 sm:$0xff]   ;;  %v8065_v56 = vld [vmem:[#allocation10 + $0x130] ss:$8 sps:$4 sm:$0xff]  }
 0x907   :  { %8142 = vrsqrt.f32 %v5675_v60  ;;  %v5676_v39 = vadd.f32 1e-05, %v5668_v61  ;;  %v8070_v60 = vld [vmem:[#allocation10 + $0x144] ss:$8 sps:$4 sm:$0xff]   ;;  %v8073_v61 = vld [vmem:[#allocation10 + $0x154] ss:$8 sps:$4 sm:$0xff]  }
 0x908   :  { %8144 = vrsqrt.f32 %v5674_v59  ;;  %v8068_v59 = vld [vmem:[#allocation10 + $0x140] ss:$8 sps:$4 sm:$0xff]  }
 0x909   :  { %8146 = vrsqrt.f32 %v5676_v39  ;;  %v8071_v39 = vld [vmem:[#allocation10 + $0x150] ss:$8 sps:$4 sm:$0xff]  }
 0x910   :  { %v8141_v46 = vpop.eup %8140 }
 0x911   :  { %v8143_v62 = vpop.eup %8142 }
 0x912   :  { %v8145_v4 = vpop.eup %8144 }
 0x913   :  { %v8147_v2 = vpop.eup %8146  ;;  %v5685_v44 = vcombine.low %v8141_v46, %v8145_v4  ;;  %v8076_v46 = vld [vmem:[#allocation10 + $0x164] ss:$8 sps:$4 sm:$0xff]   ;;  %v8079_v4 = vld [vmem:[#allocation10 + $0x174] ss:$8 sps:$4 sm:$0xff]  }
 0x914   :  { %v5686_v57 = vcombine.low %v8143_v62, %v8147_v2  ;;  %v8074_v62 = vld [vmem:[#allocation10 + $0x160] ss:$8 sps:$4 sm:$0xff]   ;;  %v8077_v2 = vld [vmem:[#allocation10 + $0x170] ss:$8 sps:$4 sm:$0xff]  }
 0x915   :  { %v5693_v1 = vrot.slane %v5685_v44, %v8551_v48  ;;  %v8082_v44 = vld [vmem:[#allocation10 + $0x184] ss:$8 sps:$4 sm:$0xff]  }
 0x916   :  { %v5700_v5 = vrot.slane %v5686_v57, %v8551_v48 }
 0x918   :  { %v5701_v6 = vcombine.low %v5693_v1, %v5700_v5  ;;  %v8080_v1 = vld [vmem:[#allocation10 + $0x180] ss:$8 sps:$4 sm:$0xff]  }
 0x91a   :  { %v5708_v7 = vrot.slane %v5701_v6, %v8551_v48 }
 0x91c   :  { %v5710_v11 = vmul.f32 %v5708_v7, %v5670_v8  ;;  %v8083_v8 = vld [vmem:[%s8966_s7] sm:$0xff]   ;;  %v8084_v7 = vld [vmem:[%s8966_s7 + $0x8] sm:$0xff]  }
 0x91d   :  { %6422 = vmatpush1.bf16.msra.mxu0 %v8083_v8 }
 0x91e   :  { %v5715_v12 = vrot.slane %v5710_v11, %v8556_v54  ;;  %v5719_v63 = vrot.slane %v5710_v11, %v8559_v55  ;;  %v5723_v15 = vrot.slane %v5710_v11, %v8599_v45  ;;  %v5727_v9 = vrot.slane %v5710_v11, %v8602_v47  ;;  %6423 = vmatprep.subr.bf16.mxu0 %v8374_v0  ;;  %v8085_v11 = vld [vmem:[%s8966_s7 + $0x10] sm:$0xff]  }
 0x920   :  { %v5732_v10 = vmul.f32 %v5715_v12, %v5653_v27  ;;  %v5733_v14 = vmul.f32 %v5719_v63, %v5654_v33  ;;  %v5734_v3 = vmul.f32 %v5723_v15, %v5655_v31  ;;  %v5735_v16 = vmul.f32 %v5727_v9, %v5656_v43  ;;  %v8056_v43 = vld [vmem:[#allocation10 + $0x100] ss:$8 sps:$4 sm:$0xff]  }
 0x921   :  { %v5769_v17 = vmul.f32 %v5727_v9, %v8852_v35  ;;  %v5767_v18 = vmul.f32 %v5719_v63, %v8850_v34  ;;  %v5766_v19 = vmul.f32 %v5715_v12, %v8840_v29  ;;  %v5768_v21 = vmul.f32 %v5723_v15, %v8842_v30  ;;  %6424 = vmatpush1.bf16.msra.mxu0 %v8084_v7  ;;  %v8086_v12 = vld [vmem:[%s8966_s7 + $0x18] sm:$0xff]   ;;  %v8087_v63 = vld [vmem:[%s8966_s7 + $0x20] sm:$0xff]   ;;  %v8088_v15 = vld [vmem:[%s8966_s7 + $0x28] sm:$0xff]  }
 0x922   :  { %v5740_v22 = vcombine.low %v5732_v10, %v5733_v14  ;;  %v5741_v24 = vcombine.low %v5734_v3, %v5735_v16  ;;  %6425 = vmatprep.subr.bf16.mxu0 %v8374_v0  ;;  %v8089_v9 = vld [vmem:[%s8966_s7 + $0x30] sm:$0xff]   ;;  %v8090_v10 = vld [vmem:[%s8966_s7 + $0x38] sm:$0xff]   ;;  %v8091_v14 = vld [vmem:[%s8966_s7 + $0x40] sm:$0xff]  }
 0x923   :  { %v8092_v3 = vld [vmem:[%s8966_s7 + $0x48] sm:$0xff]   ;;  %v8093_v16 = vld [vmem:[%s8966_s7 + $0x50] sm:$0xff]  }
 0x924   :  { %v5748_v25 = vrot.slane %v5740_v22, %v8551_v48  ;;  %v5755_v13 = vrot.slane %v5741_v24, %v8551_v48 }
 0x925   :  { %6426 = vmatpush1.bf16.msra.mxu0 %v8085_v11 }
 0x926   :  { %v5756_v26 = vcombine.low %v5748_v25, %v5755_v13  ;;  %6427 = vmatprep.subr.bf16.mxu0 %v8374_v0 }
 0x928   :  { %v5763_v27 = vrot.slane %v5756_v26, %v8551_v48 }
 0x929   :  { %6428 = vmatpush1.bf16.msra.mxu0 %v8086_v12 }
 0x92a   :  { %v5765_v31 = vsub.f32 %v5672_v28, %v5763_v27  ;;  %6429 = vmatprep.subr.bf16.mxu0 %v8374_v0 }
 0x92c   :  { %v5786_v32 = vrot.slane %v5765_v31, %v8602_v47  ;;  %v5778_v35 = vrot.slane %v5765_v31, %v8559_v55  ;;  %v5774_v34 = vrot.slane %v5765_v31, %v8556_v54  ;;  %v5782_v29 = vrot.slane %v5765_v31, %v8599_v45  ;;  %v8061_v47 = vld [vmem:[#allocation10 + $0x114] ss:$8 sps:$4 sm:$0xff]   ;;  %v8059_v45 = vld [vmem:[#allocation10 + $0x110] ss:$8 sps:$4 sm:$0xff]  }
 0x92d   :  { %6430 = vmatpush1.bf16.msra.mxu0 %v8087_v63 }
 0x92e   :  { %v5794_v30 = vadd.f32 %v5786_v32, %v5769_v17  ;;  %v5792_v33 = vadd.f32 %v5778_v35, %v5767_v18  ;;  %v5791_v37 = vadd.f32 %v5774_v34, %v5766_v19  ;;  %v5793_v36 = vadd.f32 %v5782_v29, %v5768_v21  ;;  %6431 = vmatprep.subr.bf16.mxu0 %v8374_v0  ;;  %v8094_v17 = vld [vmem:[%s8966_s7 + $0x58] sm:$0xff]   ;;  %v8095_v18 = vld [vmem:[%s8966_s7 + $0x60] ss:$0 sps:$4 sm:$0xff]   ;;  %s8376_s7 = smov [#allocation16]  }
 0x92f   :  { %v6419_v19 = vsel %vm624_vm1, %v8095_v18, 0  ;;  %s6469_s6 = sshll.u32 %s8376_s7, 4  ;;  %s6470_s6 = int_to_ptr.vmem [resolvable:$true] %s6469_s6 }
 0x930   :  { %v5798_v40 = vmul.f32 0.01, %v5794_v30  ;;  %v5796_v38 = vmul.f32 0.01, %v5792_v33  ;;  %v5795_v23 = vmul.f32 0.01, %v5791_v37  ;;  %p8333_p9 = scmp.lt.s32.totalorder %s6470_s6, %s6470_s6 }
 0x931   :  { %v5797_v57 = vmul.f32 0.01, %v5793_v36  ;;  %6432 = vmatpush1.bf16.msra.mxu0 %v8088_v15  ;;  %s8328_s16 = scalar_lea.vmem %s6470_s6, 128 }
 0x932   :  { %v5802_v58 = vmax.f32 %v5794_v30, %v5798_v40  ;;  %v5800_v41 = vmax.f32 %v5792_v33, %v5796_v38  ;;  %v5799_v53 = vmax.f32 %v5791_v37, %v5795_v23  ;;  %6433 = vmatprep.subr.bf16.mxu0 %v8374_v0  ;;  %p8329_p8 = scmp.ne.s32.totalorder %s6470_s6, %s8328_s16  ;;  %p8334_p10 = scmp.lt.s32.totalorder %s8328_s16, %s8328_s16 }
 0x933   :  { %v5801_v5 = vmax.f32 %v5793_v36, %v5797_v57 }
 0x934   :  { %v5854_v42 = vpack.c.bf16 %v5800_v41, %v5800_v41  ;;  %v5853_v50 = vpack.c.bf16 %v5799_v53, %v5799_v53  ;;  %v5856_v49 = vpack.c.bf16 %v5802_v58, %v5802_v58  ;;  %p8335_p11 = por %p8334_p10, %p8333_p9 }
 0x935   :  { %v5855_v6 = vpack.c.bf16 %v5801_v5, %v5801_v5  ;;  %6434 = vmatpush1.bf16.msra.mxu0 %v8089_v9 }
 0x936   :  { %6142 = vmatprep.mubr.bf16.mxu1 %v5854_v42  ;;  %6435 = vmatprep.subr.bf16.mxu0 %v8374_v0  ;;  %p8336_p12 = pnand %p8335_p11, %p8329_p8 }
 0x937   :  { %6143 = vmatmul.mubr.bf16.vlgmr.msra.gmra.mrb[28].mxu1 %v5853_v50 }
 0x938   :  { %6152 = vmatpush1.bf16.msra.mxu1 %v8056_v43  ;;  %7103 = vmatprep.mubr.msk.bf16.mxu1 %vm737_vm3, %v5856_v49 }
 0x939   :  { %6153 = vmatprep.subr.bf16.mxu1 %v8061_v47  ;;  %6436 = vmatpush1.bf16.msra.mxu0 %v8090_v10 }
 0x93a   :  { %6437 = vmatprep.subr.bf16.mxu0 %v8374_v0 }
 0x93c   :  { %6154 = vmatpush1.bf16.msra.mxu1 %v8059_v45 }
 0x93d   :  { %6155 = vmatprep.subr.bf16.mxu1 %v8064_v51  ;;  %6438 = vmatpush1.bf16.msra.mxu0 %v8091_v14 }
 0x93e   :  { %6439 = vmatprep.subr.bf16.mxu0 %v8374_v0 }
 0x940   :  { %6156 = vmatpush1.bf16.msra.mxu1 %v8062_v20 }
 0x941   :  { %6157 = vmatprep.subr.bf16.mxu1 %v8067_v52  ;;  %6440 = vmatpush1.bf16.msra.mxu0 %v8092_v3 }
 0x942   :  { %6441 = vmatprep.subr.bf16.mxu0 %v8374_v0 }
 0x944   :  { %6158 = vmatpush1.bf16.msra.mxu1 %v8065_v56 }
 0x945   :  { %6159 = vmatprep.subr.bf16.mxu1 %v8070_v60  ;;  %6442 = vmatpush1.bf16.msra.mxu0 %v8093_v16  ;;  %v6231_v16 = vld [vmem:[#allocation13 + $0x7] ss:$8 sm:$0x3] }
 0x946   :  { %6443 = vmatprep.subr.bf16.mxu0 %v8374_v0 }
 0x948   :  { %6160 = vmatpush1.bf16.msra.mxu1 %v8068_v59 }
 0x949   :  { %6161 = vmatprep.subr.bf16.mxu1 %v8073_v61  ;;  %6444 = vmatpush1.bf16.msra.mxu0 %v8094_v17 }
 0x94a   :  { %6445 = vmatprep.subr.bf16.mxu0 %v8374_v0 }
 0x94c   :  { %6162 = vmatpush1.bf16.msra.mxu1 %v8071_v39 }
 0x94d   :  { %6163 = vmatprep.subr.bf16.mxu1 %v8076_v46  ;;  %6446 = vmatpush1.bf16.msra.mxu0 %v6419_v19 }
 0x950   :  { %6164 = vmatpush1.bf16.msra.mxu1 %v8074_v62 }
 0x951   :  { %6165 = vmatprep.subr.bf16.mxu1 %v8079_v4 }
 0x954   :  { %6166 = vmatpush1.bf16.msra.mxu1 %v8077_v2 }
 0x955   :  { %6167 = vmatprep.subr.bf16.mxu1 %v8082_v44 }
 0x958   :  { %6168 = vmatpush1.bf16.msra.mxu1 %v8080_v1 }
 0x95b   :  { %6184 = vmatmul.mubr.bf16.vlgmr.msra.gmra.mrb[28].mxu1 %v5855_v6  ;;  %v6229_v6 = vld [vmem:[#allocation11 + $0x7] ss:$8 sm:$0x3] }
 0xa2e   :  { %v6185_v21 = vpop.f32.mrb[28].mxu1 }
 0xa2f   :  { %v6192_v22 = vrot.slane %v6185_v21, 4  ;;  %v6205_v24 = vmul.f32 %v6185_v21, %v6185_v21  ;;  %v6187_v25 = vpop.f32.mrb[29].mxu1 }
 0xa30   :  { %v6198_v13 = vsel %vm212_vm2, %v6187_v25, 0.0  ;;  %v6206_v26 = vmul.f32 %v6187_v25, %v6187_v25  ;;  %v6189_v28 = vpop.f32.mrb[30].mxu1 }
 0xa31   :  { %v6193_v27 = vadd.f32 %v6192_v22, %v6185_v21  ;;  %v6207_v31 = vrot.slane %v6205_v24, 4  ;;  %v6199_v32 = vrot.slane %v6198_v13, 4  ;;  %v6190_v35 = vpop.f32.mrb[31].mxu1 }
 0xa32   :  { %v6213_v0 = vsel %vm212_vm2, %v6206_v26, 0.0 }
 0xa33   :  { %v6194_v34 = vrot.slane %v6193_v27, 2  ;;  %v6208_v29 = vadd.f32 %v6207_v31, %v6205_v24  ;;  %v6200_v30 = vadd.f32 %v6199_v32, %v6198_v13  ;;  %v6214_v33 = vrot.slane %v6213_v0, 4 }
 0xa35   :  { %v6195_v37 = vadd.f32 %v6194_v34, %v6193_v27  ;;  %v6209_v36 = vrot.slane %v6208_v29, 2  ;;  %v6201_v40 = vrot.slane %v6200_v30, 2  ;;  %v6215_v38 = vadd.f32 %v6214_v33, %v6213_v0 }
 0xa37   :  { %v6196_v23 = vrot.slane %v6195_v37, 1  ;;  %v6210_v58 = vadd.f32 %v6209_v36, %v6208_v29  ;;  %v6202_v41 = vadd.f32 %v6201_v40, %v6200_v30  ;;  %v6216_v53 = vrot.slane %v6215_v38, 2 }
 0xa39   :  { %v6197_v42 = vadd.f32 %v6196_v23, %v6195_v37  ;;  %v6211_v43 = vrot.slane %v6210_v58, 1  ;;  %v6203_v50 = vrot.slane %v6202_v41, 1  ;;  %v6217_v47 = vadd.f32 %v6216_v53, %v6215_v38 }
 0xa3b   :  { %v6212_v49 = vadd.f32 %v6211_v43, %v6210_v58  ;;  %v6220_v45 = vmul.f32 0.125, %v6197_v42  ;;  %v6204_v51 = vadd.f32 %v6203_v50, %v6202_v41  ;;  %v6218_v20 = vrot.slane %v6217_v47, 1 }
 0xa3d   :  { %v6222_v52 = vmul.f32 0.125, %v6212_v49  ;;  %v6224_v56 = vmul.f32 %v6220_v45, %v6220_v45  ;;  %v6219_v60 = vadd.f32 %v6218_v20, %v6217_v47  ;;  %v6221_v59 = vmul.f32 0.125, %v6204_v51 }
 0xa3f   :  { %v6226_v61 = vsub.f32 %v6222_v52, %v6224_v56  ;;  %v6223_v39 = vmul.f32 0.125, %v6219_v60  ;;  %v6225_v46 = vmul.f32 %v6221_v59, %v6221_v59 }
 0xa41   :  { %v6232_v62 = vadd.f32 1e-05, %v6226_v61  ;;  %v6227_v4 = vsub.f32 %v6223_v39, %v6225_v46 }
 0xa43   :  { %v6233_v2 = vadd.f32 1e-05, %v6227_v4  ;;  %8148 = vrsqrt.f32 %v6232_v62 }
 0xa45   :  { %8150 = vrsqrt.f32 %v6233_v2 }
 0xa4d   :  { %v8149_v44 = vpop.eup %8148 }
 0xa4f   :  { %v8151_v57 = vpop.eup %8150 }
 0xa50   :  { %v6238_v1 = vcombine.low %v8149_v44, %v8151_v57 }
 0xa52   :  { %v6245_v5 = vrot.slane %v6238_v1, %v8551_v48 }
 0xa54   :  { %v6252_v8 = vrot.slane %v6245_v5, %v8551_v48 }
 0xa56   :  { %v6254_v7 = vmul.f32 %v6252_v8, %v6229_v6 }
 0xa58   :  { %v6259_v11 = vrot.slane %v6254_v7, %v8556_v54  ;;  %v6263_v12 = vrot.slane %v6254_v7, %v8559_v55 }
 0xa5a   :  { %v6266_v63 = vmul.f32 %v6259_v11, %v6220_v45  ;;  %v6267_v15 = vmul.f32 %v6263_v12, %v6221_v59  ;;  %v6287_v9 = vmul.f32 %v6259_v11, %v6185_v21  ;;  %v6288_v10 = vmul.f32 %v6263_v12, %v6187_v25  ;;  %v7104_v25 = vld [vmem:[#allocation14] ss:$0 sm:$0xff] }
 0xa5c   :  { %v6270_v14 = vcombine.low %v6266_v63, %v6267_v15 }
 0xa5e   :  { %v6277_v3 = vrot.slane %v6270_v14, %v8551_v48 }
 0xa60   :  { %v6284_v17 = vrot.slane %v6277_v3, %v8551_v48 }
 0xa62   :  { %v6286_v18 = vsub.f32 %v6231_v16, %v6284_v17 }
 0xa64   :  { %v6293_v19 = vrot.slane %v6286_v18, %v8556_v54  ;;  %v6297_v22 = vrot.slane %v6286_v18, %v8559_v55 }
 0xa66   :  { %v6301_v24 = vadd.f32 %v6297_v22, %v6288_v10  ;;  %v6300_v13 = vadd.f32 %v6293_v19, %v6287_v9 }
 0xa68   :  { %v6303_v26 = vmul.f32 0.01, %v6301_v24  ;;  %v6302_v28 = vmul.f32 0.01, %v6300_v13 }
 0xa6a   :  { %v6305_v27 = vmax.f32 %v6301_v24, %v6303_v26  ;;  %v6304_v31 = vmax.f32 %v6300_v13, %v6302_v28 }
 0xa6c   :  { %v6307_v32 = vpack.c.bf16 %v6305_v27, %v6305_v27  ;;  %v6306_v21 = vpack.c.bf16 %v6304_v31, %v6304_v31 }
 0xa6e   :  { %7118 = vmatprep.mubr.msk.bf16.mxu0 %vm212_vm2, %v6307_v32 }
 0xa6f   :  { %6454 = vmatmul.mubr.bf16.vlgmr.msra.gmra.mrb[28].mxu0 %v6306_v21 }
 0xb42   :  { %v6455_v48 = vpop.f32.mrb[28].mxu0 }
 0xb43   :  { %v6456_v35 = vadd.f32 %v7104_v25, %v6455_v48  ;;  %v6457_v54 = vpop.f32.mrb[29].mxu0 }
 0xb44   :  { %v6458_v55 = vpop.f32.mrb[30].mxu0 }
 0xb45   :  { %v6459_v0 = vpop.f32.mrb[31].mxu0  ;;  %6462 = vst.msk [vmem:[#allocation16] sm:$0xff] %vm6461_vm4, %v6456_v35 }
 0xb46   :  { %8339 = shalt.err (!%p8336_p12)
}
 0xb47   :  { %s8340_s22 = scalar_lea.hbm %s8968_s9, 128 }
 0xb48   :  { %p8341_p13 = scmp.ne.s32.totalorder %s8968_s9, %s8340_s22  ;;  %p8344_p0 = scmp.lt.u32.totalorder %s8340_s22, %s8968_s9 }
 0xb4a   :  { %p8346_p1 = pnand %p8344_p0, %p8341_p13 }
 0xb4c   :  { %8349 = shalt.err (!%p8346_p1)
}
 0xb4d   :  { %6472 = dma.vmem_to_hbm [thread:$0]  %s6470_s6, 128, %s8968_s9, [#allocation4]  }
 0xb4e   :  { %8360 = dma.done.wait [#allocation4], 128  }
 0xb4f   :  { %8361 = vsyncadd [#allocation4], 4294967168 }
 0xb50   :  { %6476 = vsyncpa [#allocation3], 1 }
 0xb51   :  { %6477 = vsyncpa [#allocation6], 1 }
 0xb52   :  { %6478 = vsyncpa [#allocation9], 1 }
 0xb53   :  { %6479 = vsyncpa [#allocation12], 1 }
 0xb54   :  { %6480 = vsyncpa [#allocation15], 1 }
 0xb55   :  { %6481 = vsyncpa [#allocation4], 1 }

</bundles_post_ra>
